<compile_context>
chip_gen: v7x
topology: tpu7x:2x2x1
jax: 0.10.0
libtpu: 0.0.40
codegen_flags: <defaults>
</compile_context>

<pallas_src>
import jax
import jax.numpy as jnp
from jax import lax
from jax.experimental import pallas as pl
from jax.experimental.pallas import tpu as pltpu

EPS = 1e-5                      # nn.BatchNorm2d default eps
LANE = 128                      # TPU lane width
_VMEM_LIMIT = 48 * 1024 * 1024  # explicit scoped-VMEM budget (safe on v5e/v6e/v7x)


def _round_up(x, m):
    return (x + m - 1) // m * m


def _pick_divisor(n, candidates):
    for c in candidates:
        if n % c == 0:
            return c
    return n


# ---------------------------------------------------------------------------
# Kernel 1: conv1 (3x3) + fused residual conv1x1 + BN1 statistics
# ---------------------------------------------------------------------------
def _conv1_kernel(xt0_ref, xt1_ref, xt2_ref, w1_ref, w1x1_ref,
                  y1_ref, res_ref, sum_ref, sq_ref):
    h = pl.program_id(1)

    @pl.when(h == 0)
    def _():
        sum_ref[...] = jnp.zeros_like(sum_ref)
        sq_ref[...] = jnp.zeros_like(sq_ref)

    tn, _, wp2, cin = xt0_ref.shape
    w = wp2 - 2
    cout = w1_ref.shape[-1]

    taps = (xt0_ref[:, 0], xt1_ref[:, 0], xt2_ref[:, 0])   # (tn, W+2, cin) bf16
    acc = jnp.zeros((tn * w, cout), jnp.float32)
    for di in range(3):
        t = taps[di]
        for dj in range(3):
            a = t[:, dj:dj + w, :].reshape(tn * w, cin)
            acc = acc + jnp.dot(a, w1_ref[di * 3 + dj],
                                preferred_element_type=jnp.float32)

    # Residual 1x1 conv on the already-resident center tap (real row h).
    xm = taps[1][:, 1:w + 1, :].reshape(tn * w, cin)
    res = jnp.dot(xm, w1x1_ref[...], preferred_element_type=jnp.float32)
    res_ref[...] = res.reshape(tn, 1, w, cout)

    # BN1 statistics (per-channel sum / sum-of-squares), accumulated over rows.
    sum_ref[...] += jnp.sum(acc, axis=0, keepdims=True).reshape(1, 1, cout)
    sq_ref[...] += jnp.sum(acc * acc, axis=0, keepdims=True).reshape(1, 1, cout)

    # Store raw conv1 rows with zeroed W-halo columns (consumer masks them too).
    y = acc.reshape(tn, w, cout)
    zcol = jnp.zeros((tn, 1, cout), jnp.float32)
    ypad = jnp.concatenate([zcol, y, zcol], axis=1)          # (tn, W+2, cout)
    y1_ref[...] = ypad.astype(y1_ref.dtype).reshape(tn, 1, wp2, cout)


# ---------------------------------------------------------------------------
# Kernel 2: BN1 affine + ReLU applied on the fly, conv2 (3x3), BN2 statistics
# ---------------------------------------------------------------------------
def _conv2_kernel(t0_ref, t1_ref, t2_ref, sc_ref, sh_ref, w2_ref,
                  y2_ref, sum_ref, sq_ref):
    h = pl.program_id(1)
    n_rows = pl.num_programs(1)

    @pl.when(h == 0)
    def _():
        sum_ref[...] = jnp.zeros_like(sum_ref)
        sq_ref[...] = jnp.zeros_like(sq_ref)

    tn, _, wp2, c = t0_ref.shape
    w = wp2 - 2

    scale = sc_ref[...]          # (1, c) f32
    shift = sh_ref[...]

    col = lax.broadcasted_iota(jnp.int32, (1, wp2, 1), 1)
    col_valid = jnp.logical_and(col >= 1, col <= w)

    taps = (t0_ref, t1_ref, t2_ref)
    acc = jnp.zeros((tn * w, c), jnp.float32)
    for di in range(3):
        t = taps[di][:, 0].astype(jnp.float32)               # (tn, W+2, c)
        a = jnp.maximum(t * scale + shift, 0.0)              # BN1 affine + ReLU
        # conv2 zero-pads the *post-BN* activation: mask halo rows / columns.
        row_valid = jnp.logical_and(h + di >= 1, h + di <= n_rows)
        a = jnp.where(jnp.logical_and(col_valid, row_valid), a, 0.0)
        a = a.astype(jnp.bfloat16)
        for dj in range(3):
            b = a[:, dj:dj + w, :].reshape(tn * w, c)
            acc = acc + jnp.dot(b, w2_ref[di * 3 + dj],
                                preferred_element_type=jnp.float32)

    y2_ref[...] = acc.reshape(tn, 1, w, c)
    sum_ref[...] += jnp.sum(acc, axis=0, keepdims=True).reshape(1, 1, c)
    sq_ref[...] += jnp.sum(acc * acc, axis=0, keepdims=True).reshape(1, 1, c)


# ---------------------------------------------------------------------------
# Kernel 3: BN2 affine + residual add + ReLU (elementwise, tiled over pixels)
# ---------------------------------------------------------------------------
def _finalize_kernel(y2_ref, res_ref, sc_ref, sh_ref, o_ref):
    o_ref[...] = jnp.maximum(
        y2_ref[...] * sc_ref[...] + sh_ref[...] + res_ref[...], 0.0)


# ---------------------------------------------------------------------------
# Wrapper
# ---------------------------------------------------------------------------
def res_block_forward(x_nchw, params):
    """ResBlock forward (stride=1); BatchNorm uses training-mode batch stats."""
    n, cin, hh, ww = x_nchw.shape
    cout = params["w1x1"].shape[0]
    cin_p = _round_up(cin, LANE)
    cout_p = _round_up(cout, LANE)

    tn = _pick_divisor(n, (8, 4, 2, 1))          # images per grid step
    nb = n // tn
    m = n * hh * ww

    # Input: NCHW -> NHWC, zero-pad channels to a full lane and H/W halo by 1.
    x_nhwc = jnp.transpose(x_nchw, (0, 2, 3, 1))
    xp = jnp.pad(x_nhwc, ((0, 0), (1, 1), (1, 1), (0, cin_p - cin)))
    xp = xp.astype(jnp.bfloat16)

    # Weights: torch (Cout, Cin, kh, kw) -> (9, Cin_p, Cout_p), bf16.
    def conv3x3_mat(wt, ci, ci_p):
        wt = jnp.transpose(wt, (2, 3, 1, 0))                 # (3,3,ci,cout)
        wt = jnp.pad(wt, ((0, 0), (0, 0), (0, ci_p - ci), (0, cout_p - cout)))
        return wt.reshape(9, ci_p, cout_p).astype(jnp.bfloat16)

    w1_m = conv3x3_mat(params["w1"], cin, cin_p)
    w2_m = conv3x3_mat(params["w2"], cout, cout_p)
    w1x1_m = jnp.pad(params["w1x1"].reshape(cout, cin).T,
                     ((0, cin_p - cin), (0, cout_p - cout))).astype(jnp.bfloat16)

    def pad_vec(v):
        return jnp.pad(v, (0, cout_p - cout)).reshape(1, cout_p).astype(jnp.float32)

    g1, b1 = pad_vec(params["g1"]), pad_vec(params["b1"])
    g2, b2 = pad_vec(params["g2"]), pad_vec(params["b2"])

    conv_cparams = pltpu.CompilerParams(
        dimension_semantics=("parallel", "arbitrary"),
        vmem_limit_bytes=_VMEM_LIMIT)

    def shifted_row(d):            # xp is H-padded: padded row h + d
        return lambda ni, h: (ni, h + d, 0, 0)

    def clamped_row(d, rows):      # y1 is not H-padded: clamp; consumer masks
        return lambda ni, h: (ni, jnp.clip(h + d - 1, 0, rows - 1), 0, 0)

    # ---- conv1 (3x3) + residual 1x1 + BN1 statistics -----------------------
    y1, resid, s1, q1 = pl.pallas_call(
        _conv1_kernel,
        grid=(nb, hh),
        in_specs=[
            pl.BlockSpec((tn, 1, ww + 2, cin_p), shifted_row(0)),
            pl.BlockSpec((tn, 1, ww + 2, cin_p), shifted_row(1)),
            pl.BlockSpec((tn, 1, ww + 2, cin_p), shifted_row(2)),
            pl.BlockSpec((9, cin_p, cout_p), lambda ni, h: (0, 0, 0)),
            pl.BlockSpec((cin_p, cout_p), lambda ni, h: (0, 0)),
        ],
        out_specs=[
            pl.BlockSpec((tn, 1, ww + 2, cout_p), lambda ni, h: (ni, h, 0, 0)),
            pl.BlockSpec((tn, 1, ww, cout_p), lambda ni, h: (ni, h, 0, 0)),
            pl.BlockSpec((1, 1, cout_p), lambda ni, h: (ni, 0, 0)),
            pl.BlockSpec((1, 1, cout_p), lambda ni, h: (ni, 0, 0)),
        ],
        out_shape=[
            jax.ShapeDtypeStruct((n, hh, ww + 2, cout_p), jnp.bfloat16),
            jax.ShapeDtypeStruct((n, hh, ww, cout_p), jnp.float32),
            jax.ShapeDtypeStruct((nb, 1, cout_p), jnp.float32),
            jax.ShapeDtypeStruct((nb, 1, cout_p), jnp.float32),
        ],
        compiler_params=conv_cparams,
    )(xp, xp, xp, w1_m, w1x1_m)

    # Fold BN (batch statistics) into a single per-channel scale/shift (tiny).
    cnt = float(m)

    def bn_scale_shift(s, q, g, b):
        mean = jnp.sum(s, axis=0) / cnt
        var = jnp.maximum(jnp.sum(q, axis=0) / cnt - mean * mean, 0.0)
        scale = g * lax.rsqrt(var + EPS)
        return scale, b - mean * scale

    sc1, sh1 = bn_scale_shift(s1, q1, g1, b1)

    # ---- BN1+ReLU on the fly -> conv2 (3x3) + BN2 statistics ----------------
    y2, s2, q2 = pl.pallas_call(
        _conv2_kernel,
        grid=(nb, hh),
        in_specs=[
            pl.BlockSpec((tn, 1, ww + 2, cout_p), clamped_row(0, hh)),
            pl.BlockSpec((tn, 1, ww + 2, cout_p), clamped_row(1, hh)),
            pl.BlockSpec((tn, 1, ww + 2, cout_p), clamped_row(2, hh)),
            pl.BlockSpec((1, cout_p), lambda ni, h: (0, 0)),
            pl.BlockSpec((1, cout_p), lambda ni, h: (0, 0)),
            pl.BlockSpec((9, cout_p, cout_p), lambda ni, h: (0, 0, 0)),
        ],
        out_specs=[
            pl.BlockSpec((tn, 1, ww, cout_p), lambda ni, h: (ni, h, 0, 0)),
            pl.BlockSpec((1, 1, cout_p), lambda ni, h: (ni, 0, 0)),
            pl.BlockSpec((1, 1, cout_p), lambda ni, h: (ni, 0, 0)),
        ],
        out_shape=[
            jax.ShapeDtypeStruct((n, hh, ww, cout_p), jnp.float32),
            jax.ShapeDtypeStruct((nb, 1, cout_p), jnp.float32),
            jax.ShapeDtypeStruct((nb, 1, cout_p), jnp.float32),
        ],
        compiler_params=conv_cparams,
    )(y1, y1, y1, sc1, sh1, w2_m)

    sc2, sh2 = bn_scale_shift(s2, q2, g2, b2)

    # ---- BN2 affine + residual add + ReLU (parallel elementwise pass) -------
    tm = _pick_divisor(m, (1024, 512, 256, 128, 64, 32, 16, 8))
    out = pl.pallas_call(
        _finalize_kernel,
        grid=(m // tm,),
        in_specs=[
            pl.BlockSpec((tm, cout_p), lambda i: (i, 0)),
            pl.BlockSpec((tm, cout_p), lambda i: (i, 0)),
            pl.BlockSpec((1, cout_p), lambda i: (0, 0)),
            pl.BlockSpec((1, cout_p), lambda i: (0, 0)),
        ],
        out_specs=pl.BlockSpec((tm, cout_p), lambda i: (i, 0)),
        out_shape=jax.ShapeDtypeStruct((m, cout_p), jnp.float32),
        compiler_params=pltpu.CompilerParams(
            dimension_semantics=("parallel",),
            vmem_limit_bytes=_VMEM_LIMIT),
    )(y2.reshape(m, cout_p), resid.reshape(m, cout_p), sc2, sh2)

    out = out.reshape(n, hh, ww, cout_p)[..., :cout]
    return jnp.transpose(out, (0, 3, 1, 2))


# ---------------------------------------------------------------------------
# Pure-JAX f32 reference (numerical sanity check)
# ---------------------------------------------------------------------------
def _bn_train(y_nhwc, gamma, beta):
    mean = jnp.mean(y_nhwc, axis=(0, 1, 2), keepdims=True)
    var = jnp.mean((y_nhwc - mean) ** 2, axis=(0, 1, 2), keepdims=True)
    return (y_nhwc - mean) * lax.rsqrt(var + EPS) * gamma + beta


def ref_forward(x_nchw, params):
    x = jnp.transpose(x_nchw, (0, 2, 3, 1))
    dn = ("NHWC", "HWIO", "NHWC")
    w1x1 = jnp.transpose(params["w1x1"], (2, 3, 1, 0))
    w1 = jnp.transpose(params["w1"], (2, 3, 1, 0))
    w2 = jnp.transpose(params["w2"], (2, 3, 1, 0))
    residual = lax.conv_general_dilated(x, w1x1, (1, 1), "VALID",
                                        dimension_numbers=dn)
    out = lax.conv_general_dilated(x, w1, (1, 1), ((1, 1), (1, 1)),
                                   dimension_numbers=dn)
    out = jnp.maximum(_bn_train(out, params["g1"], params["b1"]), 0.0)
    out = lax.conv_general_dilated(out, w2, (1, 1), ((1, 1), (1, 1)),
                                   dimension_numbers=dn)
    out = _bn_train(out, params["g2"], params["b2"])
    out = jnp.maximum(out + residual, 0.0)
    return jnp.transpose(out, (0, 3, 1, 2))


if __name__ == "__main__":
    # TODO(synk): BatchNorm running_mean/var buffer updates (training side
    # effect) are not modeled; forward uses batch statistics like a fresh module.
    key = jax.random.PRNGKey(0)
    k = jax.random.split(key, 4)
    N, Cin, Cout, H, W = 2, 4, 8, 16, 16   # inplanes=4, planes=8, stride=1

    x = jax.random.normal(k[0], (N, Cin, H, W), jnp.float32)
    params = {
        "w1x1": 0.2 * jax.random.normal(k[1], (Cout, Cin, 1, 1), jnp.float32),
        "w1":   0.1 * jax.random.normal(k[2], (Cout, Cin, 3, 3), jnp.float32),
        "w2":   0.1 * jax.random.normal(k[3], (Cout, Cout, 3, 3), jnp.float32),
        "g1": 1.0 + 0.10 * jnp.arange(Cout, dtype=jnp.float32),
        "b1": 0.05 * jnp.arange(Cout, dtype=jnp.float32),
        "g2": 1.0 - 0.05 * jnp.arange(Cout, dtype=jnp.float32),
        "b2": -0.02 * jnp.arange(Cout, dtype=jnp.float32),
    }

    out = jax.jit(res_block_forward)(x, params)
    out = jax.block_until_ready(out)
    assert out.shape == (N, Cout, H, W)

    ref = ref_forward(x, params)
    max_err = float(jnp.max(jnp.abs(out - ref)))
    # bf16 MXU operands -> relaxed tolerance vs the pure-f32 reference.
    assert max_err < 1e-1, f"mismatch vs reference: {max_err}"

    print("KERNEL_OK")
</pallas_src>

<mosaic_0001>
module attributes {stable_mosaic.version = 11 : i64} {
  func.func @_conv1_kernel(%arg0: i32, %arg1: i32, %arg2: memref<2x1x18x128xbf16, #tpu.memory_space<vmem>>, %arg3: memref<2x1x18x128xbf16, #tpu.memory_space<vmem>>, %arg4: memref<2x1x18x128xbf16, #tpu.memory_space<vmem>>, %arg5: memref<9x128x128xbf16, #tpu.memory_space<vmem>>, %arg6: memref<128x128xbf16, #tpu.memory_space<vmem>>, %arg7: memref<2x1x18x128xbf16, #tpu.memory_space<vmem>>, %arg8: memref<2x1x16x128xf32, #tpu.memory_space<vmem>>, %arg9: memref<1x1x128xf32, #tpu.memory_space<vmem>>, %arg10: memref<1x1x128xf32, #tpu.memory_space<vmem>>) attributes {dimension_semantics = [#tpu.dimension_semantics<parallel>, #tpu.dimension_semantics<arbitrary>], iteration_bounds = array<i64: 1, 16>, scalar_prefetch = 0 : i64, scratch_operands = 0 : i64, tpu.core_type = #tpu.core_type<tc>, window_params = [{transform_indices = @transform_0, window_bounds = array<i64: 2, 1, 18, 128>}, {transform_indices = @transform_1, window_bounds = array<i64: 2, 1, 18, 128>}, {transform_indices = @transform_2, window_bounds = array<i64: 2, 1, 18, 128>}, {pipeline_mode = #tpu.pipeline_mode<synchronous>, transform_indices = @transform_3, window_bounds = array<i64: 9, 128, 128>}, {pipeline_mode = #tpu.pipeline_mode<synchronous>, transform_indices = @transform_4, window_bounds = array<i64: 128, 128>}, {transform_indices = @transform_5, window_bounds = array<i64: 2, 1, 18, 128>}, {transform_indices = @transform_6, window_bounds = array<i64: 2, 1, 16, 128>}, {transform_indices = @transform_7, window_bounds = array<i64: 1, 1, 128>}, {transform_indices = @transform_8, window_bounds = array<i64: 1, 1, 128>}]} {
    %c0_i32 = arith.constant 0 : i32
    %0 = arith.cmpi eq, %arg1, %c0_i32 : i32
    %1 = arith.extui %0 : i1 to i32
    %c0_i32_0 = arith.constant 0 : i32
    %2 = arith.cmpi ne, %1, %c0_i32_0 : i32
    scf.if %2 {
      %cst_66 = arith.constant 0.000000e+00 : f32
      %89 = vector.broadcast %cst_66 : f32 to vector<1x1x128xf32>
      %c0_67 = arith.constant 0 : index
      %c0_68 = arith.constant 0 : index
      %c0_69 = arith.constant 0 : index
      %90 = vector.load %arg9[%c0_67, %c0_68, %c0_69] : memref<1x1x128xf32, #tpu.memory_space<vmem>>, vector<1x1x128xf32>
      tpu.vector_store %arg9[%c0_67, %c0_68, %c0_69], %89 {strides = array<i32>} : memref<1x1x128xf32, #tpu.memory_space<vmem>>, vector<1x1x128xf32>,
      %cst_70 = arith.constant 0.000000e+00 : f32
      %91 = vector.broadcast %cst_70 : f32 to vector<1x1x128xf32>
      %c0_71 = arith.constant 0 : index
      %c0_72 = arith.constant 0 : index
      %c0_73 = arith.constant 0 : index
      %92 = vector.load %arg10[%c0_71, %c0_72, %c0_73] : memref<1x1x128xf32, #tpu.memory_space<vmem>>, vector<1x1x128xf32>
      tpu.vector_store %arg10[%c0_71, %c0_72, %c0_73], %91 {strides = array<i32>} : memref<1x1x128xf32, #tpu.memory_space<vmem>>, vector<1x1x128xf32>,
    } else {
    }
    %c0 = arith.constant 0 : index
    %c0_1 = arith.constant 0 : index
    %c0_2 = arith.constant 0 : index
    %c0_3 = arith.constant 0 : index
    %3 = vector.load %arg2[%c0, %c0_1, %c0_2, %c0_3] : memref<2x1x18x128xbf16, #tpu.memory_space<vmem>>, vector<2x1x18x128xbf16>
    %4 = vector.shape_cast %3 : vector<2x1x18x128xbf16> to vector<2x18x128xbf16>
    %c0_4 = arith.constant 0 : index
    %c0_5 = arith.constant 0 : index
    %c0_6 = arith.constant 0 : index
    %c0_7 = arith.constant 0 : index
    %5 = vector.load %arg3[%c0_4, %c0_5, %c0_6, %c0_7] : memref<2x1x18x128xbf16, #tpu.memory_space<vmem>>, vector<2x1x18x128xbf16>
    %6 = vector.shape_cast %5 : vector<2x1x18x128xbf16> to vector<2x18x128xbf16>
    %c0_8 = arith.constant 0 : index
    %c0_9 = arith.constant 0 : index
    %c0_10 = arith.constant 0 : index
    %c0_11 = arith.constant 0 : index
    %7 = vector.load %arg4[%c0_8, %c0_9, %c0_10, %c0_11] : memref<2x1x18x128xbf16, #tpu.memory_space<vmem>>, vector<2x1x18x128xbf16>
    %8 = vector.shape_cast %7 : vector<2x1x18x128xbf16> to vector<2x18x128xbf16>
    %cst = arith.constant 0.000000e+00 : f32
    %9 = vector.broadcast %cst : f32 to vector<32x128xf32>
    %10 = vector.extract_strided_slice %4 {offsets = [0, 0, 0], sizes = [2, 16, 128], strides = [1, 1, 1]} : vector<2x18x128xbf16> to vector<2x16x128xbf16>
    %11 = vector.shape_cast %10 : vector<2x16x128xbf16> to vector<32x128xbf16>
    %c0_12 = arith.constant 0 : index
    %c0_13 = arith.constant 0 : index
    %c0_14 = arith.constant 0 : index
    %12 = vector.load %arg5[%c0_12, %c0_13, %c0_14] : memref<9x128x128xbf16, #tpu.memory_space<vmem>>, vector<1x128x128xbf16>
    %13 = vector.shape_cast %12 : vector<1x128x128xbf16> to vector<128x128xbf16>
    %cst_15 = arith.constant dense<0.000000e+00> : vector<32x128xf32>
    %14 = tpu.matmul %11, %13, %cst_15 {dimension_numbers = #tpu.dot_dimension_numbers<[1], [0], [0], [1], [0, 0, 1, 1], [], []>} : vector<32x128xbf16>, vector<128x128xbf16>, vector<32x128xf32> -> vector<32x128xf32>
    %15 = arith.addf %9, %14 : vector<32x128xf32>
    %16 = vector.extract_strided_slice %4 {offsets = [0, 1, 0], sizes = [2, 16, 128], strides = [1, 1, 1]} : vector<2x18x128xbf16> to vector<2x16x128xbf16>
    %17 = vector.shape_cast %16 : vector<2x16x128xbf16> to vector<32x128xbf16>
    %c1 = arith.constant 1 : index
    %c0_16 = arith.constant 0 : index
    %c0_17 = arith.constant 0 : index
    %18 = vector.load %arg5[%c1, %c0_16, %c0_17] : memref<9x128x128xbf16, #tpu.memory_space<vmem>>, vector<1x128x128xbf16>
    %19 = vector.shape_cast %18 : vector<1x128x128xbf16> to vector<128x128xbf16>
    %cst_18 = arith.constant dense<0.000000e+00> : vector<32x128xf32>
    %20 = tpu.matmul %17, %19, %cst_18 {dimension_numbers = #tpu.dot_dimension_numbers<[1], [0], [0], [1], [0, 0, 1, 1], [], []>} : vector<32x128xbf16>, vector<128x128xbf16>, vector<32x128xf32> -> vector<32x128xf32>
    %21 = arith.addf %15, %20 : vector<32x128xf32>
    %22 = vector.extract_strided_slice %4 {offsets = [0, 2, 0], sizes = [2, 16, 128], strides = [1, 1, 1]} : vector<2x18x128xbf16> to vector<2x16x128xbf16>
    %23 = vector.shape_cast %22 : vector<2x16x128xbf16> to vector<32x128xbf16>
    %c2 = arith.constant 2 : index
    %c0_19 = arith.constant 0 : index
    %c0_20 = arith.constant 0 : index
    %24 = vector.load %arg5[%c2, %c0_19, %c0_20] : memref<9x128x128xbf16, #tpu.memory_space<vmem>>, vector<1x128x128xbf16>
    %25 = vector.shape_cast %24 : vector<1x128x128xbf16> to vector<128x128xbf16>
    %cst_21 = arith.constant dense<0.000000e+00> : vector<32x128xf32>
    %26 = tpu.matmul %23, %25, %cst_21 {dimension_numbers = #tpu.dot_dimension_numbers<[1], [0], [0], [1], [0, 0, 1, 1], [], []>} : vector<32x128xbf16>, vector<128x128xbf16>, vector<32x128xf32> -> vector<32x128xf32>
    %27 = arith.addf %21, %26 : vector<32x128xf32>
    %28 = vector.extract_strided_slice %6 {offsets = [0, 0, 0], sizes = [2, 16, 128], strides = [1, 1, 1]} : vector<2x18x128xbf16> to vector<2x16x128xbf16>
    %29 = vector.shape_cast %28 : vector<2x16x128xbf16> to vector<32x128xbf16>
    %c3 = arith.constant 3 : index
    %c0_22 = arith.constant 0 : index
    %c0_23 = arith.constant 0 : index
    %30 = vector.load %arg5[%c3, %c0_22, %c0_23] : memref<9x128x128xbf16, #tpu.memory_space<vmem>>, vector<1x128x128xbf16>
    %31 = vector.shape_cast %30 : vector<1x128x128xbf16> to vector<128x128xbf16>
    %cst_24 = arith.constant dense<0.000000e+00> : vector<32x128xf32>
    %32 = tpu.matmul %29, %31, %cst_24 {dimension_numbers = #tpu.dot_dimension_numbers<[1], [0], [0], [1], [0, 0, 1, 1], [], []>} : vector<32x128xbf16>, vector<128x128xbf16>, vector<32x128xf32> -> vector<32x128xf32>
    %33 = arith.addf %27, %32 : vector<32x128xf32>
    %34 = vector.extract_strided_slice %6 {offsets = [0, 1, 0], sizes = [2, 16, 128], strides = [1, 1, 1]} : vector<2x18x128xbf16> to vector<2x16x128xbf16>
    %35 = vector.shape_cast %34 : vector<2x16x128xbf16> to vector<32x128xbf16>
    %c4 = arith.constant 4 : index
    %c0_25 = arith.constant 0 : index
    %c0_26 = arith.constant 0 : index
    %36 = vector.load %arg5[%c4, %c0_25, %c0_26] : memref<9x128x128xbf16, #tpu.memory_space<vmem>>, vector<1x128x128xbf16>
    %37 = vector.shape_cast %36 : vector<1x128x128xbf16> to vector<128x128xbf16>
    %cst_27 = arith.constant dense<0.000000e+00> : vector<32x128xf32>
    %38 = tpu.matmul %35, %37, %cst_27 {dimension_numbers = #tpu.dot_dimension_numbers<[1], [0], [0], [1], [0, 0, 1, 1], [], []>} : vector<32x128xbf16>, vector<128x128xbf16>, vector<32x128xf32> -> vector<32x128xf32>
    %39 = arith.addf %33, %38 : vector<32x128xf32>
    %40 = vector.extract_strided_slice %6 {offsets = [0, 2, 0], sizes = [2, 16, 128], strides = [1, 1, 1]} : vector<2x18x128xbf16> to vector<2x16x128xbf16>
    %41 = vector.shape_cast %40 : vector<2x16x128xbf16> to vector<32x128xbf16>
    %c5 = arith.constant 5 : index
    %c0_28 = arith.constant 0 : index
    %c0_29 = arith.constant 0 : index
    %42 = vector.load %arg5[%c5, %c0_28, %c0_29] : memref<9x128x128xbf16, #tpu.memory_space<vmem>>, vector<1x128x128xbf16>
    %43 = vector.shape_cast %42 : vector<1x128x128xbf16> to vector<128x128xbf16>
    %cst_30 = arith.constant dense<0.000000e+00> : vector<32x128xf32>
    %44 = tpu.matmul %41, %43, %cst_30 {dimension_numbers = #tpu.dot_dimension_numbers<[1], [0], [0], [1], [0, 0, 1, 1], [], []>} : vector<32x128xbf16>, vector<128x128xbf16>, vector<32x128xf32> -> vector<32x128xf32>
    %45 = arith.addf %39, %44 : vector<32x128xf32>
    %46 = vector.extract_strided_slice %8 {offsets = [0, 0, 0], sizes = [2, 16, 128], strides = [1, 1, 1]} : vector<2x18x128xbf16> to vector<2x16x128xbf16>
    %47 = vector.shape_cast %46 : vector<2x16x128xbf16> to vector<32x128xbf16>
    %c6 = arith.constant 6 : index
    %c0_31 = arith.constant 0 : index
    %c0_32 = arith.constant 0 : index
    %48 = vector.load %arg5[%c6, %c0_31, %c0_32] : memref<9x128x128xbf16, #tpu.memory_space<vmem>>, vector<1x128x128xbf16>
    %49 = vector.shape_cast %48 : vector<1x128x128xbf16> to vector<128x128xbf16>
    %cst_33 = arith.constant dense<0.000000e+00> : vector<32x128xf32>
    %50 = tpu.matmul %47, %49, %cst_33 {dimension_numbers = #tpu.dot_dimension_numbers<[1], [0], [0], [1], [0, 0, 1, 1], [], []>} : vector<32x128xbf16>, vector<128x128xbf16>, vector<32x128xf32> -> vector<32x128xf32>
    %51 = arith.addf %45, %50 : vector<32x128xf32>
    %52 = vector.extract_strided_slice %8 {offsets = [0, 1, 0], sizes = [2, 16, 128], strides = [1, 1, 1]} : vector<2x18x128xbf16> to vector<2x16x128xbf16>
    %53 = vector.shape_cast %52 : vector<2x16x128xbf16> to vector<32x128xbf16>
    %c7 = arith.constant 7 : index
    %c0_34 = arith.constant 0 : index
    %c0_35 = arith.constant 0 : index
    %54 = vector.load %arg5[%c7, %c0_34, %c0_35] : memref<9x128x128xbf16, #tpu.memory_space<vmem>>, vector<1x128x128xbf16>
    %55 = vector.shape_cast %54 : vector<1x128x128xbf16> to vector<128x128xbf16>
    %cst_36 = arith.constant dense<0.000000e+00> : vector<32x128xf32>
    %56 = tpu.matmul %53, %55, %cst_36 {dimension_numbers = #tpu.dot_dimension_numbers<[1], [0], [0], [1], [0, 0, 1, 1], [], []>} : vector<32x128xbf16>, vector<128x128xbf16>, vector<32x128xf32> -> vector<32x128xf32>
    %57 = arith.addf %51, %56 : vector<32x128xf32>
    %58 = vector.extract_strided_slice %8 {offsets = [0, 2, 0], sizes = [2, 16, 128], strides = [1, 1, 1]} : vector<2x18x128xbf16> to vector<2x16x128xbf16>
    %59 = vector.shape_cast %58 : vector<2x16x128xbf16> to vector<32x128xbf16>
    %c8 = arith.constant 8 : index
    %c0_37 = arith.constant 0 : index
    %c0_38 = arith.constant 0 : index
    %60 = vector.load %arg5[%c8, %c0_37, %c0_38] : memref<9x128x128xbf16, #tpu.memory_space<vmem>>, vector<1x128x128xbf16>
    %61 = vector.shape_cast %60 : vector<1x128x128xbf16> to vector<128x128xbf16>
    %cst_39 = arith.constant dense<0.000000e+00> : vector<32x128xf32>
    %62 = tpu.matmul %59, %61, %cst_39 {dimension_numbers = #tpu.dot_dimension_numbers<[1], [0], [0], [1], [0, 0, 1, 1], [], []>} : vector<32x128xbf16>, vector<128x128xbf16>, vector<32x128xf32> -> vector<32x128xf32>
    %63 = arith.addf %57, %62 : vector<32x128xf32>
    %64 = vector.extract_strided_slice %6 {offsets = [0, 1, 0], sizes = [2, 16, 128], strides = [1, 1, 1]} : vector<2x18x128xbf16> to vector<2x16x128xbf16>
    %65 = vector.shape_cast %64 : vector<2x16x128xbf16> to vector<32x128xbf16>
    %c0_40 = arith.constant 0 : index
    %c0_41 = arith.constant 0 : index
    %66 = vector.load %arg6[%c0_40, %c0_41] : memref<128x128xbf16, #tpu.memory_space<vmem>>, vector<128x128xbf16>
    %cst_42 = arith.constant dense<0.000000e+00> : vector<32x128xf32>
    %67 = tpu.matmul %65, %66, %cst_42 {dimension_numbers = #tpu.dot_dimension_numbers<[1], [0], [0], [1], [0, 0, 1, 1], [], []>} : vector<32x128xbf16>, vector<128x128xbf16>, vector<32x128xf32> -> vector<32x128xf32>
    %68 = vector.shape_cast %67 : vector<32x128xf32> to vector<2x1x16x128xf32>
    %c0_43 = arith.constant 0 : index
    %c0_44 = arith.constant 0 : index
    %c0_45 = arith.constant 0 : index
    %c0_46 = arith.constant 0 : index
    %69 = vector.load %arg8[%c0_43, %c0_44, %c0_45, %c0_46] : memref<2x1x16x128xf32, #tpu.memory_space<vmem>>, vector<2x1x16x128xf32>
    tpu.vector_store %arg8[%c0_43, %c0_44, %c0_45, %c0_46], %68 {strides = array<i32>} : memref<2x1x16x128xf32, #tpu.memory_space<vmem>>, vector<2x1x16x128xf32>,
    %c0_47 = arith.constant 0 : index
    %c0_48 = arith.constant 0 : index
    %c0_49 = arith.constant 0 : index
    %70 = vector.load %arg9[%c0_47, %c0_48, %c0_49] : memref<1x1x128xf32, #tpu.memory_space<vmem>>, vector<1x1x128xf32>
    %cst_50 = arith.constant dense<0.000000e+00> : vector<128xf32>
    %71 = vector.multi_reduction <add>, %63, %cst_50 [0] : vector<32x128xf32> to vector<128xf32>
    %72 = vector.shape_cast %71 : vector<128xf32> to vector<1x128xf32>
    %73 = vector.shape_cast %72 : vector<1x128xf32> to vector<1x1x128xf32>
    %74 = arith.addf %70, %73 : vector<1x1x128xf32>
    %c0_51 = arith.constant 0 : index
    %c0_52 = arith.constant 0 : index
    %c0_53 = arith.constant 0 : index
    %75 = vector.load %arg9[%c0_51, %c0_52, %c0_53] : memref<1x1x128xf32, #tpu.memory_space<vmem>>, vector<1x1x128xf32>
    tpu.vector_store %arg9[%c0_51, %c0_52, %c0_53], %74 {strides = array<i32>} : memref<1x1x128xf32, #tpu.memory_space<vmem>>, vector<1x1x128xf32>,
    %c0_54 = arith.constant 0 : index
    %c0_55 = arith.constant 0 : index
    %c0_56 = arith.constant 0 : index
    %76 = vector.load %arg10[%c0_54, %c0_55, %c0_56] : memref<1x1x128xf32, #tpu.memory_space<vmem>>, vector<1x1x128xf32>
    %77 = arith.mulf %63, %63 : vector<32x128xf32>
    %cst_57 = arith.constant dense<0.000000e+00> : vector<128xf32>
    %78 = vector.multi_reduction <add>, %77, %cst_57 [0] : vector<32x128xf32> to vector<128xf32>
    %79 = vector.shape_cast %78 : vector<128xf32> to vector<1x128xf32>
    %80 = vector.shape_cast %79 : vector<1x128xf32> to vector<1x1x128xf32>
    %81 = arith.addf %76, %80 : vector<1x1x128xf32>
    %c0_58 = arith.constant 0 : index
    %c0_59 = arith.constant 0 : index
    %c0_60 = arith.constant 0 : index
    %82 = vector.load %arg10[%c0_58, %c0_59, %c0_60] : memref<1x1x128xf32, #tpu.memory_space<vmem>>, vector<1x1x128xf32>
    tpu.vector_store %arg10[%c0_58, %c0_59, %c0_60], %81 {strides = array<i32>} : memref<1x1x128xf32, #tpu.memory_space<vmem>>, vector<1x1x128xf32>,
    %83 = vector.shape_cast %63 : vector<32x128xf32> to vector<2x16x128xf32>
    %cst_61 = arith.constant 0.000000e+00 : f32
    %84 = vector.broadcast %cst_61 : f32 to vector<2x1x128xf32>
    %85 = tpu.concatenate %84, %83, %84 in 1 : vector<2x1x128xf32>, vector<2x16x128xf32>, vector<2x1x128xf32> -> vector<2x18x128xf32>
    %86 = arith.truncf %85 : vector<2x18x128xf32> to vector<2x18x128xbf16>
    %87 = vector.shape_cast %86 : vector<2x18x128xbf16> to vector<2x1x18x128xbf16>
    %c0_62 = arith.constant 0 : index
    %c0_63 = arith.constant 0 : index
    %c0_64 = arith.constant 0 : index
    %c0_65 = arith.constant 0 : index
    %88 = vector.load %arg7[%c0_62, %c0_63, %c0_64, %c0_65] : memref<2x1x18x128xbf16, #tpu.memory_space<vmem>>, vector<2x1x18x128xbf16>
    tpu.vector_store %arg7[%c0_62, %c0_63, %c0_64, %c0_65], %87 {strides = array<i32>} : memref<2x1x18x128xbf16, #tpu.memory_space<vmem>>, vector<2x1x18x128xbf16>,
    return
  }
  func.func @transform_0(%arg0: i32, %arg1: i32) -> (i32, i32, i32, i32) {
    %c0_i32 = arith.constant 0 : i32
    %0 = arith.addi %arg1, %c0_i32 : i32
    %c0_i32_0 = arith.constant 0 : i32
    %c0_i32_1 = arith.constant 0 : i32
    %c0_i32_2 = arith.constant 0 : i32
    return %arg0, %0, %c0_i32_0, %c0_i32_1 : i32, i32, i32, i32
  }
  func.func @transform_1(%arg0: i32, %arg1: i32) -> (i32, i32, i32, i32) {
    %c1_i32 = arith.constant 1 : i32
    %0 = arith.addi %arg1, %c1_i32 : i32
    %c0_i32 = arith.constant 0 : i32
    %c0_i32_0 = arith.constant 0 : i32
    %c0_i32_1 = arith.constant 0 : i32
    return %arg0, %0, %c0_i32, %c0_i32_0 : i32, i32, i32, i32
  }
  func.func @transform_2(%arg0: i32, %arg1: i32) -> (i32, i32, i32, i32) {
    %c2_i32 = arith.constant 2 : i32
    %0 = arith.addi %arg1, %c2_i32 : i32
    %c0_i32 = arith.constant 0 : i32
    %c0_i32_0 = arith.constant 0 : i32
    %c0_i32_1 = arith.constant 0 : i32
    return %arg0, %0, %c0_i32, %c0_i32_0 : i32, i32, i32, i32
  }
  func.func @transform_3(%arg0: i32, %arg1: i32) -> (i32, i32, i32) {
    %c0_i32 = arith.constant 0 : i32
    %c0_i32_0 = arith.constant 0 : i32
    %c0_i32_1 = arith.constant 0 : i32
    %c0_i32_2 = arith.constant 0 : i32
    return %c0_i32, %c0_i32_0, %c0_i32_1 : i32, i32, i32
  }
  func.func @transform_4(%arg0: i32, %arg1: i32) -> (i32, i32) {
    %c0_i32 = arith.constant 0 : i32
    %c0_i32_0 = arith.constant 0 : i32
    %c0_i32_1 = arith.constant 0 : i32
    return %c0_i32, %c0_i32_0 : i32, i32
  }
  func.func @transform_5(%arg0: i32, %arg1: i32) -> (i32, i32, i32, i32) {
    %c0_i32 = arith.constant 0 : i32
    %c0_i32_0 = arith.constant 0 : i32
    %c0_i32_1 = arith.constant 0 : i32
    return %arg0, %arg1, %c0_i32, %c0_i32_0 : i32, i32, i32, i32
  }
  func.func @transform_6(%arg0: i32, %arg1: i32) -> (i32, i32, i32, i32) {
    %c0_i32 = arith.constant 0 : i32
    %c0_i32_0 = arith.constant 0 : i32
    %c0_i32_1 = arith.constant 0 : i32
    return %arg0, %arg1, %c0_i32, %c0_i32_0 : i32, i32, i32, i32
  }
  func.func @transform_7(%arg0: i32, %arg1: i32) -> (i32, i32, i32) {
    %c0_i32 = arith.constant 0 : i32
    %c0_i32_0 = arith.constant 0 : i32
    %c0_i32_1 = arith.constant 0 : i32
    return %arg0, %c0_i32, %c0_i32_0 : i32, i32, i32
  }
  func.func @transform_8(%arg0: i32, %arg1: i32) -> (i32, i32, i32) {
    %c0_i32 = arith.constant 0 : i32
    %c0_i32_0 = arith.constant 0 : i32
    %c0_i32_1 = arith.constant 0 : i32
    return %arg0, %c0_i32, %c0_i32_0 : i32, i32, i32
  }
}

module attributes {stable_mosaic.version = 11 : i64} {
  func.func @_finalize_kernel(%arg0: i32, %arg1: memref<512x128xf32, #tpu.memory_space<vmem>>, %arg2: memref<512x128xf32, #tpu.memory_space<vmem>>, %arg3: memref<1x128xf32, #tpu.memory_space<vmem>>, %arg4: memref<1x128xf32, #tpu.memory_space<vmem>>, %arg5: memref<512x128xf32, #tpu.memory_space<vmem>>) attributes {dimension_semantics = [#tpu.dimension_semantics<parallel>], iteration_bounds = array<i64: 1>, scalar_prefetch = 0 : i64, scratch_operands = 0 : i64, tpu.core_type = #tpu.core_type<tc>, window_params = [{transform_indices = @transform_0, window_bounds = array<i64: 512, 128>}, {transform_indices = @transform_1, window_bounds = array<i64: 512, 128>}, {pipeline_mode = #tpu.pipeline_mode<synchronous>, transform_indices = @transform_2, window_bounds = array<i64: 1, 128>}, {pipeline_mode = #tpu.pipeline_mode<synchronous>, transform_indices = @transform_3, window_bounds = array<i64: 1, 128>}, {transform_indices = @transform_4, window_bounds = array<i64: 512, 128>}]} {
    %c0 = arith.constant 0 : index
    %c0_0 = arith.constant 0 : index
    %0 = vector.load %arg1[%c0, %c0_0] : memref<512x128xf32, #tpu.memory_space<vmem>>, vector<512x128xf32>
    %c0_1 = arith.constant 0 : index
    %c0_2 = arith.constant 0 : index
    %1 = vector.load %arg3[%c0_1, %c0_2] : memref<1x128xf32, #tpu.memory_space<vmem>>, vector<1x128xf32>
    %2 = vector.broadcast %1 : vector<1x128xf32> to vector<512x128xf32>
    %3 = arith.mulf %0, %2 : vector<512x128xf32>
    %c0_3 = arith.constant 0 : index
    %c0_4 = arith.constant 0 : index
    %4 = vector.load %arg4[%c0_3, %c0_4] : memref<1x128xf32, #tpu.memory_space<vmem>>, vector<1x128xf32>
    %5 = vector.broadcast %4 : vector<1x128xf32> to vector<512x128xf32>
    %6 = arith.addf %3, %5 : vector<512x128xf32>
    %c0_5 = arith.constant 0 : index
    %c0_6 = arith.constant 0 : index
    %7 = vector.load %arg2[%c0_5, %c0_6] : memref<512x128xf32, #tpu.memory_space<vmem>>, vector<512x128xf32>
    %8 = arith.addf %6, %7 : vector<512x128xf32>
    %cst = arith.constant 0.000000e+00 : f32
    %9 = vector.broadcast %cst : f32 to vector<512x128xf32>
    %10 = arith.maximumf %8, %9 : vector<512x128xf32>
    %c0_7 = arith.constant 0 : index
    %c0_8 = arith.constant 0 : index
    %11 = vector.load %arg5[%c0_7, %c0_8] : memref<512x128xf32, #tpu.memory_space<vmem>>, vector<512x128xf32>
    tpu.vector_store %arg5[%c0_7, %c0_8], %10 {strides = array<i32>} : memref<512x128xf32, #tpu.memory_space<vmem>>, vector<512x128xf32>,
    return
  }
  func.func @transform_0(%arg0: i32) -> (i32, i32) {
    %c0_i32 = arith.constant 0 : i32
    %c0_i32_0 = arith.constant 0 : i32
    return %arg0, %c0_i32 : i32, i32
  }
  func.func @transform_1(%arg0: i32) -> (i32, i32) {
    %c0_i32 = arith.constant 0 : i32
    %c0_i32_0 = arith.constant 0 : i32
    return %arg0, %c0_i32 : i32, i32
  }
  func.func @transform_2(%arg0: i32) -> (i32, i32) {
    %c0_i32 = arith.constant 0 : i32
    %c0_i32_0 = arith.constant 0 : i32
    %c0_i32_1 = arith.constant 0 : i32
    return %c0_i32, %c0_i32_0 : i32, i32
  }
  func.func @transform_3(%arg0: i32) -> (i32, i32) {
    %c0_i32 = arith.constant 0 : i32
    %c0_i32_0 = arith.constant 0 : i32
    %c0_i32_1 = arith.constant 0 : i32
    return %c0_i32, %c0_i32_0 : i32, i32
  }
  func.func @transform_4(%arg0: i32) -> (i32, i32) {
    %c0_i32 = arith.constant 0 : i32
    %c0_i32_0 = arith.constant 0 : i32
    return %arg0, %c0_i32 : i32, i32
  }
}

module attributes {stable_mosaic.version = 11 : i64} {
  func.func @_conv2_kernel(%arg0: i32, %arg1: i32, %arg2: memref<2x1x18x128xbf16, #tpu.memory_space<vmem>>, %arg3: memref<2x1x18x128xbf16, #tpu.memory_space<vmem>>, %arg4: memref<2x1x18x128xbf16, #tpu.memory_space<vmem>>, %arg5: memref<1x128xf32, #tpu.memory_space<vmem>>, %arg6: memref<1x128xf32, #tpu.memory_space<vmem>>, %arg7: memref<9x128x128xbf16, #tpu.memory_space<vmem>>, %arg8: memref<2x1x16x128xf32, #tpu.memory_space<vmem>>, %arg9: memref<1x1x128xf32, #tpu.memory_space<vmem>>, %arg10: memref<1x1x128xf32, #tpu.memory_space<vmem>>) attributes {dimension_semantics = [#tpu.dimension_semantics<parallel>, #tpu.dimension_semantics<arbitrary>], iteration_bounds = array<i64: 1, 16>, scalar_prefetch = 0 : i64, scratch_operands = 0 : i64, tpu.core_type = #tpu.core_type<tc>, window_params = [{transform_indices = @transform_0, window_bounds = array<i64: 2, 1, 18, 128>}, {transform_indices = @transform_1, window_bounds = array<i64: 2, 1, 18, 128>}, {transform_indices = @transform_2, window_bounds = array<i64: 2, 1, 18, 128>}, {pipeline_mode = #tpu.pipeline_mode<synchronous>, transform_indices = @transform_3, window_bounds = array<i64: 1, 128>}, {pipeline_mode = #tpu.pipeline_mode<synchronous>, transform_indices = @transform_4, window_bounds = array<i64: 1, 128>}, {pipeline_mode = #tpu.pipeline_mode<synchronous>, transform_indices = @transform_5, window_bounds = array<i64: 9, 128, 128>}, {transform_indices = @transform_6, window_bounds = array<i64: 2, 1, 16, 128>}, {transform_indices = @transform_7, window_bounds = array<i64: 1, 1, 128>}, {transform_indices = @transform_8, window_bounds = array<i64: 1, 1, 128>}]} {
    %c0_i32 = arith.constant 0 : i32
    %0 = arith.cmpi eq, %arg1, %c0_i32 : i32
    %1 = arith.extui %0 : i1 to i32
    %c0_i32_0 = arith.constant 0 : i32
    %2 = arith.cmpi ne, %1, %c0_i32_0 : i32
    scf.if %2 {
      %cst_79 = arith.constant 0.000000e+00 : f32
      %150 = vector.broadcast %cst_79 : f32 to vector<1x1x128xf32>
      %c0_80 = arith.constant 0 : index
      %c0_81 = arith.constant 0 : index
      %c0_82 = arith.constant 0 : index
      %151 = vector.load %arg9[%c0_80, %c0_81, %c0_82] : memref<1x1x128xf32, #tpu.memory_space<vmem>>, vector<1x1x128xf32>
      tpu.vector_store %arg9[%c0_80, %c0_81, %c0_82], %150 {strides = array<i32>} : memref<1x1x128xf32, #tpu.memory_space<vmem>>, vector<1x1x128xf32>,
      %cst_83 = arith.constant 0.000000e+00 : f32
      %152 = vector.broadcast %cst_83 : f32 to vector<1x1x128xf32>
      %c0_84 = arith.constant 0 : index
      %c0_85 = arith.constant 0 : index
      %c0_86 = arith.constant 0 : index
      %153 = vector.load %arg10[%c0_84, %c0_85, %c0_86] : memref<1x1x128xf32, #tpu.memory_space<vmem>>, vector<1x1x128xf32>
      tpu.vector_store %arg10[%c0_84, %c0_85, %c0_86], %152 {strides = array<i32>} : memref<1x1x128xf32, #tpu.memory_space<vmem>>, vector<1x1x128xf32>,
    } else {
    }
    %c0 = arith.constant 0 : index
    %c0_1 = arith.constant 0 : index
    %3 = vector.load %arg5[%c0, %c0_1] : memref<1x128xf32, #tpu.memory_space<vmem>>, vector<1x128xf32>
    %c0_2 = arith.constant 0 : index
    %c0_3 = arith.constant 0 : index
    %4 = vector.load %arg6[%c0_2, %c0_3] : memref<1x128xf32, #tpu.memory_space<vmem>>, vector<1x128xf32>
    %5 = tpu.iota {dimensions = array<i32: 1>} : vector<1x18x1xi32>
    %c1_i32 = arith.constant 1 : i32
    %6 = vector.broadcast %c1_i32 : i32 to vector<1x18x1xi32>
    %7 = arith.cmpi sge, %5, %6 : vector<1x18x1xi32>
    %c16_i32 = arith.constant 16 : i32
    %8 = vector.broadcast %c16_i32 : i32 to vector<1x18x1xi32>
    %9 = arith.cmpi sle, %5, %8 : vector<1x18x1xi32>
    %10 = arith.andi %7, %9 : vector<1x18x1xi1>
    %cst = arith.constant 0.000000e+00 : f32
    %11 = vector.broadcast %cst : f32 to vector<32x128xf32>
    %c0_4 = arith.constant 0 : index
    %c0_5 = arith.constant 0 : index
    %c0_6 = arith.constant 0 : index
    %c0_7 = arith.constant 0 : index
    %12 = vector.load %arg2[%c0_4, %c0_5, %c0_6, %c0_7] : memref<2x1x18x128xbf16, #tpu.memory_space<vmem>>, vector<2x1x18x128xbf16>
    %13 = vector.shape_cast %12 : vector<2x1x18x128xbf16> to vector<2x18x128xbf16>
    %14 = arith.extf %13 : vector<2x18x128xbf16> to vector<2x18x128xf32>
    %15 = vector.shape_cast %3 : vector<1x128xf32> to vector<1x1x128xf32>
    %16 = vector.broadcast %15 : vector<1x1x128xf32> to vector<2x18x128xf32>
    %17 = arith.mulf %14, %16 : vector<2x18x128xf32>
    %18 = vector.shape_cast %4 : vector<1x128xf32> to vector<1x1x128xf32>
    %19 = vector.broadcast %18 : vector<1x1x128xf32> to vector<2x18x128xf32>
    %20 = arith.addf %17, %19 : vector<2x18x128xf32>
    %cst_8 = arith.constant 0.000000e+00 : f32
    %21 = vector.broadcast %cst_8 : f32 to vector<2x18x128xf32>
    %22 = arith.maximumf %20, %21 : vector<2x18x128xf32>
    %c0_i32_9 = arith.constant 0 : i32
    %23 = arith.addi %arg1, %c0_i32_9 : i32
    %c1_i32_10 = arith.constant 1 : i32
    %24 = arith.cmpi sge, %23, %c1_i32_10 : i32
    %c0_i32_11 = arith.constant 0 : i32
    %25 = arith.addi %arg1, %c0_i32_11 : i32
    %c16_i32_12 = arith.constant 16 : i32
    %26 = arith.cmpi sle, %25, %c16_i32_12 : i32
    %27 = arith.andi %24, %26 : i1
    %28 = vector.broadcast %27 : i1 to vector<1x18x1xi1>
    %29 = arith.andi %10, %28 : vector<1x18x1xi1>
    %cst_13 = arith.constant 0.000000e+00 : f32
    %30 = vector.shape_cast %29 : vector<1x18x1xi1> to vector<1x18x1xi1>
    %31 = vector.broadcast %30 : vector<1x18x1xi1> to vector<2x18x128xi1>
    %32 = vector.broadcast %cst_13 : f32 to vector<2x18x128xf32>
    %33 = arith.select %31, %22, %32 : vector<2x18x128xi1>, vector<2x18x128xf32>
    %34 = arith.truncf %33 : vector<2x18x128xf32> to vector<2x18x128xbf16>
    %35 = vector.extract_strided_slice %34 {offsets = [0, 0, 0], sizes = [2, 16, 128], strides = [1, 1, 1]} : vector<2x18x128xbf16> to vector<2x16x128xbf16>
    %36 = vector.shape_cast %35 : vector<2x16x128xbf16> to vector<32x128xbf16>
    %c0_14 = arith.constant 0 : index
    %c0_15 = arith.constant 0 : index
    %c0_16 = arith.constant 0 : index
    %37 = vector.load %arg7[%c0_14, %c0_15, %c0_16] : memref<9x128x128xbf16, #tpu.memory_space<vmem>>, vector<1x128x128xbf16>
    %38 = vector.shape_cast %37 : vector<1x128x128xbf16> to vector<128x128xbf16>
    %cst_17 = arith.constant dense<0.000000e+00> : vector<32x128xf32>
    %39 = tpu.matmul %36, %38, %cst_17 {dimension_numbers = #tpu.dot_dimension_numbers<[1], [0], [0], [1], [0, 0, 1, 1], [], []>} : vector<32x128xbf16>, vector<128x128xbf16>, vector<32x128xf32> -> vector<32x128xf32>
    %40 = arith.addf %11, %39 : vector<32x128xf32>
    %41 = vector.extract_strided_slice %34 {offsets = [0, 1, 0], sizes = [2, 16, 128], strides = [1, 1, 1]} : vector<2x18x128xbf16> to vector<2x16x128xbf16>
    %42 = vector.shape_cast %41 : vector<2x16x128xbf16> to vector<32x128xbf16>
    %c1 = arith.constant 1 : index
    %c0_18 = arith.constant 0 : index
    %c0_19 = arith.constant 0 : index
    %43 = vector.load %arg7[%c1, %c0_18, %c0_19] : memref<9x128x128xbf16, #tpu.memory_space<vmem>>, vector<1x128x128xbf16>
    %44 = vector.shape_cast %43 : vector<1x128x128xbf16> to vector<128x128xbf16>
    %cst_20 = arith.constant dense<0.000000e+00> : vector<32x128xf32>
    %45 = tpu.matmul %42, %44, %cst_20 {dimension_numbers = #tpu.dot_dimension_numbers<[1], [0], [0], [1], [0, 0, 1, 1], [], []>} : vector<32x128xbf16>, vector<128x128xbf16>, vector<32x128xf32> -> vector<32x128xf32>
    %46 = arith.addf %40, %45 : vector<32x128xf32>
    %47 = vector.extract_strided_slice %34 {offsets = [0, 2, 0], sizes = [2, 16, 128], strides = [1, 1, 1]} : vector<2x18x128xbf16> to vector<2x16x128xbf16>
    %48 = vector.shape_cast %47 : vector<2x16x128xbf16> to vector<32x128xbf16>
    %c2 = arith.constant 2 : index
    %c0_21 = arith.constant 0 : index
    %c0_22 = arith.constant 0 : index
    %49 = vector.load %arg7[%c2, %c0_21, %c0_22] : memref<9x128x128xbf16, #tpu.memory_space<vmem>>, vector<1x128x128xbf16>
    %50 = vector.shape_cast %49 : vector<1x128x128xbf16> to vector<128x128xbf16>
    %cst_23 = arith.constant dense<0.000000e+00> : vector<32x128xf32>
    %51 = tpu.matmul %48, %50, %cst_23 {dimension_numbers = #tpu.dot_dimension_numbers<[1], [0], [0], [1], [0, 0, 1, 1], [], []>} : vector<32x128xbf16>, vector<128x128xbf16>, vector<32x128xf32> -> vector<32x128xf32>
    %52 = arith.addf %46, %51 : vector<32x128xf32>
    %c0_24 = arith.constant 0 : index
    %c0_25 = arith.constant 0 : index
    %c0_26 = arith.constant 0 : index
    %c0_27 = arith.constant 0 : index
    %53 = vector.load %arg3[%c0_24, %c0_25, %c0_26, %c0_27] : memref<2x1x18x128xbf16, #tpu.memory_space<vmem>>, vector<2x1x18x128xbf16>
    %54 = vector.shape_cast %53 : vector<2x1x18x128xbf16> to vector<2x18x128xbf16>
    %55 = arith.extf %54 : vector<2x18x128xbf16> to vector<2x18x128xf32>
    %56 = vector.shape_cast %3 : vector<1x128xf32> to vector<1x1x128xf32>
    %57 = vector.broadcast %56 : vector<1x1x128xf32> to vector<2x18x128xf32>
    %58 = arith.mulf %55, %57 : vector<2x18x128xf32>
    %59 = vector.shape_cast %4 : vector<1x128xf32> to vector<1x1x128xf32>
    %60 = vector.broadcast %59 : vector<1x1x128xf32> to vector<2x18x128xf32>
    %61 = arith.addf %58, %60 : vector<2x18x128xf32>
    %cst_28 = arith.constant 0.000000e+00 : f32
    %62 = vector.broadcast %cst_28 : f32 to vector<2x18x128xf32>
    %63 = arith.maximumf %61, %62 : vector<2x18x128xf32>
    %c1_i32_29 = arith.constant 1 : i32
    %64 = arith.addi %arg1, %c1_i32_29 : i32
    %c1_i32_30 = arith.constant 1 : i32
    %65 = arith.cmpi sge, %64, %c1_i32_30 : i32
    %c1_i32_31 = arith.constant 1 : i32
    %66 = arith.addi %arg1, %c1_i32_31 : i32
    %c16_i32_32 = arith.constant 16 : i32
    %67 = arith.cmpi sle, %66, %c16_i32_32 : i32
    %68 = arith.andi %65, %67 : i1
    %69 = vector.broadcast %68 : i1 to vector<1x18x1xi1>
    %70 = arith.andi %10, %69 : vector<1x18x1xi1>
    %cst_33 = arith.constant 0.000000e+00 : f32
    %71 = vector.shape_cast %70 : vector<1x18x1xi1> to vector<1x18x1xi1>
    %72 = vector.broadcast %71 : vector<1x18x1xi1> to vector<2x18x128xi1>
    %73 = vector.broadcast %cst_33 : f32 to vector<2x18x128xf32>
    %74 = arith.select %72, %63, %73 : vector<2x18x128xi1>, vector<2x18x128xf32>
    %75 = arith.truncf %74 : vector<2x18x128xf32> to vector<2x18x128xbf16>
    %76 = vector.extract_strided_slice %75 {offsets = [0, 0, 0], sizes = [2, 16, 128], strides = [1, 1, 1]} : vector<2x18x128xbf16> to vector<2x16x128xbf16>
    %77 = vector.shape_cast %76 : vector<2x16x128xbf16> to vector<32x128xbf16>
    %c3 = arith.constant 3 : index
    %c0_34 = arith.constant 0 : index
    %c0_35 = arith.constant 0 : index
    %78 = vector.load %arg7[%c3, %c0_34, %c0_35] : memref<9x128x128xbf16, #tpu.memory_space<vmem>>, vector<1x128x128xbf16>
    %79 = vector.shape_cast %78 : vector<1x128x128xbf16> to vector<128x128xbf16>
    %cst_36 = arith.constant dense<0.000000e+00> : vector<32x128xf32>
    %80 = tpu.matmul %77, %79, %cst_36 {dimension_numbers = #tpu.dot_dimension_numbers<[1], [0], [0], [1], [0, 0, 1, 1], [], []>} : vector<32x128xbf16>, vector<128x128xbf16>, vector<32x128xf32> -> vector<32x128xf32>
    %81 = arith.addf %52, %80 : vector<32x128xf32>
    %82 = vector.extract_strided_slice %75 {offsets = [0, 1, 0], sizes = [2, 16, 128], strides = [1, 1, 1]} : vector<2x18x128xbf16> to vector<2x16x128xbf16>
    %83 = vector.shape_cast %82 : vector<2x16x128xbf16> to vector<32x128xbf16>
    %c4 = arith.constant 4 : index
    %c0_37 = arith.constant 0 : index
    %c0_38 = arith.constant 0 : index
    %84 = vector.load %arg7[%c4, %c0_37, %c0_38] : memref<9x128x128xbf16, #tpu.memory_space<vmem>>, vector<1x128x128xbf16>
    %85 = vector.shape_cast %84 : vector<1x128x128xbf16> to vector<128x128xbf16>
    %cst_39 = arith.constant dense<0.000000e+00> : vector<32x128xf32>
    %86 = tpu.matmul %83, %85, %cst_39 {dimension_numbers = #tpu.dot_dimension_numbers<[1], [0], [0], [1], [0, 0, 1, 1], [], []>} : vector<32x128xbf16>, vector<128x128xbf16>, vector<32x128xf32> -> vector<32x128xf32>
    %87 = arith.addf %81, %86 : vector<32x128xf32>
    %88 = vector.extract_strided_slice %75 {offsets = [0, 2, 0], sizes = [2, 16, 128], strides = [1, 1, 1]} : vector<2x18x128xbf16> to vector<2x16x128xbf16>
    %89 = vector.shape_cast %88 : vector<2x16x128xbf16> to vector<32x128xbf16>
    %c5 = arith.constant 5 : index
    %c0_40 = arith.constant 0 : index
    %c0_41 = arith.constant 0 : index
    %90 = vector.load %arg7[%c5, %c0_40, %c0_41] : memref<9x128x128xbf16, #tpu.memory_space<vmem>>, vector<1x128x128xbf16>
    %91 = vector.shape_cast %90 : vector<1x128x128xbf16> to vector<128x128xbf16>
    %cst_42 = arith.constant dense<0.000000e+00> : vector<32x128xf32>
    %92 = tpu.matmul %89, %91, %cst_42 {dimension_numbers = #tpu.dot_dimension_numbers<[1], [0], [0], [1], [0, 0, 1, 1], [], []>} : vector<32x128xbf16>, vector<128x128xbf16>, vector<32x128xf32> -> vector<32x128xf32>
    %93 = arith.addf %87, %92 : vector<32x128xf32>
    %c0_43 = arith.constant 0 : index
    %c0_44 = arith.constant 0 : index
    %c0_45 = arith.constant 0 : index
    %c0_46 = arith.constant 0 : index
    %94 = vector.load %arg4[%c0_43, %c0_44, %c0_45, %c0_46] : memref<2x1x18x128xbf16, #tpu.memory_space<vmem>>, vector<2x1x18x128xbf16>
    %95 = vector.shape_cast %94 : vector<2x1x18x128xbf16> to vector<2x18x128xbf16>
    %96 = arith.extf %95 : vector<2x18x128xbf16> to vector<2x18x128xf32>
    %97 = vector.shape_cast %3 : vector<1x128xf32> to vector<1x1x128xf32>
    %98 = vector.broadcast %97 : vector<1x1x128xf32> to vector<2x18x128xf32>
    %99 = arith.mulf %96, %98 : vector<2x18x128xf32>
    %100 = vector.shape_cast %4 : vector<1x128xf32> to vector<1x1x128xf32>
    %101 = vector.broadcast %100 : vector<1x1x128xf32> to vector<2x18x128xf32>
    %102 = arith.addf %99, %101 : vector<2x18x128xf32>
    %cst_47 = arith.constant 0.000000e+00 : f32
    %103 = vector.broadcast %cst_47 : f32 to vector<2x18x128xf32>
    %104 = arith.maximumf %102, %103 : vector<2x18x128xf32>
    %c2_i32 = arith.constant 2 : i32
    %105 = arith.addi %arg1, %c2_i32 : i32
    %c1_i32_48 = arith.constant 1 : i32
    %106 = arith.cmpi sge, %105, %c1_i32_48 : i32
    %c2_i32_49 = arith.constant 2 : i32
    %107 = arith.addi %arg1, %c2_i32_49 : i32
    %c16_i32_50 = arith.constant 16 : i32
    %108 = arith.cmpi sle, %107, %c16_i32_50 : i32
    %109 = arith.andi %106, %108 : i1
    %110 = vector.broadcast %109 : i1 to vector<1x18x1xi1>
    %111 = arith.andi %10, %110 : vector<1x18x1xi1>
    %cst_51 = arith.constant 0.000000e+00 : f32
    %112 = vector.shape_cast %111 : vector<1x18x1xi1> to vector<1x18x1xi1>
    %113 = vector.broadcast %112 : vector<1x18x1xi1> to vector<2x18x128xi1>
    %114 = vector.broadcast %cst_51 : f32 to vector<2x18x128xf32>
    %115 = arith.select %113, %104, %114 : vector<2x18x128xi1>, vector<2x18x128xf32>
    %116 = arith.truncf %115 : vector<2x18x128xf32> to vector<2x18x128xbf16>
    %117 = vector.extract_strided_slice %116 {offsets = [0, 0, 0], sizes = [2, 16, 128], strides = [1, 1, 1]} : vector<2x18x128xbf16> to vector<2x16x128xbf16>
    %118 = vector.shape_cast %117 : vector<2x16x128xbf16> to vector<32x128xbf16>
    %c6 = arith.constant 6 : index
    %c0_52 = arith.constant 0 : index
    %c0_53 = arith.constant 0 : index
    %119 = vector.load %arg7[%c6, %c0_52, %c0_53] : memref<9x128x128xbf16, #tpu.memory_space<vmem>>, vector<1x128x128xbf16>
    %120 = vector.shape_cast %119 : vector<1x128x128xbf16> to vector<128x128xbf16>
    %cst_54 = arith.constant dense<0.000000e+00> : vector<32x128xf32>
    %121 = tpu.matmul %118, %120, %cst_54 {dimension_numbers = #tpu.dot_dimension_numbers<[1], [0], [0], [1], [0, 0, 1, 1], [], []>} : vector<32x128xbf16>, vector<128x128xbf16>, vector<32x128xf32> -> vector<32x128xf32>
    %122 = arith.addf %93, %121 : vector<32x128xf32>
    %123 = vector.extract_strided_slice %116 {offsets = [0, 1, 0], sizes = [2, 16, 128], strides = [1, 1, 1]} : vector<2x18x128xbf16> to vector<2x16x128xbf16>
    %124 = vector.shape_cast %123 : vector<2x16x128xbf16> to vector<32x128xbf16>
    %c7 = arith.constant 7 : index
    %c0_55 = arith.constant 0 : index
    %c0_56 = arith.constant 0 : index
    %125 = vector.load %arg7[%c7, %c0_55, %c0_56] : memref<9x128x128xbf16, #tpu.memory_space<vmem>>, vector<1x128x128xbf16>
    %126 = vector.shape_cast %125 : vector<1x128x128xbf16> to vector<128x128xbf16>
    %cst_57 = arith.constant dense<0.000000e+00> : vector<32x128xf32>
    %127 = tpu.matmul %124, %126, %cst_57 {dimension_numbers = #tpu.dot_dimension_numbers<[1], [0], [0], [1], [0, 0, 1, 1], [], []>} : vector<32x128xbf16>, vector<128x128xbf16>, vector<32x128xf32> -> vector<32x128xf32>
    %128 = arith.addf %122, %127 : vector<32x128xf32>
    %129 = vector.extract_strided_slice %116 {offsets = [0, 2, 0], sizes = [2, 16, 128], strides = [1, 1, 1]} : vector<2x18x128xbf16> to vector<2x16x128xbf16>
    %130 = vector.shape_cast %129 : vector<2x16x128xbf16> to vector<32x128xbf16>
    %c8 = arith.constant 8 : index
    %c0_58 = arith.constant 0 : index
    %c0_59 = arith.constant 0 : index
    %131 = vector.load %arg7[%c8, %c0_58, %c0_59] : memref<9x128x128xbf16, #tpu.memory_space<vmem>>, vector<1x128x128xbf16>
    %132 = vector.shape_cast %131 : vector<1x128x128xbf16> to vector<128x128xbf16>
    %cst_60 = arith.constant dense<0.000000e+00> : vector<32x128xf32>
    %133 = tpu.matmul %130, %132, %cst_60 {dimension_numbers = #tpu.dot_dimension_numbers<[1], [0], [0], [1], [0, 0, 1, 1], [], []>} : vector<32x128xbf16>, vector<128x128xbf16>, vector<32x128xf32> -> vector<32x128xf32>
    %134 = arith.addf %128, %133 : vector<32x128xf32>
    %135 = vector.shape_cast %134 : vector<32x128xf32> to vector<2x1x16x128xf32>
    %c0_61 = arith.constant 0 : index
    %c0_62 = arith.constant 0 : index
    %c0_63 = arith.constant 0 : index
    %c0_64 = arith.constant 0 : index
    %136 = vector.load %arg8[%c0_61, %c0_62, %c0_63, %c0_64] : memref<2x1x16x128xf32, #tpu.memory_space<vmem>>, vector<2x1x16x128xf32>
    tpu.vector_store %arg8[%c0_61, %c0_62, %c0_63, %c0_64], %135 {strides = array<i32>} : memref<2x1x16x128xf32, #tpu.memory_space<vmem>>, vector<2x1x16x128xf32>,
    %c0_65 = arith.constant 0 : index
    %c0_66 = arith.constant 0 : index
    %c0_67 = arith.constant 0 : index
    %137 = vector.load %arg9[%c0_65, %c0_66, %c0_67] : memref<1x1x128xf32, #tpu.memory_space<vmem>>, vector<1x1x128xf32>
    %cst_68 = arith.constant dense<0.000000e+00> : vector<128xf32>
    %138 = vector.multi_reduction <add>, %134, %cst_68 [0] : vector<32x128xf32> to vector<128xf32>
    %139 = vector.shape_cast %138 : vector<128xf32> to vector<1x128xf32>
    %140 = vector.shape_cast %139 : vector<1x128xf32> to vector<1x1x128xf32>
    %141 = arith.addf %137, %140 : vector<1x1x128xf32>
    %c0_69 = arith.constant 0 : index
    %c0_70 = arith.constant 0 : index
    %c0_71 = arith.constant 0 : index
    %142 = vector.load %arg9[%c0_69, %c0_70, %c0_71] : memref<1x1x128xf32, #tpu.memory_space<vmem>>, vector<1x1x128xf32>
    tpu.vector_store %arg9[%c0_69, %c0_70, %c0_71], %141 {strides = array<i32>} : memref<1x1x128xf32, #tpu.memory_space<vmem>>, vector<1x1x128xf32>,
    %c0_72 = arith.constant 0 : index
    %c0_73 = arith.constant 0 : index
    %c0_74 = arith.constant 0 : index
    %143 = vector.load %arg10[%c0_72, %c0_73, %c0_74] : memref<1x1x128xf32, #tpu.memory_space<vmem>>, vector<1x1x128xf32>
    %144 = arith.mulf %134, %134 : vector<32x128xf32>
    %cst_75 = arith.constant dense<0.000000e+00> : vector<128xf32>
    %145 = vector.multi_reduction <add>, %144, %cst_75 [0] : vector<32x128xf32> to vector<128xf32>
    %146 = vector.shape_cast %145 : vector<128xf32> to vector<1x128xf32>
    %147 = vector.shape_cast %146 : vector<1x128xf32> to vector<1x1x128xf32>
    %148 = arith.addf %143, %147 : vector<1x1x128xf32>
    %c0_76 = arith.constant 0 : index
    %c0_77 = arith.constant 0 : index
    %c0_78 = arith.constant 0 : index
    %149 = vector.load %arg10[%c0_76, %c0_77, %c0_78] : memref<1x1x128xf32, #tpu.memory_space<vmem>>, vector<1x1x128xf32>
    tpu.vector_store %arg10[%c0_76, %c0_77, %c0_78], %148 {strides = array<i32>} : memref<1x1x128xf32, #tpu.memory_space<vmem>>, vector<1x1x128xf32>,
    return
  }
  func.func @transform_0(%arg0: i32, %arg1: i32) -> (i32, i32, i32, i32) {
    %c0_i32 = arith.constant 0 : i32
    %0 = arith.addi %arg1, %c0_i32 : i32
    %c1_i32 = arith.constant 1 : i32
    %1 = arith.subi %0, %c1_i32 : i32
    %c0_i32_0 = arith.constant 0 : i32
    %c15_i32 = arith.constant 15 : i32
    %2 = arith.maxsi %c0_i32_0, %1 : i32
    %3 = arith.minsi %c15_i32, %2 : i32
    %c0_i32_1 = arith.constant 0 : i32
    %c0_i32_2 = arith.constant 0 : i32
    %c0_i32_3 = arith.constant 0 : i32
    return %arg0, %3, %c0_i32_1, %c0_i32_2 : i32, i32, i32, i32
  }
  func.func @transform_1(%arg0: i32, %arg1: i32) -> (i32, i32, i32, i32) {
    %c1_i32 = arith.constant 1 : i32
    %0 = arith.addi %arg1, %c1_i32 : i32
    %c1_i32_0 = arith.constant 1 : i32
    %1 = arith.subi %0, %c1_i32_0 : i32
    %c0_i32 = arith.constant 0 : i32
    %c15_i32 = arith.constant 15 : i32
    %2 = arith.maxsi %c0_i32, %1 : i32
    %3 = arith.minsi %c15_i32, %2 : i32
    %c0_i32_1 = arith.constant 0 : i32
    %c0_i32_2 = arith.constant 0 : i32
    %c0_i32_3 = arith.constant 0 : i32
    return %arg0, %3, %c0_i32_1, %c0_i32_2 : i32, i32, i32, i32
  }
  func.func @transform_2(%arg0: i32, %arg1: i32) -> (i32, i32, i32, i32) {
    %c2_i32 = arith.constant 2 : i32
    %0 = arith.addi %arg1, %c2_i32 : i32
    %c1_i32 = arith.constant 1 : i32
    %1 = arith.subi %0, %c1_i32 : i32
    %c0_i32 = arith.constant 0 : i32
    %c15_i32 = arith.constant 15 : i32
    %2 = arith.maxsi %c0_i32, %1 : i32
    %3 = arith.minsi %c15_i32, %2 : i32
    %c0_i32_0 = arith.constant 0 : i32
    %c0_i32_1 = arith.constant 0 : i32
    %c0_i32_2 = arith.constant 0 : i32
    return %arg0, %3, %c0_i32_0, %c0_i32_1 : i32, i32, i32, i32
  }
  func.func @transform_3(%arg0: i32, %arg1: i32) -> (i32, i32) {
    %c0_i32 = arith.constant 0 : i32
    %c0_i32_0 = arith.constant 0 : i32
    %c0_i32_1 = arith.constant 0 : i32
    return %c0_i32, %c0_i32_0 : i32, i32
  }
  func.func @transform_4(%arg0: i32, %arg1: i32) -> (i32, i32) {
    %c0_i32 = arith.constant 0 : i32
    %c0_i32_0 = arith.constant 0 : i32
    %c0_i32_1 = arith.constant 0 : i32
    return %c0_i32, %c0_i32_0 : i32, i32
  }
  func.func @transform_5(%arg0: i32, %arg1: i32) -> (i32, i32, i32) {
    %c0_i32 = arith.constant 0 : i32
    %c0_i32_0 = arith.constant 0 : i32
    %c0_i32_1 = arith.constant 0 : i32
    %c0_i32_2 = arith.constant 0 : i32
    return %c0_i32, %c0_i32_0, %c0_i32_1 : i32, i32, i32
  }
  func.func @transform_6(%arg0: i32, %arg1: i32) -> (i32, i32, i32, i32) {
    %c0_i32 = arith.constant 0 : i32
    %c0_i32_0 = arith.constant 0 : i32
    %c0_i32_1 = arith.constant 0 : i32
    return %arg0, %arg1, %c0_i32, %c0_i32_0 : i32, i32, i32, i32
  }
  func.func @transform_7(%arg0: i32, %arg1: i32) -> (i32, i32, i32) {
    %c0_i32 = arith.constant 0 : i32
    %c0_i32_0 = arith.constant 0 : i32
    %c0_i32_1 = arith.constant 0 : i32
    return %arg0, %c0_i32, %c0_i32_0 : i32, i32, i32
  }
  func.func @transform_8(%arg0: i32, %arg1: i32) -> (i32, i32, i32) {
    %c0_i32 = arith.constant 0 : i32
    %c0_i32_0 = arith.constant 0 : i32
    %c0_i32_1 = arith.constant 0 : i32
    return %arg0, %c0_i32, %c0_i32_0 : i32, i32, i32
  }
}

</mosaic_0001>

<bundles_post_ra>
// kernel: res_block_forward.5
= control target key start
LH: loop header
LB: loop body
LE: loop exit
PB: predicated region body
PF: predicated region fallthrough
CT: control target
= control target key end

     0   :  { %s1224_s0 = inlined_call_operand.vmem [shape: f32[512,128], index: 0, kind: input, shape index: {}]   ;;  %s1225_s1 = inlined_call_operand.vmem [shape: f32[512,128], index: 1, kind: input, shape index: {}]   ;;  %s1226_s2 = inlined_call_operand.vmem [shape: f32[1,128], index: 2, kind: input, shape index: {}]   ;;  %s1227_s3 = inlined_call_operand.vmem [shape: f32[1,128], index: 3, kind: input, shape index: {}]   ;;  %s1228_s4 = inlined_call_operand.vmem [shape: f32[512,128], index: 4, kind: output, shape index: {}]  }
   0x1   :  { %v17_v0 = vld [vmem:[%s1224_s0] sm:$0xff]  ;;  %v18_v4 = vld [vmem:[%s1224_s0 + $0x8] sm:$0xff]  ;;  %v19_v7 = vld [vmem:[%s1224_s0 + $0x10] sm:$0xff] }
   0x2   :  { %v516_v1 = vld [vmem:[%s1226_s2] ss:$0 sm:$0xff]  ;;  %v20_v8 = vld [vmem:[%s1224_s0 + $0x18] sm:$0xff]  ;;  %v224_v10 = vld [vmem:[%s1225_s1 + $0x8] sm:$0xff] }
   0x3   :  { %v521_v2 = vld [vmem:[%s1227_s3] ss:$0 sm:$0xff]  ;;  %v88_v3 = vmul.f32 %v516_v1, %v17_v0  ;;  %v89_v6 = vmul.f32 %v516_v1, %v18_v4  ;;  %v90_v11 = vmul.f32 %v516_v1, %v19_v7  ;;  %v225_v12 = vld [vmem:[%s1225_s1 + $0x10] sm:$0xff]  ;;  %v91_v13 = vmul.f32 %v516_v1, %v20_v8  ;;  %v226_v16 = vld [vmem:[%s1225_s1 + $0x18] sm:$0xff] }
   0x4   :  { %v223_v5 = vld [vmem:[%s1225_s1] sm:$0xff]  ;;  %v22_v18 = vld [vmem:[%s1224_s0 + $0x28] sm:$0xff]  ;;  %v23_v19 = vld [vmem:[%s1224_s0 + $0x30] sm:$0xff] }
   0x5   :  { %v159_v9 = vadd.f32 %v521_v2, %v88_v3  ;;  %v21_v14 = vld [vmem:[%s1224_s0 + $0x20] sm:$0xff]  ;;  %v160_v15 = vadd.f32 %v521_v2, %v89_v6  ;;  %v161_v21 = vadd.f32 %v521_v2, %v90_v11  ;;  %v162_v22 = vadd.f32 %v521_v2, %v91_v13  ;;  %v24_v25 = vld [vmem:[%s1224_s0 + $0x38] sm:$0xff]  ;;  %v228_v28 = vld [vmem:[%s1225_s1 + $0x28] sm:$0xff] }
   0x6   :  { %v92_v17 = vmul.f32 %v516_v1, %v21_v14  ;;  %v227_v23 = vld [vmem:[%s1225_s1 + $0x20] sm:$0xff]  ;;  %v93_v24 = vmul.f32 %v516_v1, %v22_v18  ;;  %v94_v29 = vmul.f32 %v516_v1, %v23_v19  ;;  %v95_v30 = vmul.f32 %v516_v1, %v24_v25  ;;  %v229_v36 = vld [vmem:[%s1225_s1 + $0x30] sm:$0xff]  ;;  %v230_v37 = vld [vmem:[%s1225_s1 + $0x38] sm:$0xff] }
   0x7   :  { %v287_v20 = vadd.f32 %v223_v5, %v159_v9  ;;  %v288_v26 = vadd.f32 %v224_v10, %v160_v15  ;;  %v25_v31 = vld [vmem:[%s1224_s0 + $0x40] sm:$0xff]  ;;  %v289_v33 = vadd.f32 %v225_v12, %v161_v21  ;;  %v290_v34 = vadd.f32 %v226_v16, %v162_v22  ;;  %v26_v38 = vld [vmem:[%s1224_s0 + $0x48] sm:$0xff]  ;;  %v27_v43 = vld [vmem:[%s1224_s0 + $0x50] sm:$0xff] }
   0x8   :  { %v163_v27 = vadd.f32 %v521_v2, %v92_v17  ;;  %v164_v35 = vadd.f32 %v521_v2, %v93_v24  ;;  %v165_v41 = vadd.f32 %v521_v2, %v94_v29  ;;  %v166_v42 = vadd.f32 %v521_v2, %v95_v30  ;;  %v28_v44 = vld [vmem:[%s1224_s0 + $0x58] sm:$0xff]  ;;  %v29_v49 = vld [vmem:[%s1224_s0 + $0x60] sm:$0xff]  ;;  %v30_v55 = vld [vmem:[%s1224_s0 + $0x68] sm:$0xff] }
   0x9   :  { %v351_v32 = vmax.f32 %v287_v20, 0.0  ;;  %v352_v39 = vmax.f32 %v288_v26, 0.0  ;;  %v353_v45 = vmax.f32 %v289_v33, 0.0  ;;  %v354_v46 = vmax.f32 %v290_v34, 0.0  ;;  %v231_v53 = vld [vmem:[%s1225_s1 + $0x40] sm:$0xff]  ;;  %v232_v58 = vld [vmem:[%s1225_s1 + $0x48] sm:$0xff] }
   0xa   :  { %v291_v40 = vadd.f32 %v227_v23, %v163_v27  ;;  %v292_v47 = vadd.f32 %v228_v28, %v164_v35  ;;  %v96_v48 = vmul.f32 %v516_v1, %v25_v31  ;;  %v293_v51 = vadd.f32 %v229_v36, %v165_v41  ;;  %v31_v61 = vld [vmem:[%s1224_s0 + $0x70] sm:$0xff]  ;;  %v32_v62 = vld [vmem:[%s1224_s0 + $0x78] sm:$0xff]  ;;  %v235_v10 = vld [vmem:[%s1225_s1 + $0x60] sm:$0xff] }
   0xb   :  { %415 = vst [vmem:[%s1228_s4] sm:$0xff] %v351_v32  ;;  %416 = vst [vmem:[%s1228_s4 + $0x8] sm:$0xff] %v352_v39  ;;  %v294_v52 = vadd.f32 %v230_v37, %v166_v42  ;;  %v97_v54 = vmul.f32 %v516_v1, %v26_v38  ;;  %v98_v59 = vmul.f32 %v516_v1, %v27_v43  ;;  %v233_v4 = vld [vmem:[%s1225_s1 + $0x50] sm:$0xff]  ;;  %v234_v5 = vld [vmem:[%s1225_s1 + $0x58] sm:$0xff] }
   0xc   :  { %v355_v50 = vmax.f32 %v291_v40, 0.0  ;;  %417 = vst [vmem:[%s1228_s4 + $0x10] sm:$0xff] %v353_v45  ;;  %418 = vst [vmem:[%s1228_s4 + $0x18] sm:$0xff] %v354_v46  ;;  %v356_v56 = vmax.f32 %v292_v47, 0.0  ;;  %v167_v57 = vadd.f32 %v521_v2, %v96_v48  ;;  %v99_v60 = vmul.f32 %v516_v1, %v28_v44  ;;  %v236_v14 = vld [vmem:[%s1225_s1 + $0x68] sm:$0xff]  ;;  %v33_v17 = vld [vmem:[%s1224_s0 + $0x80] sm:$0xff] }
   0xd   :  { %v357_v63 = vmax.f32 %v293_v51, 0.0  ;;  %v358_v0 = vmax.f32 %v294_v52, 0.0  ;;  %v168_v3 = vadd.f32 %v521_v2, %v97_v54  ;;  %v100_v6 = vmul.f32 %v516_v1, %v29_v49  ;;  %v237_v22 = vld [vmem:[%s1225_s1 + $0x70] sm:$0xff]  ;;  %v238_v23 = vld [vmem:[%s1225_s1 + $0x78] sm:$0xff]  ;;  %v34_v24 = vld [vmem:[%s1224_s0 + $0x88] sm:$0xff] }
   0xe   :  { %419 = vst [vmem:[%s1228_s4 + $0x20] sm:$0xff] %v355_v50  ;;  %420 = vst [vmem:[%s1228_s4 + $0x28] sm:$0xff] %v356_v56  ;;  %v295_v7 = vadd.f32 %v231_v53, %v167_v57  ;;  %v169_v8 = vadd.f32 %v521_v2, %v98_v59  ;;  %v170_v9 = vadd.f32 %v521_v2, %v99_v60  ;;  %v35_v29 = vld [vmem:[%s1224_s0 + $0x90] sm:$0xff]  ;;  %v36_v30 = vld [vmem:[%s1224_s0 + $0x98] sm:$0xff] }
   0xf   :  { %v101_v11 = vmul.f32 %v516_v1, %v30_v55  ;;  %421 = vst [vmem:[%s1228_s4 + $0x30] sm:$0xff] %v357_v63  ;;  %422 = vst [vmem:[%s1228_s4 + $0x38] sm:$0xff] %v358_v0  ;;  %v296_v12 = vadd.f32 %v232_v58, %v168_v3  ;;  %v171_v13 = vadd.f32 %v521_v2, %v100_v6  ;;  %v37_v35 = vld [vmem:[%s1224_s0 + $0xa0] sm:$0xff]  ;;  %v38_v41 = vld [vmem:[%s1224_s0 + $0xa8] sm:$0xff] }
  0x10   :  { %v102_v15 = vmul.f32 %v516_v1, %v31_v61  ;;  %v103_v16 = vmul.f32 %v516_v1, %v32_v62  ;;  %v359_v18 = vmax.f32 %v295_v7, 0.0  ;;  %v297_v19 = vadd.f32 %v233_v4, %v169_v8  ;;  %v239_v39 = vld [vmem:[%s1225_s1 + $0x80] sm:$0xff]  ;;  %v240_v44 = vld [vmem:[%s1225_s1 + $0x88] sm:$0xff]  ;;  %v39_v47 = vld [vmem:[%s1224_s0 + $0xb0] sm:$0xff] }
  0x11   :  { %v298_v20 = vadd.f32 %v234_v5, %v170_v9  ;;  %v172_v21 = vadd.f32 %v521_v2, %v101_v11  ;;  %v360_v25 = vmax.f32 %v296_v12, 0.0  ;;  %v299_v26 = vadd.f32 %v235_v10, %v171_v13  ;;  %v40_v48 = vld [vmem:[%s1224_s0 + $0xb8] sm:$0xff]  ;;  %v241_v52 = vld [vmem:[%s1225_s1 + $0x90] sm:$0xff]  ;;  %v243_v58 = vld [vmem:[%s1225_s1 + $0xa0] sm:$0xff] }
  0x12   :  { %v173_v27 = vadd.f32 %v521_v2, %v102_v15  ;;  %v174_v28 = vadd.f32 %v521_v2, %v103_v16  ;;  %423 = vst [vmem:[%s1228_s4 + $0x40] sm:$0xff] %v359_v18  ;;  %v361_v31 = vmax.f32 %v297_v19, 0.0  ;;  %v104_v34 = vmul.f32 %v516_v1, %v33_v17  ;;  %v242_v53 = vld [vmem:[%s1225_s1 + $0x98] sm:$0xff]  ;;  %v244_v62 = vld [vmem:[%s1225_s1 + $0xa8] sm:$0xff]  ;;  %v41_v3 = vld [vmem:[%s1224_s0 + $0xc0] sm:$0xff] }
  0x13   :  { %v362_v32 = vmax.f32 %v298_v20, 0.0  ;;  %v300_v33 = vadd.f32 %v236_v14, %v172_v21  ;;  %424 = vst [vmem:[%s1228_s4 + $0x48] sm:$0xff] %v360_v25  ;;  %v363_v36 = vmax.f32 %v299_v26, 0.0  ;;  %v105_v40 = vmul.f32 %v516_v1, %v34_v24  ;;  %v245_v8 = vld [vmem:[%s1225_s1 + $0xb0] sm:$0xff]  ;;  %v246_v9 = vld [vmem:[%s1225_s1 + $0xb8] sm:$0xff]  ;;  %v42_v10 = vld [vmem:[%s1224_s0 + $0xc8] sm:$0xff] }
  0x14   :  { %v301_v37 = vadd.f32 %v237_v22, %v173_v27  ;;  %v302_v38 = vadd.f32 %v238_v23, %v174_v28  ;;  %425 = vst [vmem:[%s1228_s4 + $0x50] sm:$0xff] %v361_v31  ;;  %v175_v43 = vadd.f32 %v521_v2, %v104_v34  ;;  %v106_v45 = vmul.f32 %v516_v1, %v35_v29  ;;  %v43_v15 = vld [vmem:[%s1224_s0 + $0xd0] sm:$0xff]  ;;  %v44_v16 = vld [vmem:[%s1224_s0 + $0xd8] sm:$0xff]  ;;  %v45_v21 = vld [vmem:[%s1224_s0 + $0xe0] sm:$0xff] }
  0x15   :  { %426 = vst [vmem:[%s1228_s4 + $0x58] sm:$0xff] %v362_v32  ;;  %v364_v42 = vmax.f32 %v300_v33, 0.0  ;;  %v107_v46 = vmul.f32 %v516_v1, %v36_v30  ;;  %427 = vst [vmem:[%s1228_s4 + $0x60] sm:$0xff] %v363_v36  ;;  %v176_v51 = vadd.f32 %v521_v2, %v105_v40  ;;  %v108_v54 = vmul.f32 %v516_v1, %v37_v35  ;;  %v247_v25 = vld [vmem:[%s1225_s1 + $0xc0] sm:$0xff]  ;;  %v46_v27 = vld [vmem:[%s1224_s0 + $0xe8] sm:$0xff] }
  0x16   :  { %v365_v49 = vmax.f32 %v301_v37, 0.0  ;;  %v366_v50 = vmax.f32 %v302_v38, 0.0  ;;  %v303_v55 = vadd.f32 %v239_v39, %v175_v43  ;;  %v177_v56 = vadd.f32 %v521_v2, %v106_v45  ;;  %v248_v30 = vld [vmem:[%s1225_s1 + $0xc8] sm:$0xff]  ;;  %v47_v33 = vld [vmem:[%s1224_s0 + $0xf0] sm:$0xff]  ;;  %v48_v34 = vld [vmem:[%s1224_s0 + $0xf8] sm:$0xff] }
  0x17   :  { %428 = vst [vmem:[%s1228_s4 + $0x68] sm:$0xff] %v364_v42  ;;  %v178_v57 = vadd.f32 %v521_v2, %v107_v46  ;;  %v109_v59 = vmul.f32 %v516_v1, %v38_v41  ;;  %v304_v60 = vadd.f32 %v240_v44, %v176_v51  ;;  %v179_v61 = vadd.f32 %v521_v2, %v108_v54  ;;  %v249_v38 = vld [vmem:[%s1225_s1 + $0xd0] sm:$0xff]  ;;  %v250_v39 = vld [vmem:[%s1225_s1 + $0xd8] sm:$0xff]  ;;  %v251_v44 = vld [vmem:[%s1225_s1 + $0xe0] sm:$0xff] }
  0x18   :  { %429 = vst [vmem:[%s1228_s4 + $0x70] sm:$0xff] %v365_v49  ;;  %430 = vst [vmem:[%s1228_s4 + $0x78] sm:$0xff] %v366_v50  ;;  %v110_v63 = vmul.f32 %v516_v1, %v39_v47  ;;  %v111_v0 = vmul.f32 %v516_v1, %v40_v48  ;;  %v367_v4 = vmax.f32 %v303_v55, 0.0  ;;  %v305_v5 = vadd.f32 %v241_v52, %v177_v56  ;;  %v252_v48 = vld [vmem:[%s1225_s1 + $0xe8] sm:$0xff]  ;;  %v49_v51 = vld [vmem:[%s1224_s0 + $0x100] sm:$0xff] }
  0x19   :  { %v306_v6 = vadd.f32 %v242_v53, %v178_v57  ;;  %v180_v7 = vadd.f32 %v521_v2, %v109_v59  ;;  %v368_v11 = vmax.f32 %v304_v60, 0.0  ;;  %v307_v12 = vadd.f32 %v243_v58, %v179_v61  ;;  %v253_v56 = vld [vmem:[%s1225_s1 + $0xf0] sm:$0xff]  ;;  %v254_v57 = vld [vmem:[%s1225_s1 + $0xf8] sm:$0xff]  ;;  %v50_v58 = vld [vmem:[%s1224_s0 + $0x108] sm:$0xff] }
  0x1a   :  { %v181_v13 = vadd.f32 %v521_v2, %v110_v63  ;;  %v182_v14 = vadd.f32 %v521_v2, %v111_v0  ;;  %431 = vst [vmem:[%s1228_s4 + $0x80] sm:$0xff] %v367_v4  ;;  %v369_v17 = vmax.f32 %v305_v5, 0.0  ;;  %v112_v20 = vmul.f32 %v516_v1, %v41_v3  ;;  %v51_v63 = vld [vmem:[%s1224_s0 + $0x110] sm:$0xff]  ;;  %v52_v0 = vld [vmem:[%s1224_s0 + $0x118] sm:$0xff] }
  0x1b   :  { %v370_v18 = vmax.f32 %v306_v6, 0.0  ;;  %v308_v19 = vadd.f32 %v244_v62, %v180_v7  ;;  %432 = vst [vmem:[%s1228_s4 + $0x88] sm:$0xff] %v368_v11  ;;  %v371_v22 = vmax.f32 %v307_v12, 0.0  ;;  %v113_v26 = vmul.f32 %v516_v1, %v42_v10  ;;  %v53_v7 = vld [vmem:[%s1224_s0 + $0x120] sm:$0xff] }
  0x1c   :  { %v309_v23 = vadd.f32 %v245_v8, %v181_v13  ;;  %v310_v24 = vadd.f32 %v246_v9, %v182_v14  ;;  %433 = vst [vmem:[%s1228_s4 + $0x90] sm:$0xff] %v369_v17  ;;  %v183_v29 = vadd.f32 %v521_v2, %v112_v20  ;;  %v114_v31 = vmul.f32 %v516_v1, %v43_v15  ;;  %v255_v11 = vld [vmem:[%s1225_s1 + $0x100] sm:$0xff]  ;;  %v54_v13 = vld [vmem:[%s1224_s0 + $0x128] sm:$0xff]  ;;  %v56_v20 = vld [vmem:[%s1224_s0 + $0x138] sm:$0xff] }
  0x1d   :  { %434 = vst [vmem:[%s1228_s4 + $0x98] sm:$0xff] %v370_v18  ;;  %v372_v28 = vmax.f32 %v308_v19, 0.0  ;;  %v115_v32 = vmul.f32 %v516_v1, %v44_v16  ;;  %435 = vst [vmem:[%s1228_s4 + $0xa0] sm:$0xff] %v371_v22  ;;  %v184_v37 = vadd.f32 %v521_v2, %v113_v26  ;;  %v116_v40 = vmul.f32 %v516_v1, %v45_v21  ;;  %v256_v16 = vld [vmem:[%s1225_s1 + $0x108] sm:$0xff]  ;;  %v55_v19 = vld [vmem:[%s1224_s0 + $0x130] sm:$0xff] }
  0x1e   :  { %v373_v35 = vmax.f32 %v309_v23, 0.0  ;;  %v374_v36 = vmax.f32 %v310_v24, 0.0  ;;  %v311_v41 = vadd.f32 %v247_v25, %v183_v29  ;;  %v185_v42 = vadd.f32 %v521_v2, %v114_v31  ;;  %v257_v24 = vld [vmem:[%s1225_s1 + $0x110] sm:$0xff]  ;;  %v258_v25 = vld [vmem:[%s1225_s1 + $0x118] sm:$0xff] }
  0x1f   :  { %436 = vst [vmem:[%s1228_s4 + $0xa8] sm:$0xff] %v372_v28  ;;  %v186_v43 = vadd.f32 %v521_v2, %v115_v32  ;;  %v117_v45 = vmul.f32 %v516_v1, %v46_v27  ;;  %v312_v46 = vadd.f32 %v248_v30, %v184_v37  ;;  %v187_v47 = vadd.f32 %v521_v2, %v116_v40  ;;  %v259_v30 = vld [vmem:[%s1225_s1 + $0x120] sm:$0xff] }
  0x20   :  { %437 = vst [vmem:[%s1228_s4 + $0xb0] sm:$0xff] %v373_v35  ;;  %438 = vst [vmem:[%s1228_s4 + $0xb8] sm:$0xff] %v374_v36  ;;  %v118_v49 = vmul.f32 %v516_v1, %v47_v33  ;;  %v119_v50 = vmul.f32 %v516_v1, %v48_v34  ;;  %v375_v52 = vmax.f32 %v311_v41, 0.0  ;;  %v313_v53 = vadd.f32 %v249_v38, %v185_v42  ;;  %v260_v34 = vld [vmem:[%s1225_s1 + $0x128] sm:$0xff]  ;;  %v57_v37 = vld [vmem:[%s1224_s0 + $0x140] sm:$0xff] }
  0x21   :  { %v314_v54 = vadd.f32 %v250_v39, %v186_v43  ;;  %v188_v55 = vadd.f32 %v521_v2, %v117_v45  ;;  %v376_v59 = vmax.f32 %v312_v46, 0.0  ;;  %v315_v60 = vadd.f32 %v251_v44, %v187_v47  ;;  %v261_v42 = vld [vmem:[%s1225_s1 + $0x130] sm:$0xff]  ;;  %v262_v43 = vld [vmem:[%s1225_s1 + $0x138] sm:$0xff]  ;;  %v58_v44 = vld [vmem:[%s1224_s0 + $0x148] sm:$0xff] }
  0x22   :  { %v189_v61 = vadd.f32 %v521_v2, %v118_v49  ;;  %v190_v62 = vadd.f32 %v521_v2, %v119_v50  ;;  %439 = vst [vmem:[%s1228_s4 + $0xc0] sm:$0xff] %v375_v52  ;;  %v377_v3 = vmax.f32 %v313_v53, 0.0  ;;  %v120_v6 = vmul.f32 %v516_v1, %v49_v51  ;;  %v59_v49 = vld [vmem:[%s1224_s0 + $0x150] sm:$0xff]  ;;  %v60_v50 = vld [vmem:[%s1224_s0 + $0x158] sm:$0xff] }
  0x23   :  { %v378_v4 = vmax.f32 %v314_v54, 0.0  ;;  %v316_v5 = vadd.f32 %v252_v48, %v188_v55  ;;  %440 = vst [vmem:[%s1228_s4 + $0xc8] sm:$0xff] %v376_v59  ;;  %v379_v8 = vmax.f32 %v315_v60, 0.0  ;;  %v121_v12 = vmul.f32 %v516_v1, %v50_v58  ;;  %v61_v55 = vld [vmem:[%s1224_s0 + $0x160] sm:$0xff] }
  0x24   :  { %v317_v9 = vadd.f32 %v253_v56, %v189_v61  ;;  %v318_v10 = vadd.f32 %v254_v57, %v190_v62  ;;  %441 = vst [vmem:[%s1228_s4 + $0xd0] sm:$0xff] %v377_v3  ;;  %v191_v15 = vadd.f32 %v521_v2, %v120_v6  ;;  %v122_v17 = vmul.f32 %v516_v1, %v51_v63  ;;  %v263_v59 = vld [vmem:[%s1225_s1 + $0x140] sm:$0xff]  ;;  %v62_v61 = vld [vmem:[%s1224_s0 + $0x168] sm:$0xff]  ;;  %v64_v6 = vld [vmem:[%s1224_s0 + $0x178] sm:$0xff] }
  0x25   :  { %442 = vst [vmem:[%s1228_s4 + $0xd8] sm:$0xff] %v378_v4  ;;  %v380_v14 = vmax.f32 %v316_v5, 0.0  ;;  %v123_v18 = vmul.f32 %v516_v1, %v52_v0  ;;  %443 = vst [vmem:[%s1228_s4 + $0xe0] sm:$0xff] %v379_v8  ;;  %v192_v23 = vadd.f32 %v521_v2, %v121_v12  ;;  %v124_v26 = vmul.f32 %v516_v1, %v53_v7  ;;  %v264_v0 = vld [vmem:[%s1225_s1 + $0x148] sm:$0xff]  ;;  %v63_v5 = vld [vmem:[%s1224_s0 + $0x170] sm:$0xff] }
  0x26   :  { %v381_v21 = vmax.f32 %v317_v9, 0.0  ;;  %v382_v22 = vmax.f32 %v318_v10, 0.0  ;;  %v319_v27 = vadd.f32 %v255_v11, %v191_v15  ;;  %v193_v28 = vadd.f32 %v521_v2, %v122_v17  ;;  %v265_v10 = vld [vmem:[%s1225_s1 + $0x150] sm:$0xff]  ;;  %v266_v11 = vld [vmem:[%s1225_s1 + $0x158] sm:$0xff] }
  0x27   :  { %444 = vst [vmem:[%s1228_s4 + $0xe8] sm:$0xff] %v380_v14  ;;  %v194_v29 = vadd.f32 %v521_v2, %v123_v18  ;;  %v125_v31 = vmul.f32 %v516_v1, %v54_v13  ;;  %v320_v32 = vadd.f32 %v256_v16, %v192_v23  ;;  %v195_v33 = vadd.f32 %v521_v2, %v124_v26  ;;  %v267_v16 = vld [vmem:[%s1225_s1 + $0x160] sm:$0xff] }
  0x28   :  { %445 = vst [vmem:[%s1228_s4 + $0xf0] sm:$0xff] %v381_v21  ;;  %446 = vst [vmem:[%s1228_s4 + $0xf8] sm:$0xff] %v382_v22  ;;  %v126_v35 = vmul.f32 %v516_v1, %v55_v19  ;;  %v127_v36 = vmul.f32 %v516_v1, %v56_v20  ;;  %v383_v38 = vmax.f32 %v319_v27, 0.0  ;;  %v321_v39 = vadd.f32 %v257_v24, %v193_v28  ;;  %v268_v20 = vld [vmem:[%s1225_s1 + $0x168] sm:$0xff]  ;;  %v65_v23 = vld [vmem:[%s1224_s0 + $0x180] sm:$0xff] }
  0x29   :  { %v322_v40 = vadd.f32 %v258_v25, %v194_v29  ;;  %v196_v41 = vadd.f32 %v521_v2, %v125_v31  ;;  %v384_v45 = vmax.f32 %v320_v32, 0.0  ;;  %v323_v46 = vadd.f32 %v259_v30, %v195_v33  ;;  %v269_v28 = vld [vmem:[%s1225_s1 + $0x170] sm:$0xff]  ;;  %v270_v29 = vld [vmem:[%s1225_s1 + $0x178] sm:$0xff]  ;;  %v66_v30 = vld [vmem:[%s1224_s0 + $0x188] sm:$0xff] }
  0x2a   :  { %v197_v47 = vadd.f32 %v521_v2, %v126_v35  ;;  %v198_v48 = vadd.f32 %v521_v2, %v127_v36  ;;  %447 = vst [vmem:[%s1228_s4 + $0x100] sm:$0xff] %v383_v38  ;;  %v385_v51 = vmax.f32 %v321_v39, 0.0  ;;  %v128_v54 = vmul.f32 %v516_v1, %v57_v37  ;;  %v67_v35 = vld [vmem:[%s1224_s0 + $0x190] sm:$0xff]  ;;  %v68_v36 = vld [vmem:[%s1224_s0 + $0x198] sm:$0xff] }
  0x2b   :  { %v386_v52 = vmax.f32 %v322_v40, 0.0  ;;  %v324_v53 = vadd.f32 %v260_v34, %v196_v41  ;;  %448 = vst [vmem:[%s1228_s4 + $0x108] sm:$0xff] %v384_v45  ;;  %v387_v56 = vmax.f32 %v323_v46, 0.0  ;;  %v129_v60 = vmul.f32 %v516_v1, %v58_v44  ;;  %v69_v41 = vld [vmem:[%s1224_s0 + $0x1a0] sm:$0xff] }
  0x2c   :  { %v325_v57 = vadd.f32 %v261_v42, %v197_v47  ;;  %v326_v58 = vadd.f32 %v262_v43, %v198_v48  ;;  %449 = vst [vmem:[%s1228_s4 + $0x110] sm:$0xff] %v385_v51  ;;  %v199_v63 = vadd.f32 %v521_v2, %v128_v54  ;;  %v130_v3 = vmul.f32 %v516_v1, %v59_v49  ;;  %v271_v45 = vld [vmem:[%s1225_s1 + $0x180] sm:$0xff]  ;;  %v70_v47 = vld [vmem:[%s1224_s0 + $0x1a8] sm:$0xff]  ;;  %v72_v54 = vld [vmem:[%s1224_s0 + $0x1b8] sm:$0xff] }
  0x2d   :  { %450 = vst [vmem:[%s1228_s4 + $0x118] sm:$0xff] %v386_v52  ;;  %v388_v62 = vmax.f32 %v324_v53, 0.0  ;;  %v131_v4 = vmul.f32 %v516_v1, %v60_v50  ;;  %451 = vst [vmem:[%s1228_s4 + $0x120] sm:$0xff] %v387_v56  ;;  %v200_v9 = vadd.f32 %v521_v2, %v129_v60  ;;  %v132_v12 = vmul.f32 %v516_v1, %v61_v55  ;;  %v272_v50 = vld [vmem:[%s1225_s1 + $0x188] sm:$0xff]  ;;  %v71_v53 = vld [vmem:[%s1224_s0 + $0x1b0] sm:$0xff] }
  0x2e   :  { %v389_v7 = vmax.f32 %v325_v57, 0.0  ;;  %v390_v8 = vmax.f32 %v326_v58, 0.0  ;;  %v327_v13 = vadd.f32 %v263_v59, %v199_v63  ;;  %v201_v14 = vadd.f32 %v521_v2, %v130_v3  ;;  %v273_v58 = vld [vmem:[%s1225_s1 + $0x190] sm:$0xff]  ;;  %v274_v59 = vld [vmem:[%s1225_s1 + $0x198] sm:$0xff] }
  0x2f   :  { %452 = vst [vmem:[%s1228_s4 + $0x128] sm:$0xff] %v388_v62  ;;  %v202_v15 = vadd.f32 %v521_v2, %v131_v4  ;;  %v133_v17 = vmul.f32 %v516_v1, %v62_v61  ;;  %v328_v18 = vadd.f32 %v264_v0, %v200_v9  ;;  %v203_v19 = vadd.f32 %v521_v2, %v132_v12  ;;  %v275_v0 = vld [vmem:[%s1225_s1 + $0x1a0] sm:$0xff] }
  0x30   :  { %453 = vst [vmem:[%s1228_s4 + $0x130] sm:$0xff] %v389_v7  ;;  %454 = vst [vmem:[%s1228_s4 + $0x138] sm:$0xff] %v390_v8  ;;  %v134_v21 = vmul.f32 %v516_v1, %v63_v5  ;;  %v135_v22 = vmul.f32 %v516_v1, %v64_v6  ;;  %v391_v24 = vmax.f32 %v327_v13, 0.0  ;;  %v329_v25 = vadd.f32 %v265_v10, %v201_v14  ;;  %v276_v6 = vld [vmem:[%s1225_s1 + $0x1a8] sm:$0xff]  ;;  %v73_v9 = vld [vmem:[%s1224_s0 + $0x1c0] sm:$0xff] }
  0x31   :  { %v330_v26 = vadd.f32 %v266_v11, %v202_v15  ;;  %v204_v27 = vadd.f32 %v521_v2, %v133_v17  ;;  %v392_v31 = vmax.f32 %v328_v18, 0.0  ;;  %v331_v32 = vadd.f32 %v267_v16, %v203_v19  ;;  %v277_v14 = vld [vmem:[%s1225_s1 + $0x1b0] sm:$0xff]  ;;  %v278_v15 = vld [vmem:[%s1225_s1 + $0x1b8] sm:$0xff]  ;;  %v74_v16 = vld [vmem:[%s1224_s0 + $0x1c8] sm:$0xff] }
  0x32   :  { %v205_v33 = vadd.f32 %v521_v2, %v134_v21  ;;  %v206_v34 = vadd.f32 %v521_v2, %v135_v22  ;;  %455 = vst [vmem:[%s1228_s4 + $0x140] sm:$0xff] %v391_v24  ;;  %v393_v37 = vmax.f32 %v329_v25, 0.0  ;;  %v136_v40 = vmul.f32 %v516_v1, %v65_v23  ;;  %v75_v21 = vld [vmem:[%s1224_s0 + $0x1d0] sm:$0xff]  ;;  %v76_v22 = vld [vmem:[%s1224_s0 + $0x1d8] sm:$0xff] }
  0x33   :  { %v394_v38 = vmax.f32 %v330_v26, 0.0  ;;  %v332_v39 = vadd.f32 %v268_v20, %v204_v27  ;;  %456 = vst [vmem:[%s1228_s4 + $0x148] sm:$0xff] %v392_v31  ;;  %v395_v42 = vmax.f32 %v331_v32, 0.0  ;;  %v137_v46 = vmul.f32 %v516_v1, %v66_v30  ;;  %v77_v27 = vld [vmem:[%s1224_s0 + $0x1e0] sm:$0xff] }
  0x34   :  { %v333_v43 = vadd.f32 %v269_v28, %v205_v33  ;;  %v334_v44 = vadd.f32 %v270_v29, %v206_v34  ;;  %457 = vst [vmem:[%s1228_s4 + $0x150] sm:$0xff] %v393_v37  ;;  %v207_v49 = vadd.f32 %v521_v2, %v136_v40  ;;  %v138_v51 = vmul.f32 %v516_v1, %v67_v35  ;;  %v279_v31 = vld [vmem:[%s1225_s1 + $0x1c0] sm:$0xff]  ;;  %v78_v33 = vld [vmem:[%s1224_s0 + $0x1e8] sm:$0xff]  ;;  %v80_v40 = vld [vmem:[%s1224_s0 + $0x1f8] sm:$0xff] }
  0x35   :  { %458 = vst [vmem:[%s1228_s4 + $0x158] sm:$0xff] %v394_v38  ;;  %v396_v48 = vmax.f32 %v332_v39, 0.0  ;;  %v139_v52 = vmul.f32 %v516_v1, %v68_v36  ;;  %459 = vst [vmem:[%s1228_s4 + $0x160] sm:$0xff] %v395_v42  ;;  %v208_v57 = vadd.f32 %v521_v2, %v137_v46  ;;  %v140_v60 = vmul.f32 %v516_v1, %v69_v41  ;;  %v280_v36 = vld [vmem:[%s1225_s1 + $0x1c8] sm:$0xff]  ;;  %v79_v39 = vld [vmem:[%s1224_s0 + $0x1f0] sm:$0xff] }
  0x36   :  { %v397_v55 = vmax.f32 %v333_v43, 0.0  ;;  %v398_v56 = vmax.f32 %v334_v44, 0.0  ;;  %v335_v61 = vadd.f32 %v271_v45, %v207_v49  ;;  %v209_v62 = vadd.f32 %v521_v2, %v138_v51  ;;  %v281_v44 = vld [vmem:[%s1225_s1 + $0x1d0] sm:$0xff]  ;;  %v282_v45 = vld [vmem:[%s1225_s1 + $0x1d8] sm:$0xff] }
  0x37   :  { %460 = vst [vmem:[%s1228_s4 + $0x168] sm:$0xff] %v396_v48  ;;  %v210_v63 = vadd.f32 %v521_v2, %v139_v52  ;;  %v141_v3 = vmul.f32 %v516_v1, %v70_v47  ;;  %v336_v4 = vadd.f32 %v272_v50, %v208_v57  ;;  %v211_v5 = vadd.f32 %v521_v2, %v140_v60  ;;  %v283_v50 = vld [vmem:[%s1225_s1 + $0x1e0] sm:$0xff] }
  0x38   :  { %461 = vst [vmem:[%s1228_s4 + $0x170] sm:$0xff] %v397_v55  ;;  %462 = vst [vmem:[%s1228_s4 + $0x178] sm:$0xff] %v398_v56  ;;  %v142_v7 = vmul.f32 %v516_v1, %v71_v53  ;;  %v143_v8 = vmul.f32 %v516_v1, %v72_v54  ;;  %v399_v10 = vmax.f32 %v335_v61, 0.0  ;;  %v337_v11 = vadd.f32 %v273_v58, %v209_v62  ;;  %v284_v54 = vld [vmem:[%s1225_s1 + $0x1e8] sm:$0xff]  ;;  %v285_v61 = vld [vmem:[%s1225_s1 + $0x1f0] sm:$0xff] }
  0x39   :  { %v338_v12 = vadd.f32 %v274_v59, %v210_v63  ;;  %v212_v13 = vadd.f32 %v521_v2, %v141_v3  ;;  %v400_v17 = vmax.f32 %v336_v4, 0.0  ;;  %v339_v18 = vadd.f32 %v275_v0, %v211_v5  ;;  %v286_v62 = vld [vmem:[%s1225_s1 + $0x1f8] sm:$0xff] }
  0x3a   :  { %v213_v19 = vadd.f32 %v521_v2, %v142_v7  ;;  %v214_v20 = vadd.f32 %v521_v2, %v143_v8  ;;  %463 = vst [vmem:[%s1228_s4 + $0x180] sm:$0xff] %v399_v10  ;;  %v401_v23 = vmax.f32 %v337_v11, 0.0  ;;  %v144_v26 = vmul.f32 %v516_v1, %v73_v9 }
  0x3b   :  { %v402_v24 = vmax.f32 %v338_v12, 0.0  ;;  %v340_v25 = vadd.f32 %v276_v6, %v212_v13  ;;  %464 = vst [vmem:[%s1228_s4 + $0x188] sm:$0xff] %v400_v17  ;;  %v403_v28 = vmax.f32 %v339_v18, 0.0  ;;  %v145_v32 = vmul.f32 %v516_v1, %v74_v16 }
  0x3c   :  { %v341_v29 = vadd.f32 %v277_v14, %v213_v19  ;;  %v342_v30 = vadd.f32 %v278_v15, %v214_v20  ;;  %465 = vst [vmem:[%s1228_s4 + $0x190] sm:$0xff] %v401_v23  ;;  %v215_v35 = vadd.f32 %v521_v2, %v144_v26  ;;  %v146_v37 = vmul.f32 %v516_v1, %v75_v21 }
  0x3d   :  { %466 = vst [vmem:[%s1228_s4 + $0x198] sm:$0xff] %v402_v24  ;;  %v404_v34 = vmax.f32 %v340_v25, 0.0  ;;  %v147_v38 = vmul.f32 %v516_v1, %v76_v22  ;;  %467 = vst [vmem:[%s1228_s4 + $0x1a0] sm:$0xff] %v403_v28  ;;  %v216_v43 = vadd.f32 %v521_v2, %v145_v32  ;;  %v148_v46 = vmul.f32 %v516_v1, %v77_v27 }
  0x3e   :  { %v405_v41 = vmax.f32 %v341_v29, 0.0  ;;  %v406_v42 = vmax.f32 %v342_v30, 0.0  ;;  %v343_v47 = vadd.f32 %v279_v31, %v215_v35  ;;  %v217_v48 = vadd.f32 %v521_v2, %v146_v37 }
  0x3f   :  { %468 = vst [vmem:[%s1228_s4 + $0x1a8] sm:$0xff] %v404_v34  ;;  %v218_v49 = vadd.f32 %v521_v2, %v147_v38  ;;  %v149_v51 = vmul.f32 %v516_v1, %v78_v33  ;;  %v344_v52 = vadd.f32 %v280_v36, %v216_v43  ;;  %v219_v53 = vadd.f32 %v521_v2, %v148_v46 }
  0x40   :  { %469 = vst [vmem:[%s1228_s4 + $0x1b0] sm:$0xff] %v405_v41  ;;  %470 = vst [vmem:[%s1228_s4 + $0x1b8] sm:$0xff] %v406_v42  ;;  %v150_v55 = vmul.f32 %v516_v1, %v79_v39  ;;  %v151_v56 = vmul.f32 %v516_v1, %v80_v40  ;;  %v407_v57 = vmax.f32 %v343_v47, 0.0  ;;  %v345_v58 = vadd.f32 %v281_v44, %v217_v48 }
  0x41   :  { %v346_v59 = vadd.f32 %v282_v45, %v218_v49  ;;  %v220_v60 = vadd.f32 %v521_v2, %v149_v51  ;;  %v408_v63 = vmax.f32 %v344_v52, 0.0  ;;  %v347_v0 = vadd.f32 %v283_v50, %v219_v53 }
  0x42   :  { %v221_v3 = vadd.f32 %v521_v2, %v150_v55  ;;  %v222_v4 = vadd.f32 %v521_v2, %v151_v56  ;;  %471 = vst [vmem:[%s1228_s4 + $0x1c0] sm:$0xff] %v407_v57  ;;  %v409_v1 = vmax.f32 %v345_v58, 0.0 }
  0x43   :  { %v410_v5 = vmax.f32 %v346_v59, 0.0  ;;  %v348_v6 = vadd.f32 %v284_v54, %v220_v60  ;;  %472 = vst [vmem:[%s1228_s4 + $0x1c8] sm:$0xff] %v408_v63  ;;  %v411_v7 = vmax.f32 %v347_v0, 0.0 }
  0x44   :  { %v349_v8 = vadd.f32 %v285_v61, %v221_v3  ;;  %v350_v9 = vadd.f32 %v286_v62, %v222_v4  ;;  %473 = vst [vmem:[%s1228_s4 + $0x1d0] sm:$0xff] %v409_v1 }
  0x45   :  { %474 = vst [vmem:[%s1228_s4 + $0x1d8] sm:$0xff] %v410_v5  ;;  %v412_v2 = vmax.f32 %v348_v6, 0.0  ;;  %475 = vst [vmem:[%s1228_s4 + $0x1e0] sm:$0xff] %v411_v7 }
  0x46   :  { %v413_v10 = vmax.f32 %v349_v8, 0.0  ;;  %v414_v11 = vmax.f32 %v350_v9, 0.0 }
  0x47   :  { %476 = vst [vmem:[%s1228_s4 + $0x1e8] sm:$0xff] %v412_v2 }
  0x48   :  { %477 = vst [vmem:[%s1228_s4 + $0x1f0] sm:$0xff] %v413_v10  ;;  %478 = vst [vmem:[%s1228_s4 + $0x1f8] sm:$0xff] %v414_v11 }

// kernel: res_block_forward.3
= control target key start
LH: loop header
LB: loop body
LE: loop exit
PB: predicated region body
PF: predicated region fallthrough
CT: control target
= control target key end

     0   :  { %s4022_s0 = inlined_call_operand.vmem [shape: bf16[2,18,18,128], index: 0, kind: input, shape index: {}, may-alias: {0,1,2}]   ;;  %s4023_s1 = inlined_call_operand.vmem [shape: bf16[2,18,18,128], index: 1, kind: input, shape index: {}, may-alias: {0,1,2}]   ;;  %s4024_s2 = inlined_call_operand.vmem [shape: bf16[2,18,18,128], index: 2, kind: input, shape index: {}, may-alias: {0,1,2}]   ;;  %s4025_s3 = inlined_call_operand.vmem [shape: bf16[9,128,128], index: 3, kind: input, shape index: {}]   ;;  %s4026_s4 = inlined_call_operand.vmem [shape: bf16[128,128], index: 4, kind: input, shape index: {}]   ;;  %s4027_s5 = inlined_call_operand.vmem [shape: bf16[2,16,18,128], index: 5, kind: output, shape index: {0}]   ;;  %s4028_s6 = inlined_call_operand.vmem [shape: f32[2,16,16,128], index: 6, kind: output, shape index: {1}]   ;;  %s4029_s7 = inlined_call_operand.vmem [shape: f32[1,1,128], index: 7, kind: output, shape index: {2}]   ;;  %s4030_s8 = inlined_call_operand.vmem [shape: f32[1,1,128], index: 8, kind: output, shape index: {3}]  }
   0x1   :  { %4032 = sst [smem:[#allocation7_spill]] %s4022_s0 }
   0x2   :  { %4033 = sst [smem:[#allocation8_spill]] %s4026_s4 }
   0x3   :  { %4034 = sst [smem:[#allocation9_spill]] %s4027_s5 }
   0x4   :  { %4035 = sst [smem:[#allocation10_spill]] %s4028_s6 }
   0x5   :  { %s3367_s27 = smov 0   ;;  %s3369_s28 = smov 0  }
   0x6   :  { %s3371_s29 = smov 0   ;;  %s3373_s30 = smov 0  }
   0x7   :  { %s3375_s9 = smov 0   ;;  %s3377_s10 = smov 0  }
   0x8   :  { %s3379_s11 = smov 0   ;;  %s3381_s12 = smov 0  }
   0x9   :  { %s3383_s13 = smov 0  }
   0xa LB: > { %s2470_s14 = sadd.s32 4294967295, %s3319_s13   ;;  %s28_s15 = sadd.s32 1, %s3315_s12  ;;  %s3319_s13 = sphi %s3383_s13, %s19_s13   ;;  %s3315_s12 = sphi %s3381_s12, %s4055_s12   ;;  %s3311_s11 = sphi %s3379_s11, %s4054_s11   ;;  %s3307_s10 = sphi %s3377_s10, %s4053_s10   ;;  %s3303_s9 = sphi %s3375_s9, %s4052_s9   ;;  %s3299_s30 = sphi %s3373_s30, %s4051_s30   ;;  %s3295_s29 = sphi %s3371_s29, %s4050_s29   ;;  %s3291_s28 = sphi %s3369_s28, %s4049_s28   ;;  %s3287_s27 = sphi %s3367_s27, %s4048_s27  }
   0xb   : > { %p29_p0 = scmp.ge.s32.totalorder %s28_s15, 16  ;;  %s40_s16 = sadd.s32 1, %s3307_s10 }
   0xc   : > { %p47_p1 = scmp.ne.s32.totalorder %s3307_s10, %s3303_s9  ;;  %p48_p2 = scmp.eq.s32.totalorder %s3319_s13, 0 }
   0xd   : > { %s3418_s17 = scalar_select %p29_p0, 0, %s28_s15  }
   0xe   : > { %p3425_p3 = por %p48_p2, %p47_p1  ;;  %s70_s19 = sadd.s32 1, %s3299_s30 }
   0xf   : > { %s36_s20 = ssub.s32 %s3315_s12, %s3418_s17  ;;  %s64_s21 = sadd.s32 1, %s3418_s17 }
  0x10   : > { %p38_p4 = scmp.eq.s32.totalorder %s36_s20, 0  ;;  %s66_s22 = ssub.s32 %s28_s15, %s64_s21 }
  0x11   : > { %p68_p5 = scmp.eq.s32.totalorder %s66_s22, 0  ;;  %p77_p6 = scmp.ne.s32.totalorder %s3299_s30, %s3295_s29 }
  0x12   : > { %s3436_s23 = scalar_select %p38_p4, %s3307_s10, %s40_s16  }
  0x13   : > { %s3439_s24 = scalar_select %p68_p5, %s3299_s30, %s70_s19  }
  0x14   : > { %p3443_p7 = por %p77_p6, %p48_p2  ;;  %s93_s26 = sadd.s32 2, %s3315_s12 }
  0x15   : > { %s94_s6 = sadd.s32 2, %s3418_s17  ;;  %s100_s5 = sadd.s32 1, %s3291_s28 }
  0x16   : > { %s96_s4 = ssub.s32 %s93_s26, %s94_s6  ;;  %p107_p8 = scmp.ne.s32.totalorder %s3291_s28, %s3287_s27 }
  0x17   : > { %p98_p9 = scmp.eq.s32.totalorder %s96_s4, 0  ;;  %p181_p10 = scmp.eq.s32.totalorder %s2470_s14, 15 }
  0x18   : > { %p3454_p11 = por %p107_p8, %p48_p2  ;;  %p2473_p13 = scmp.ge.s32.totalorder %s3319_s13, 16 }
  0x19   : > { %s3459_s16 = scalar_select %p98_p9, %s3291_s28, %s100_s5  }
  0x1a   : > { %p3464_p12 = por %p181_p10, %p47_p1  ;;  %289 = sbr.rel (%p2473_p13) target bundleno = 58 (0x3a), region = 24 }
  0x21   : > { %292 = sbr.rel (!%p3425_p3) target bundleno = 44 (0x2c), region = 28  ;;  %s294_s4 = sand.u32 (%p3425_p3), 1, %s3307_s10  }
  0x22   : > { %s3083_s6 = smul.u32 (%p3425_p3), 12, %s3315_s12  ;;  %s4040_s0 = sld [smem:[#allocation7_spill]] (%p3425_p3) }
  0x23   : > { %s3082_s14 = smul.u32 (%p3425_p3), 24, %s294_s4 }
  0x25   : > { %s296_s22 = scalar_lea.vmem (%p3425_p3), [#allocation2], %s3082_s14 }
  0x28   : > { %s302_s5 = scalar_lea.vmem %s4040_s0, %s3083_s6 }
  0x29   : > { %v318_v0 = vld [vmem:[%s302_s5] sm:$0xff]   ;;  %v322_v1 = vld [vmem:[%s302_s5 + $0x8] sm:$0xf]  ;;  %v324_v2 = vld [vmem:[%s302_s5 + $0xd8] sm:$0xff]  }
  0x2a   : > { %319 = vst [vmem:[%s296_s22] sm:$0xff] %v318_v0   ;;  %323 = vst [vmem:[%s296_s22 + $0x8] sm:$0xf] %v322_v1  ;;  %v328_v3 = vld [vmem:[%s302_s5 + $0xe0] sm:$0xf] }
  0x2b   : > { %325 = vst [vmem:[%s296_s22 + $0xc] sm:$0xff] %v324_v2   ;;  %329 = vst [vmem:[%s296_s22 + $0x14] sm:$0xf] %v328_v3 }
  0x2c PF: > { %364 = sbr.rel (!%p3443_p7) target bundleno = 51 (0x33), region = 69  ;;  %s366_s18 = sand.u32 (%p3443_p7), 1, %s3299_s30  }
  0x2d   : > { %s2475_s26 = smul.u32 (%p3443_p7), 12, %s3315_s12 }
  0x2e   : > { %s3084_s4 = smul.u32 (%p3443_p7), 24, %s366_s18 }
  0x2f   : > { %s2336_s21 = scalar_lea.vmem (%p3443_p7), %s4023_s1, %s2475_s26 }
  0x30   : > { %v2476_v4 = vld [vmem:[%s2336_s21 + $0xc] sm:$0xff] (%p3443_p7)   ;;  %v2478_v5 = vld [vmem:[%s2336_s21 + $0x14] sm:$0xf] (%p3443_p7)  ;;  %v2479_v6 = vld [vmem:[%s2336_s21 + $0xe4] sm:$0xff] (%p3443_p7)   ;;  %s368_s14 = scalar_lea.vmem (%p3443_p7), [#allocation3], %s3084_s4 }
  0x31   : > { %392 = vst [vmem:[%s368_s14] sm:$0xff] (%p3443_p7), %v2476_v4   ;;  %396 = vst [vmem:[%s368_s14 + $0x8] sm:$0xf] (%p3443_p7), %v2478_v5  ;;  %v2481_v7 = vld [vmem:[%s2336_s21 + $0xec] sm:$0xf] (%p3443_p7) }
  0x32   : > { %398 = vst [vmem:[%s368_s14 + $0xc] sm:$0xff] (%p3443_p7), %v2479_v6   ;;  %402 = vst [vmem:[%s368_s14 + $0x14] sm:$0xf] (%p3443_p7), %v2481_v7 }
  0x33 PF: > { %437 = sbr.rel (!%p3454_p11) target bundleno = 58 (0x3a), region = 110  ;;  %s439_s25 = sand.u32 (%p3454_p11), 1, %s3291_s28  }
  0x34   : > { %s2482_s5 = smul.u32 (%p3454_p11), 12, %s3315_s12 }
  0x35   : > { %s3085_s22 = smul.u32 (%p3454_p11), 24, %s439_s25 }
  0x36   : > { %s2344_s20 = scalar_lea.vmem (%p3454_p11), %s4024_s2, %s2482_s5 }
  0x37   : > { %v2483_v8 = vld [vmem:[%s2344_s20 + $0x18] sm:$0xff] (%p3454_p11)   ;;  %v2485_v9 = vld [vmem:[%s2344_s20 + $0x20] sm:$0xf] (%p3454_p11)  ;;  %v2486_v10 = vld [vmem:[%s2344_s20 + $0xf0] sm:$0xff] (%p3454_p11)   ;;  %s441_s4 = scalar_lea.vmem (%p3454_p11), [#allocation4], %s3085_s22 }
  0x38   : > { %465 = vst [vmem:[%s441_s4] sm:$0xff] (%p3454_p11), %v2483_v8   ;;  %469 = vst [vmem:[%s441_s4 + $0x8] sm:$0xf] (%p3454_p11), %v2485_v9  ;;  %v2488_v11 = vld [vmem:[%s2344_s20 + $0xf8] sm:$0xf] (%p3454_p11) }
  0x39   : > { %471 = vst [vmem:[%s441_s4 + $0xc] sm:$0xff] (%p3454_p11), %v2486_v10   ;;  %475 = vst [vmem:[%s441_s4 + $0x14] sm:$0xf] (%p3454_p11), %v2488_v11 }
  0x3a PF: > { %p2489_p0 = scmp.ge.s32.totalorder %s3319_s13, 1  ;;  %p509_p1 = scmp.lt.s32.totalorder %s3319_s13, 17 }
  0x3c   : > { %p510_p2 = pnand %p2489_p0, %p509_p1 }
  0x3d   : > { %s516_s15 = sand.u32 (!%p510_p2), 1, %s3303_s9   ;;  %s523_s6 = sand.u32 (!%p510_p2), 1, %s3295_s29  }
  0x3e   : > { %513 = sbr.rel (%p510_p2) target bundleno = 493 (0x1ed), region = 151  ;;  %s530_s14 = sand.u32 (!%p510_p2), 1, %s3287_s27  }
  0x3f   : > { %s3086_s21 = smul.u32 (!%p510_p2), 24, %s516_s15  ;;  %s2490_s5 = sshll.u32 (!%p510_p2), %s516_s15, 5 }
  0x40   : > { %s3087_s25 = smul.u32 (!%p510_p2), 24, %s523_s6  ;;  %s3503_s0 = scalar_lea.vmem (!%p510_p2), [#allocation6], %s2490_s5 }
  0x41   : > { %s3088_s22 = smul.u32 (!%p510_p2), 24, %s530_s14  ;;  %s3495_s18 = scalar_lea.vmem (!%p510_p2), [#allocation2], %s3086_s21 }
  0x42   : > { %s3497_s26 = scalar_lea.vmem (!%p510_p2), [#allocation3], %s3087_s25  ;;  %s3501_s4 = scalar_lea.vmem (!%p510_p2), [#allocation5], %s3086_s21 }
  0x43   : > { %s3499_s20 = scalar_lea.vmem (!%p510_p2), [#allocation4], %s3088_s22  ;;  %p2491_p3 = scmp.ne.s32.totalorder (!%p510_p2), %s3311_s11, 0 }
  0x45   : > { %597 = sbr.rel (%p2491_p3) target bundleno = 76 (0x4c), region = 167  ;;  %v3321_v12 = vmov (!%p2491_p3), 0.0  }
  0x46   : > { %598 = vst [vmem:[%s4029_s7] sm:$0x1] (!%p2491_p3), %v3321_v12  ;;  %599 = vst [vmem:[%s4030_s8] sm:$0x1] (!%p2491_p3), %v3321_v12 }
  0x4c PF: > { %v3163_v13 = vld [vmem:[%s4025_s3 + $0x40] sm:$0xff]   ;;  %v3165_v15 = vld [vmem:[%s4025_s3 + $0x48] sm:$0xff]   ;;  %v3167_v17 = vld [vmem:[%s4025_s3 + $0x50] sm:$0xff]   ;;  %vm634_vm0 = vsmask.f32 3328  ;;  %vm918_vm3 = vcmask 1042432  }
  0x4d   : > { %v3164_v14 = vld [vmem:[%s4025_s3 + $0x100] sm:$0xff]   ;;  %2850 = vmatprep.subr.bf16.mxu1 %v3163_v13  ;;  %v3166_v16 = vld [vmem:[%s4025_s3 + $0x108] sm:$0xff]   ;;  %v3168_v18 = vld [vmem:[%s4025_s3 + $0x110] sm:$0xff]   ;;  %vm635_vm1 = vsmask.f32 7440  ;;  %vm919_vm4 = vcmask 1046532  }
  0x4e   : > { %2930 = vmatprep.subr.bf16.mxu0 %v3164_v14  ;;  %2851 = vmatpush3.bf16.msra.mxu1 %v3163_v13  ;;  %v3169_v19 = vld [vmem:[%s4025_s3 + $0x58] sm:$0xff]   ;;  %v3171_v21 = vld [vmem:[%s4025_s3 + $0x60] sm:$0xff]   ;;  %v3173_v23 = vld [vmem:[%s4025_s3 + $0x68] sm:$0xff]   ;;  %s4045_s14 = sld [smem:[#allocation8_spill]]  ;;  %vm2102_vm6 = vcmask 1040384   ;;  %s4046_s9 = sld [smem:[#allocation9_spill]] (%p3464_p12) }
  0x4f   : > { %2931 = vmatpush3.bf16.msra.mxu0 %v3164_v14  ;;  %2852 = vmatprep.subr.bf16.mxu1 %v3165_v15  ;;  %v3170_v20 = vld [vmem:[%s4025_s3 + $0x118] sm:$0xff]   ;;  %v3172_v22 = vld [vmem:[%s4025_s3 + $0x120] sm:$0xff]   ;;  %v3174_v27 = vld [vmem:[%s4025_s3 + $0x128] sm:$0xff]  }
  0x50   : > { %2932 = vmatprep.subr.bf16.mxu0 %v3166_v16  ;;  %v3546_v24 = vld [vmem:[%s3495_s18] sm:$0xf]  ;;  %v3549_v25 = vld [vmem:[%s3495_s18 + $0x4] sm:$0xf]  ;;  %v3552_v26 = vld [vmem:[%s3495_s18 + $0x8] sm:$0x1] }
  0x51   : > { %v638_v28 = vshrl.u32 %v3546_v24, 16  ;;  %v641_v29 = vshll.u32 %v3546_v24, 16  ;;  %v3175_v30 = vld [vmem:[%s4025_s3 + $0x70] sm:$0xff]   ;;  %v647_v31 = vshll.u32 %v3549_v25, 16  ;;  %v651_v32 = vshrl.u32 %v3549_v25, 16  ;;  %v3177_v46 = vld [vmem:[%s4025_s3 + $0x78] sm:$0xff]   ;;  %vm3584_vm2 = vmor %vm634_vm0, %vm635_vm1 }
  0x52   : > { %2853 = vmatpush3.bf16.msra.mxu1 %v3165_v15  ;;  %v657_v33 = vshll.u32 %v3552_v26, 16  ;;  %v3176_v36 = vld [vmem:[%s4025_s3 + $0x130] sm:$0xff]   ;;  %v3178_v52 = vld [vmem:[%s4025_s3 + $0x138] sm:$0xff]   ;;  %v3597_v61 = vld [vmem:[%s3495_s18 + $0xc] sm:$0xf] }
  0x53   : > { %2933 = vmatpush3.bf16.msra.mxu0 %v3166_v16  ;;  %2854 = vmatprep.subr.bf16.mxu1 %v3167_v17  ;;  %v640_v34 = vrot.slane %v638_v28, 4  ;;  %v643_v35 = vrot.slane %v641_v29, 5  ;;  %v649_v37 = vrot.slane %v647_v31, 5  ;;  %v653_v38 = vrot.slane %v651_v32, 4  ;;  %v3569_v40 = vld [vmem:[%s3497_s26] sm:$0xf]  ;;  %vm3654_vm5 = vmor %vm918_vm3, %vm919_vm4 }
  0x54   : > { %2934 = vmatprep.subr.bf16.mxu0 %v3168_v18  ;;  %v659_v39 = vrot.slane %v657_v33, 5  ;;  %v3572_v42 = vld [vmem:[%s3497_s26 + $0x4] sm:$0xf]  ;;  %v3575_v43 = vld [vmem:[%s3497_s26 + $0x8] sm:$0x1]  ;;  %v1192_v44 = vshrl.u32 %v3569_v40, 16 }
  0x55   : > { %v644_v41 = vor.u32 %v643_v35, %v640_v34  ;;  %v1195_v45 = vshll.u32 %v3569_v40, 16  ;;  %v654_v48 = vor.u32 %v653_v38, %v649_v37  ;;  %v1201_v49 = vshll.u32 %v3572_v42, 16  ;;  %v3602_v0 = vld [vmem:[%s3495_s18 + $0x10] sm:$0xf]  ;;  %v3605_v1 = vld [vmem:[%s3495_s18 + $0x14] sm:$0x1] }
  0x56   : > { %2855 = vmatpush3.bf16.msra.mxu1 %v3167_v17  ;;  %v1205_v50 = vshrl.u32 %v3572_v42, 16  ;;  %v1211_v51 = vshll.u32 %v3575_v43, 16  ;;  %v1194_v54 = vrot.slane %v1192_v44, 4  ;;  %v2572_v56 = vcombine.low %v3569_v40, %v3572_v42  ;;  %v3614_v8 = vld [vmem:[%s3497_s26 + $0xc] sm:$0xf]  ;;  %v3179_v11 = vld [vmem:[%s4025_s3] sm:$0xff]  }
  0x57   : > { %2935 = vmatpush3.bf16.msra.mxu0 %v3168_v18  ;;  %2856 = vmatprep.subr.bf16.mxu1 %v3169_v19  ;;  %v645_v53 = vrot.slane %v644_v41, 4  ;;  %v1197_v55 = vrot.slane %v1195_v45, 5  ;;  %v655_v57 = vrot.slane %v654_v48, 4  ;;  %v1203_v58 = vrot.slane %v1201_v49, 5  ;;  %v3617_v9 = vld [vmem:[%s3497_s26 + $0x10] sm:$0xf] }
  0x58   : > { %2936 = vmatprep.subr.bf16.mxu0 %v3170_v20  ;;  %v1207_v59 = vrot.slane %v1205_v50, 4  ;;  %v1213_v60 = vrot.slane %v1211_v51, 5  ;;  %v662_v2 = vshrl.u32 %v3597_v61, 16  ;;  %v665_v3 = vshll.u32 %v3597_v61, 16  ;;  %v3623_v15 = vld [vmem:[%s3497_s26 + $0x14] sm:$0x1] }
  0x59   : > { %v650_v62 = vsel %vm3584_vm2, %v645_v53, %v649_v37  ;;  %v1198_v63 = vor.u32 %v1197_v55, %v1194_v54  ;;  %v660_v4 = vsel %vm3584_vm2, %v655_v57, %v659_v39  ;;  %v671_v6 = vshll.u32 %v3602_v0, 16  ;;  %v3181_v51 = vld [vmem:[%s4025_s3 + $0x8] sm:$0xff]   ;;  %s3089_s26 = smul.u32 (%p3464_p12), 12, %s3311_s11 }
  0x5a   : > { %2857 = vmatpush3.bf16.msra.mxu1 %v3169_v19  ;;  %v1208_v5 = vor.u32 %v1207_v59, %v1203_v58  ;;  %v675_v7 = vshrl.u32 %v3602_v0, 16  ;;  %v2508_v10 = vcombine.low %v650_v62, %v660_v4  ;;  %v664_v13 = vrot.slane %v662_v2, 4  ;;  %v3183_v62 = vld [vmem:[%s4025_s3 + $0x10] sm:$0xff]  }
  0x5b   : > { %2937 = vmatpush3.bf16.msra.mxu0 %v3170_v20  ;;  %2858 = vmatprep.subr.bf16.mxu1 %v3171_v21  ;;  %v1199_v12 = vrot.slane %v1198_v63, 4  ;;  %v667_v14 = vrot.slane %v665_v3, 5  ;;  %v673_v17 = vrot.slane %v671_v6, 5  ;;  %v681_v19 = vshll.u32 %v3605_v1, 16  ;;  %v3182_v6 = vld [vmem:[%s4025_s3 + $0x148] sm:$0xff]   ;;  %s2173_s27 = scalar_lea.vmem (%p3464_p12), %s4046_s9, %s3089_s26 }
  0x5c   : > { %2938 = vmatprep.subr.bf16.mxu0 %v3172_v22  ;;  %v1209_v16 = vrot.slane %v1208_v5, 4  ;;  %v677_v18 = vrot.slane %v675_v7, 4  ;;  %2866 = vmatprep.mubr.bf16.mxu1 %v2508_v10  ;;  %v1225_v34 = vshll.u32 %v3617_v9, 16  ;;  %v1229_v37 = vshrl.u32 %v3617_v9, 16  ;;  %v3185_v10 = vld [vmem:[%s4025_s3 + $0x18] sm:$0xff]  }
  0x5d   : > { %v1204_v20 = vsel %vm3584_vm2, %v1199_v12, %v1203_v58  ;;  %v683_v29 = vrot.slane %v681_v19, 5  ;;  %v1235_v38 = vshll.u32 %v3623_v15, 16  ;;  %v2518_v48 = vcombine.low %v3546_v24, %v3549_v25 }
  0x5e   : > { %2859 = vmatpush3.bf16.msra.mxu1 %v3171_v21  ;;  %v3180_v21 = vld [vmem:[%s4025_s3 + $0x140] sm:$0xff]   ;;  %v678_v28 = vor.u32 %v677_v18, %v673_v17  ;;  %v1227_v41 = vrot.slane %v1225_v34, 5  ;;  %v2608_v55 = vrot.slane %v3569_v40, 9  ;;  %v1369_v58 = vrot.slane %v3572_v42, 5  ;;  %v3192_v34 = vld [vmem:[%s4025_s3 + $0x170] sm:$0xff]   ;;  %v3221_v40 = vld [vmem:[%s4025_s3 + $0xd8] sm:$0xff]  }
  0x5f   : > { %2939 = vmatpush3.bf16.msra.mxu0 %v3172_v22  ;;  %2860 = vmatprep.subr.bf16.mxu1 %v3173_v23  ;;  %v668_v22 = vor.u32 %v667_v14, %v664_v13  ;;  %v1237_v50 = vrot.slane %v1235_v38, 5  ;;  %v1372_v4 = vrot.slane %v3575_v43, 5  ;;  %v3184_v43 = vld [vmem:[%s4025_s3 + $0x150] sm:$0xff]   ;;  %v2529_v12 = vrot.slane %v3597_v61, 9  ;;  %v3187_v13 = vld [vmem:[%s4025_s3 + $0x20] sm:$0xff]  }
  0x60   : > { %2940 = vmatprep.subr.bf16.mxu0 %v3174_v27  ;;  %v679_v35 = vrot.slane %v678_v28, 4  ;;  %v1371_v63 = vrot.slane %v1369_v58, 4  ;;  %v1370_v3 = vsel %vm3654_vm5, %v2608_v55, %v1369_v58  ;;  %v933_v14 = vrot.slane %v3605_v1, 5  ;;  %v3190_v28 = vld [vmem:[%s4025_s3 + $0x168] sm:$0xff]   ;;  %v3202_v55 = vld [vmem:[%s4025_s3 + $0x190] sm:$0xff]   ;;  %v3205_v58 = vld [vmem:[%s4025_s3 + $0xa0] sm:$0xff]  }
  0x61   : > { %v669_v32 = vrot.slane %v668_v22, 4  ;;  %v3220_v42 = vld [vmem:[%s4025_s3 + $0x1d0] sm:$0xff]  }
  0x62   : > { %2861 = vmatpush3.bf16.msra.mxu1 %v3173_v23  ;;  %v1216_v23 = vshrl.u32 %v3614_v8, 16  ;;  %v684_v44 = vsel %vm3584_vm2, %v679_v35, %v683_v29  ;;  %v1373_v7 = vsel %vm3654_vm5, %v1371_v63, %v1372_v4  ;;  %v926_v29 = vrot.slane %v3552_v26, 5  ;;  %v3196_v35 = vld [vmem:[%s4025_s3 + $0x80] sm:$0xff]  }
  0x63   : > { %2941 = vmatpush3.bf16.msra.mxu0 %v3174_v27  ;;  %2862 = vmatprep.subr.bf16.mxu1 %v3175_v30  ;;  %v1214_v27 = vsel %vm3584_vm2, %v1209_v16, %v1213_v60  ;;  %v674_v39 = vsel %vm3584_vm2, %v669_v32, %v673_v17  ;;  %v930_v16 = vrot.slane %v3602_v0, 5  ;;  %v3186_v17 = vld [vmem:[%s4025_s3 + $0x158] sm:$0xff]   ;;  %v2528_v32 = vrot.slane %v3546_v24, 9 }
  0x64   : > { %2942 = vmatprep.subr.bf16.mxu0 %v3176_v36  ;;  %v3635_v31 = vcombine.low %v1204_v20, %v1214_v27  ;;  %v1218_v33 = vrot.slane %v1216_v23, 4  ;;  %v2509_v49 = vcombine.low %v674_v39, %v684_v44  ;;  %v3189_v20 = vld [vmem:[%s4025_s3 + $0x28] sm:$0xff]   ;;  %v3191_v23 = vld [vmem:[%s4025_s3 + $0x30] sm:$0xff]   ;;  %v923_v27 = vrot.slane %v3549_v25, 5  ;;  %v3197_v44 = vld [vmem:[%s4025_s3 + $0x180] sm:$0xff]  }
  0x65   : > { %v3694_v18 = vsel %vm3654_vm5, %v2529_v12, %v930_v16  ;;  %v932_v19 = vrot.slane %v930_v16, 4  ;;  %v1376_v25 = vrot.slane %v3617_v9, 5  ;;  %v1379_v26 = vrot.slane %v3623_v15, 5  ;;  %v3194_v15 = vld [vmem:[%s4025_s3 + $0x178] sm:$0xff]   ;;  %v3210_v16 = vld [vmem:[%s4025_s3 + $0x1b0] sm:$0xff]  }
  0x66   : > { %2863 = vmatpush3.bf16.msra.mxu1 %v3175_v30  ;;  %v1219_v30 = vshll.u32 %v3614_v8, 16  ;;  %2946 = vmatprep.mubr.bf16.mxu0 %v3635_v31  ;;  %v924_v24 = vsel %vm3654_vm5, %v2528_v32, %v923_v27  ;;  %v2519_v39 = vcombine.low %v3597_v61, %v3602_v0  ;;  %v3752_v61 = vld [vmem:[%s3499_s20 + $0x4] sm:$0xf]  ;;  %v3810_v32 = vld [vmem:[%s3499_s20 + $0xc] sm:$0xf] }
  0x67   : > { %2943 = vmatpush3.bf16.msra.mxu0 %v3176_v36  ;;  %2864 = vmatprep.subr.bf16.mxu1 %v3177_v46  ;;  %v3701_v1 = vsel %vm3654_vm5, %v932_v19, %v933_v14  ;;  %v1378_v38 = vrot.slane %v1376_v25, 4  ;;  %v1647_v4 = vshll.u32 %v3752_v61, 16  ;;  %v3211_v14 = vld [vmem:[%s4025_s3 + $0xb8] sm:$0xff]  }
  0x68   : > { %2944 = vmatprep.subr.bf16.mxu0 %v3178_v52  ;;  %v1221_v36 = vrot.slane %v1219_v30, 5  ;;  %v2547_v22 = vcombine.low %v3694_v18, %v3701_v1  ;;  %v3193_v30 = vld [vmem:[%s4025_s3 + $0x38] sm:$0xff]   ;;  %v3219_v18 = vld [vmem:[%s4025_s3 + $0xd0] sm:$0xff]  }
  0x69   : > { %v1649_v12 = vrot.slane %v1647_v4, 5  ;;  %v3230_v4 = vld [vmem:[%s4025_s3 + $0x1f8] sm:$0xff]  }
  0x6a   : > { %2865 = vmatpush3.bf16.msra.mxu1 %v3177_v46  ;;  %v1222_v45 = vor.u32 %v1221_v36, %v1218_v33  ;;  %v1231_v46 = vrot.slane %v1229_v37, 4  ;;  %v925_v33 = vrot.slane %v923_v27, 4  ;;  %v2609_v37 = vrot.slane %v3614_v8, 9 }
  0x6b   : > { %2945 = vmatpush3.bf16.msra.mxu0 %v3178_v52  ;;  %2870 = vmatprep.subr.bf16.mxu1 %v3179_v11  ;;  %v2573_v52 = vcombine.low %v3614_v8, %v3617_v9  ;;  %v3243_v8 = vld [vmem:[%s4045_s14 + $0x10] sm:$0xff]  }
  0x6c   : > { %2950 = vmatprep.subr.bf16.mxu0 %v3180_v21  ;;  %v1223_v53 = vrot.slane %v1222_v45, 4  ;;  %v1232_v54 = vor.u32 %v1231_v46, %v1227_v41  ;;  %v927_v36 = vsel %vm3654_vm5, %v925_v33, %v926_v29  ;;  %v3199_v45 = vld [vmem:[%s4025_s3 + $0x88] sm:$0xff]   ;;  %v1377_v46 = vsel %vm3654_vm5, %v2609_v37, %v1376_v25  ;;  %v3215_v25 = vld [vmem:[%s4025_s3 + $0x1c0] sm:$0xff]  }
  0x6d   : > { %2867 = vmatmul.mubr.bf16.vlgmr.msra.gmra.mrb[0].mxu1 %v2509_v49  ;;  %v3749_v49 = vld [vmem:[%s3499_s20] sm:$0xf]  ;;  %v3813_v33 = vld [vmem:[%s3499_s20 + $0x10] sm:$0xf]  ;;  %v1662_v37 = vshrl.u32 %v3810_v32, 16 }
  0x6e   : > { %2871 = vmatpush3.bf16.msra.mxu1 %v3179_v11  ;;  %v1228_v59 = vsel %vm3584_vm2, %v1223_v53, %v1227_v41  ;;  %v1233_v60 = vrot.slane %v1232_v54, 4  ;;  %2886 = vmatprep.mubr.bf16.mxu1 %v2518_v48  ;;  %v2626_v11 = vcombine.low %v1370_v3, %v1373_v7  ;;  %v2546_v41 = vcombine.low %v924_v24, %v927_v36  ;;  %v3200_v53 = vld [vmem:[%s4025_s3 + $0x188] sm:$0xff]   ;;  %v3203_v54 = vld [vmem:[%s4025_s3 + $0x98] sm:$0xff]   ;;  %v3209_v7 = vld [vmem:[%s4025_s3 + $0xb0] sm:$0xff]  }
  0x6f   : > { %2872 = vmatprep.subr.bf16.mxu1 %v3181_v51  ;;  %v1380_v48 = vsel %vm3654_vm5, %v1378_v38, %v1379_v26  ;;  %v1638_v63 = vshrl.u32 %v3749_v49, 16  ;;  %v1651_v3 = vshrl.u32 %v3752_v61, 16  ;;  %v3222_v24 = vld [vmem:[%s4025_s3 + $0x1d8] sm:$0xff]   ;;  %v3225_v36 = vld [vmem:[%s4025_s3 + $0xe8] sm:$0xff]   ;;  %v1665_v38 = vshll.u32 %v3810_v32, 16 }
  0x70   : > { %v1238_v2 = vsel %vm3584_vm2, %v1233_v60, %v1237_v50  ;;  %v2627_v0 = vcombine.low %v1377_v46, %v1380_v48  ;;  %v3201_v50 = vld [vmem:[%s4025_s3 + $0x90] sm:$0xff]   ;;  %v3207_v60 = vld [vmem:[%s4025_s3 + $0xa8] sm:$0xff]  }
  0x71   : > { %v3669_v5 = vcombine.low %v1228_v59, %v1238_v2  ;;  %v3204_v59 = vld [vmem:[%s4025_s3 + $0x198] sm:$0xff]   ;;  %v1641_v2 = vshll.u32 %v3749_v49, 16  ;;  %v1667_v46 = vrot.slane %v1665_v38, 5 }
  0x72   : > { %2873 = vmatpush3.bf16.msra.mxu1 %v3181_v51  ;;  %v2652_v51 = vcombine.low %v3749_v49, %v3752_v61 }
  0x73   : > { %2947 = vmatmul.mubr.bf16.vlgmr.msra.gmra.mrb[0].mxu0 %v3669_v5  ;;  %2874 = vmatprep.subr.bf16.mxu1 %v3183_v62 }
  0x74   : > { %2951 = vmatpush3.bf16.msra.mxu0 %v3180_v21  ;;  %2966 = vmatprep.mubr.bf16.mxu0 %v2626_v11  ;;  %v3188_v21 = vld [vmem:[%s4025_s3 + $0x160] sm:$0xff]   ;;  %v1643_v11 = vrot.slane %v1641_v2, 5 }
  0x75   : > { %2952 = vmatprep.subr.bf16.mxu0 %v3182_v6 }
  0x76   : > { %2875 = vmatpush3.bf16.msra.mxu1 %v3183_v62  ;;  %v3206_v62 = vld [vmem:[%s4025_s3 + $0x1a0] sm:$0xff]  }
  0x77   : > { %2876 = vmatprep.subr.bf16.mxu1 %v3185_v10 }
  0x78   : > { %2953 = vmatpush3.bf16.msra.mxu0 %v3182_v6  ;;  %v3208_v6 = vld [vmem:[%s4025_s3 + $0x1a8] sm:$0xff]  }
  0x79   : > { %2954 = vmatprep.subr.bf16.mxu0 %v3184_v43 }
  0x7a   : > { %2877 = vmatpush3.bf16.msra.mxu1 %v3185_v10  ;;  %v1640_v10 = vrot.slane %v1638_v63, 4 }
  0x7b   : > { %2878 = vmatprep.subr.bf16.mxu1 %v3187_v13 }
  0x7c   : > { %2955 = vmatpush3.bf16.msra.mxu0 %v3184_v43  ;;  %v3791_v43 = vld [vmem:[%s3499_s20 + $0x8] sm:$0x1] }
  0x7d   : > { %2956 = vmatprep.subr.bf16.mxu0 %v3186_v17 }
  0x7e   : > { %2879 = vmatpush3.bf16.msra.mxu1 %v3187_v13  ;;  %v1653_v13 = vrot.slane %v1651_v3, 4 }
  0x7f   : > { %2880 = vmatprep.subr.bf16.mxu1 %v3189_v20 }
  0x80   : > { %2957 = vmatpush3.bf16.msra.mxu0 %v3186_v17  ;;  %v1644_v17 = vor.u32 %v1643_v11, %v1640_v10  ;;  %v1654_v19 = vor.u32 %v1653_v13, %v1649_v12  ;;  %v3241_v10 = vld [vmem:[%s4045_s14 + $0x8] sm:$0xff]  }
  0x81   : > { %2958 = vmatprep.subr.bf16.mxu0 %v3188_v21 }
  0x82   : > { %2881 = vmatpush3.bf16.msra.mxu1 %v3189_v20  ;;  %v1657_v20 = vshll.u32 %v3791_v43, 16  ;;  %v1645_v27 = vrot.slane %v1644_v17, 4  ;;  %v3236_v17 = vld [vmem:[%s4025_s3 + $0x218] sm:$0xff]  }
  0x83   : > { %2882 = vmatprep.subr.bf16.mxu1 %v3191_v23 }
  0x84   : > { %2959 = vmatpush3.bf16.msra.mxu0 %v3188_v21  ;;  %v3213_v21 = vld [vmem:[%s4025_s3 + $0xc0] sm:$0xff]   ;;  %v1659_v29 = vrot.slane %v1657_v20, 5 }
  0x85   : > { %2960 = vmatprep.subr.bf16.mxu0 %v3190_v28  ;;  %v3237_v20 = vld [vmem:[%s4025_s3 + $0x220] sm:$0xff]  }
  0x86   : > { %2883 = vmatpush3.bf16.msra.mxu1 %v3191_v23  ;;  %v3212_v23 = vld [vmem:[%s4025_s3 + $0x1b8] sm:$0xff]  }
  0x87   : > { %2884 = vmatprep.subr.bf16.mxu1 %v3193_v30 }
  0x88   : > { %2961 = vmatpush3.bf16.msra.mxu0 %v3190_v28  ;;  %v1655_v28 = vrot.slane %v1654_v19, 4  ;;  %v3246_v19 = vld [vmem:[%s4045_s14 + $0x28] sm:$0xff]  }
  0x89   : > { %2962 = vmatprep.subr.bf16.mxu0 %v3192_v34 }
  0x8a   : > { %2885 = vmatpush3.bf16.msra.mxu1 %v3193_v30  ;;  %v3217_v30 = vld [vmem:[%s4025_s3 + $0xc8] sm:$0xff]   ;;  %v1660_v26 = vsel %vm3584_vm2, %v1655_v28, %v1659_v29  ;;  %v1822_v28 = vrot.slane %v3813_v33, 5  ;;  %v3240_v29 = vld [vmem:[%s4025_s3 + $0x230] sm:$0xff]  }
  0x8b   : > { %2890 = vmatprep.subr.bf16.mxu1 %v3196_v35 }
  0x8c   : > { %2963 = vmatpush3.bf16.msra.mxu0 %v3192_v34  ;;  %v1650_v34 = vsel %vm3584_vm2, %v1645_v27, %v1649_v12  ;;  %v3248_v27 = vld [vmem:[%s4045_s14 + $0x38] sm:$0xff]  }
  0x8d   : > { %2964 = vmatprep.subr.bf16.mxu0 %v3194_v15  ;;  %2887 = vmatmul.mubr.bf16.vlgmr.msra.gmra.mrb[0].mxu1 %v2519_v39  ;;  %v2678_v1 = vcombine.low %v1650_v34, %v1660_v26  ;;  %v1671_v39 = vshll.u32 %v3813_v33, 16  ;;  %v3242_v26 = vld [vmem:[%s4025_s3 + $0x238] sm:$0xff]  }
  0x8e   : > { %2891 = vmatpush3.bf16.msra.mxu1 %v3196_v35  ;;  %2906 = vmatprep.mubr.bf16.mxu1 %v2546_v41  ;;  %v2653_v35 = vcombine.low %v3810_v32, %v3813_v33  ;;  %v3224_v41 = vld [vmem:[%s4025_s3 + $0x1e0] sm:$0xff]  }
  0x8f   : > { %2892 = vmatprep.subr.bf16.mxu1 %v3199_v45  ;;  %v1673_v48 = vrot.slane %v1671_v39, 5 }
  0x90   : > { %2965 = vmatpush3.bf16.msra.mxu0 %v3194_v15  ;;  %v1675_v15 = vshrl.u32 %v3813_v33, 16 }
  0x91   : > { %2970 = vmatprep.subr.bf16.mxu0 %v3197_v44 }
  0x92   : > { %2893 = vmatpush3.bf16.msra.mxu1 %v3199_v45  ;;  %v1664_v45 = vrot.slane %v1662_v37, 4 }
  0x93   : > { %2967 = vmatmul.mubr.bf16.vlgmr.msra.gmra.mrb[0].mxu0 %v2627_v0  ;;  %2894 = vmatprep.subr.bf16.mxu1 %v3201_v50  ;;  %v1677_v0 = vrot.slane %v1675_v15, 4 }
  0x94   : > { %2971 = vmatpush3.bf16.msra.mxu0 %v3197_v44  ;;  %2986 = vmatprep.mubr.bf16.mxu0 %v2652_v51  ;;  %v3227_v44 = vld [vmem:[%s4025_s3 + $0xf0] sm:$0xff]  }
  0x95   : > { %2972 = vmatprep.subr.bf16.mxu0 %v3200_v53  ;;  %v3865_v51 = vld [vmem:[%s3499_s20 + $0x14] sm:$0x1] }
  0x96   : > { %2895 = vmatpush3.bf16.msra.mxu1 %v3201_v50  ;;  %v3226_v50 = vld [vmem:[%s4025_s3 + $0x1e8] sm:$0xff]   ;;  %v1825_v34 = vrot.slane %v3865_v51, 5 }
  0x97   : > { %2896 = vmatprep.subr.bf16.mxu1 %v3203_v54 }
  0x98   : > { %2973 = vmatpush3.bf16.msra.mxu0 %v3200_v53  ;;  %v3229_v53 = vld [vmem:[%s4025_s3 + $0xf8] sm:$0xff]  }
  0x99   : > { %2974 = vmatprep.subr.bf16.mxu0 %v3202_v55 }
  0x9a   : > { %2897 = vmatpush3.bf16.msra.mxu1 %v3203_v54  ;;  %v1668_v54 = vor.u32 %v1667_v46, %v1664_v45 }
  0x9b   : > { %2898 = vmatprep.subr.bf16.mxu1 %v3205_v58 }
  0x9c   : > { %2975 = vmatpush3.bf16.msra.mxu0 %v3202_v55  ;;  %v1678_v55 = vor.u32 %v1677_v0, %v1673_v48  ;;  %v1669_v63 = vrot.slane %v1668_v54, 4 }
  0x9d   : > { %2976 = vmatprep.subr.bf16.mxu0 %v3204_v59 }
  0x9e   : > { %2899 = vmatpush3.bf16.msra.mxu1 %v3205_v58  ;;  %v1681_v58 = vshll.u32 %v3865_v51, 16  ;;  %v1679_v2 = vrot.slane %v1678_v55, 4  ;;  %v1674_v11 = vsel %vm3584_vm2, %v1669_v63, %v1673_v48 }
  0x9f   : > { %2900 = vmatprep.subr.bf16.mxu1 %v3207_v60 }
  0xa0   : > { %2977 = vmatpush3.bf16.msra.mxu0 %v3204_v59  ;;  %v3228_v59 = vld [vmem:[%s4025_s3 + $0x1f0] sm:$0xff]   ;;  %v1683_v3 = vrot.slane %v1681_v58, 5 }
  0xa1   : > { %2978 = vmatprep.subr.bf16.mxu0 %v3206_v62 }
  0xa2   : > { %2901 = vmatpush3.bf16.msra.mxu1 %v3207_v60  ;;  %v1815_v60 = vrot.slane %v3752_v61, 5  ;;  %v1818_v61 = vrot.slane %v3791_v43, 5  ;;  %v1684_v12 = vsel %vm3584_vm2, %v1679_v2, %v1683_v3 }
  0xa3   : > { %2902 = vmatprep.subr.bf16.mxu1 %v3209_v7  ;;  %v2679_v47 = vcombine.low %v1674_v11, %v1684_v12 }
  0xa4   : > { %2979 = vmatpush3.bf16.msra.mxu0 %v3206_v62  ;;  %v3239_v62 = vld [vmem:[%s4045_s14] sm:$0xff]  }
  0xa5   : > { %2980 = vmatprep.subr.bf16.mxu0 %v3208_v6 }
  0xa6   : > { %2903 = vmatpush3.bf16.msra.mxu1 %v3209_v7  ;;  %v1817_v7 = vrot.slane %v1815_v60, 4 }
  0xa7   : > { %2904 = vmatprep.subr.bf16.mxu1 %v3211_v14 }
  0xa8   : > { %2981 = vmatpush3.bf16.msra.mxu0 %v3208_v6  ;;  %v2688_v6 = vrot.slane %v3749_v49, 9  ;;  %v3233_v49 = vld [vmem:[%s4025_s3 + $0x200] sm:$0xff]   ;;  %v1819_v13 = vsel %vm3654_vm5, %v1817_v7, %v1818_v61 }
  0xa9   : > { %2982 = vmatprep.subr.bf16.mxu0 %v3210_v16 }
  0xaa   : > { %2905 = vmatpush3.bf16.msra.mxu1 %v3211_v14  ;;  %v1816_v43 = vsel %vm3654_vm5, %v2688_v6, %v1815_v60  ;;  %v3235_v14 = vld [vmem:[%s4025_s3 + $0x210] sm:$0xff]  }
  0xab   : > { %2910 = vmatprep.subr.bf16.mxu1 %v3213_v21  ;;  %v2706_v9 = vcombine.low %v1816_v43, %v1819_v13 }
  0xac   : > { %2983 = vmatpush3.bf16.msra.mxu0 %v3210_v16  ;;  %v3245_v16 = vld [vmem:[%s4045_s14 + $0x20] sm:$0xff]  }
  0xad   : > { %2984 = vmatprep.subr.bf16.mxu0 %v3212_v23  ;;  %2907 = vmatmul.mubr.bf16.vlgmr.msra.gmra.mrb[0].mxu1 %v2547_v22  ;;  %v3218_v22 = vld [vmem:[%s4025_s3 + $0x1c8] sm:$0xff]  }
  0xae   : > { %2911 = vmatpush3.bf16.msra.mxu1 %v3213_v21  ;;  %2926 = vmatprep.mubr.bf16.mxu1 %v2572_v56  ;;  %v3223_v56 = vld [vmem:[%s4025_s3 + $0xe0] sm:$0xff]   ;;  %v3247_v21 = vld [vmem:[%s4045_s14 + $0x30] sm:$0xff]  }
  0xaf   : > { %2912 = vmatprep.subr.bf16.mxu1 %v3217_v30 }
  0xb0   : > { %2985 = vmatpush3.bf16.msra.mxu0 %v3212_v23  ;;  %v3238_v23 = vld [vmem:[%s4025_s3 + $0x228] sm:$0xff]  }
  0xb1   : > { %2990 = vmatprep.subr.bf16.mxu0 %v3215_v25 }
  0xb2   : > { %2913 = vmatpush3.bf16.msra.mxu1 %v3217_v30  ;;  %v2689_v30 = vrot.slane %v3810_v32, 9 }
  0xb3   : > { %2987 = vmatmul.mubr.bf16.vlgmr.msra.gmra.mrb[0].mxu0 %v2653_v35  ;;  %2914 = vmatprep.subr.bf16.mxu1 %v3219_v18 }
  0xb4   : > { %2991 = vmatpush3.bf16.msra.mxu0 %v3215_v25  ;;  %3006 = vmatprep.mubr.bf16.mxu0 %v2678_v1  ;;  %v1824_v25 = vrot.slane %v1822_v28, 4  ;;  %v1823_v33 = vsel %vm3654_vm5, %v2689_v30, %v1822_v28 }
  0xb5   : > { %2992 = vmatprep.subr.bf16.mxu0 %v3218_v22 }
  0xb6   : > { %2915 = vmatpush3.bf16.msra.mxu1 %v3219_v18  ;;  %v1826_v35 = vsel %vm3654_vm5, %v1824_v25, %v1825_v34 }
  0xb7   : > { %2916 = vmatprep.subr.bf16.mxu1 %v3221_v40  ;;  %v2707_v32 = vcombine.low %v1823_v33, %v1826_v35 }
  0xb8   : > { %2993 = vmatpush3.bf16.msra.mxu0 %v3218_v22 }
  0xb9   : > { %2994 = vmatprep.subr.bf16.mxu0 %v3220_v42 }
  0xba   : > { %2917 = vmatpush3.bf16.msra.mxu1 %v3221_v40 }
  0xbb   : > { %2918 = vmatprep.subr.bf16.mxu1 %v3223_v56 }
  0xbc   : > { %2995 = vmatpush3.bf16.msra.mxu0 %v3220_v42 }
  0xbd   : > { %2996 = vmatprep.subr.bf16.mxu0 %v3222_v24 }
  0xbe   : > { %2919 = vmatpush3.bf16.msra.mxu1 %v3223_v56 }
  0xbf   : > { %2920 = vmatprep.subr.bf16.mxu1 %v3225_v36 }
  0xc0   : > { %2997 = vmatpush3.bf16.msra.mxu0 %v3222_v24 }
  0xc1   : > { %2998 = vmatprep.subr.bf16.mxu0 %v3224_v41 }
  0xc2   : > { %2921 = vmatpush3.bf16.msra.mxu1 %v3225_v36 }
  0xc3   : > { %2922 = vmatprep.subr.bf16.mxu1 %v3227_v44 }
  0xc4   : > { %2999 = vmatpush3.bf16.msra.mxu0 %v3224_v41 }
  0xc5   : > { %3000 = vmatprep.subr.bf16.mxu0 %v3226_v50 }
  0xc6   : > { %2923 = vmatpush3.bf16.msra.mxu1 %v3227_v44 }
  0xc7   : > { %2924 = vmatprep.subr.bf16.mxu1 %v3229_v53 }
  0xc8   : > { %3001 = vmatpush3.bf16.msra.mxu0 %v3226_v50 }
  0xc9   : > { %3002 = vmatprep.subr.bf16.mxu0 %v3228_v59 }
  0xca   : > { %2925 = vmatpush3.bf16.msra.mxu1 %v3229_v53 }
  0xcb   : > { %3030 = vmatprep.subr.bf16.mxu1 %v3239_v62 }
  0xcc   : > { %3003 = vmatpush3.bf16.msra.mxu0 %v3228_v59 }
  0xcd   : > { %3004 = vmatprep.subr.bf16.mxu0 %v3230_v4  ;;  %2927 = vmatmul.mubr.bf16.vlgmr.msra.gmra.mrb[0].mxu1 %v2573_v52  ;;  %v3234_v52 = vld [vmem:[%s4025_s3 + $0x208] sm:$0xff]  }
  0xce   : > { %3031 = vmatpush3.bf16.msra.mxu1 %v3239_v62  ;;  %3046 = vmatprep.mubr.bf16.mxu1 %v3635_v31  ;;  %v3244_v31 = vld [vmem:[%s4045_s14 + $0x18] sm:$0xff]  }
  0xcf   : > { %3032 = vmatprep.subr.bf16.mxu1 %v3241_v10 }
  0xd0   : > { %3005 = vmatpush3.bf16.msra.mxu0 %v3230_v4 }
  0xd1   : > { %3010 = vmatprep.subr.bf16.mxu0 %v3233_v49 }
  0xd2   : > { %3033 = vmatpush3.bf16.msra.mxu1 %v3241_v10 }
  0xd3   : > { %3007 = vmatmul.mubr.bf16.vlgmr.msra.gmra.mrb[0].mxu0 %v2679_v47  ;;  %3034 = vmatprep.subr.bf16.mxu1 %v3243_v8 }
  0xd4   : > { %3011 = vmatpush3.bf16.msra.mxu0 %v3233_v49  ;;  %3026 = vmatprep.mubr.bf16.mxu0 %v2706_v9 }
  0xd5   : > { %3012 = vmatprep.subr.bf16.mxu0 %v3234_v52 }
  0xd6   : > { %3035 = vmatpush3.bf16.msra.mxu1 %v3243_v8 }
  0xd7   : > { %3036 = vmatprep.subr.bf16.mxu1 %v3244_v31 }
  0xd8   : > { %3013 = vmatpush3.bf16.msra.mxu0 %v3234_v52 }
  0xd9   : > { %3014 = vmatprep.subr.bf16.mxu0 %v3235_v14 }
  0xda   : > { %3037 = vmatpush3.bf16.msra.mxu1 %v3244_v31 }
  0xdb   : > { %3038 = vmatprep.subr.bf16.mxu1 %v3245_v16 }
  0xdc   : > { %3015 = vmatpush3.bf16.msra.mxu0 %v3235_v14 }
  0xdd   : > { %3016 = vmatprep.subr.bf16.mxu0 %v3236_v17 }
  0xde   : > { %3039 = vmatpush3.bf16.msra.mxu1 %v3245_v16 }
  0xdf   : > { %3040 = vmatprep.subr.bf16.mxu1 %v3246_v19 }
  0xe0   : > { %3017 = vmatpush3.bf16.msra.mxu0 %v3236_v17 }
  0xe1   : > { %3018 = vmatprep.subr.bf16.mxu0 %v3237_v20 }
  0xe2   : > { %3041 = vmatpush3.bf16.msra.mxu1 %v3246_v19  ;;  %v2070_v19 = vld [vmem:[%s4029_s7] sm:$0x1] }
  0xe3   : > { %3042 = vmatprep.subr.bf16.mxu1 %v3247_v21 }
  0xe4   : > { %3019 = vmatpush3.bf16.msra.mxu0 %v3237_v20 }
  0xe5   : > { %3020 = vmatprep.subr.bf16.mxu0 %v3238_v23 }
  0xe6   : > { %3043 = vmatpush3.bf16.msra.mxu1 %v3247_v21 }
  0xe7   : > { %3044 = vmatprep.subr.bf16.mxu1 %v3248_v27 }
  0xe8   : > { %3021 = vmatpush3.bf16.msra.mxu0 %v3238_v23  ;;  %v2082_v23 = vld [vmem:[%s4030_s8] sm:$0x1] }
  0xe9   : > { %3022 = vmatprep.subr.bf16.mxu0 %v3240_v29 }
  0xea   : > { %3045 = vmatpush3.bf16.msra.mxu1 %v3248_v27 }
  0xec   : > { %3023 = vmatpush3.bf16.msra.mxu0 %v3240_v29 }
  0xed   : > { %3024 = vmatprep.subr.bf16.mxu0 %v3242_v26  ;;  %3047 = vmatmul.mubr.bf16.vlgmr.msra.gmra.mrb[4].mxu1 %v3669_v5 }
  0xf0   : > { %3025 = vmatpush3.bf16.msra.mxu0 %v3242_v26 }
  0xf3   : > { %3027 = vmatmul.mubr.bf16.vlgmr.msra.gmra.mrb[0].mxu0 %v2707_v32 }
 0x1a0   : > { %v2928_v18 = vpop.f32.mrb[0].mxu1 }
 0x1a1   : > { %v1172_v1 = vpop.f32.mrb[1].mxu1 }
 0x1a2   : > { %v2929_v22 = vpop.f32.mrb[2].mxu1 }
 0x1a3   : > { %v1175_v40 = vpop.f32.mrb[3].mxu1 }
 0x1c0   : > { %v3048_v42 = vpop.f32.mrb[4].mxu1 }
 0x1c1   : > { %2068 = vst [vmem:[%s3503_s0 + $0x10] sm:$0xff] %v3048_v42  ;;  %v2051_v56 = vpop.f32.mrb[5].mxu1 }
 0x1c2   : > { %2066 = vst [vmem:[%s3503_s0] sm:$0xff] %v2051_v56  ;;  %v3049_v24 = vpop.f32.mrb[6].mxu1 }
 0x1c3   : > { %2069 = vst [vmem:[%s3503_s0 + $0x18] sm:$0xff] %v3049_v24  ;;  %v2054_v57 = vpop.f32.mrb[7].mxu1 }
 0x1c4   : > { %2067 = vst [vmem:[%s3503_s0 + $0x8] sm:$0xff] %v2054_v57 }
 0x1c6   : > { %v3028_v36 = vpop.f32.mrb[0].mxu0 }
 0x1c7   : > { %v3050_v37 = vadd.f32 %v3028_v36, %v2928_v18  ;;  %v1934_v38 = vpop.f32.mrb[1].mxu0 }
 0x1c8   : > { %v3051_v5 = vadd.f32 %v1934_v38, %v1172_v1  ;;  %v3029_v15 = vpop.f32.mrb[2].mxu0 }
 0x1c9   : > { %v2106_v39 = vrot.slane %v3050_v37, 7  ;;  %v3052_v41 = vadd.f32 %v3029_v15, %v2929_v22  ;;  %v1937_v44 = vpop.f32.mrb[3].mxu0  ;;  %v2085_v55 = vmul.f32 %v3050_v37, %v3050_v37 }
 0x1ca   : > { %v3053_v45 = vadd.f32 %v1937_v44, %v1175_v40  ;;  %v2103_v48 = vrot.slane %v3051_v5, 7  ;;  %v2083_v51 = vmul.f32 %v3051_v5, %v3051_v5 }
 0x1cb   : > { %v2116_v46 = vsel %vm2102_vm6, 0.0, %v2106_v39  ;;  %v2107_v0 = vrot.slane %v3052_v41, 7  ;;  %v2086_v6 = vmul.f32 %v3052_v41, %v3052_v41 }
 0x1cc   : > { %v2741_v50 = vpack.c.bf16 %v2116_v46, %v2116_v46  ;;  %v2071_v53 = vadd.f32 %v3053_v45, %v3051_v5  ;;  %v2084_v54 = vmul.f32 %v3053_v45, %v3053_v45  ;;  %v2104_v60 = vrot.slane %v3053_v45, 7 }
 0x1cd   : > { %v2108_v58 = vsel %vm2102_vm6, %v2106_v39, %v2107_v0  ;;  %v2118_v59 = vsel %vm2102_vm6, %v2107_v0, 0.0  ;;  %v2115_v4 = vsel %vm2102_vm6, 0.0, %v2103_v48 }
 0x1ce   : > { %2148 = vst [vmem:[%s3501_s4 + $0xc] sm:$0xf] %v2741_v50  ;;  %v2742_v62 = vpack.c.bf16 %v2108_v58, %v2108_v58  ;;  %v2743_v63 = vpack.c.bf16 %v2118_v59, %v2118_v59  ;;  %v2072_v2 = vadd.f32 %v3050_v37, %v2071_v53  ;;  %v2087_v3 = vadd.f32 %v2084_v54, %v2083_v51 }
 0x1cf   : > { %v2105_v7 = vsel %vm2102_vm6, %v2103_v48, %v2104_v60  ;;  %v2117_v61 = vsel %vm2102_vm6, %v2104_v60, 0.0 }
 0x1d0   : > { %2149 = vst [vmem:[%s3501_s4 + $0x10] sm:$0xf] %v2742_v62  ;;  %2150 = vst [vmem:[%s3501_s4 + $0x14] sm:$0x1] %v2743_v63  ;;  %v2073_v10 = vadd.f32 %v3052_v41, %v2072_v2  ;;  %v2088_v11 = vadd.f32 %v2087_v3, %v2085_v55  ;;  %v2740_v12 = vpack.c.bf16 %v2117_v61, %v2117_v61 }
 0x1d1   : > { %v2748_v49 = vpack.c.bf16 %v2105_v7, %v2115_v4 }
 0x1d2   : > { %v2074_v43 = vrot.slane %v2073_v10, 4  ;;  %v2089_v13 = vadd.f32 %v2088_v11, %v2086_v6  ;;  %2147 = vst [vmem:[%s3501_s4 + $0x8] sm:$0x1] %v2740_v12 }
 0x1d3   : > { %2749 = vst [vmem:[%s3501_s4] sm:$0xff] %v2748_v49  }
 0x1d4   : > { %v2075_v47 = vadd.f32 %v2074_v43, %v2073_v10  ;;  %v2090_v8 = vrot.slane %v2089_v13, 4 }
 0x1d6   : > { %v2076_v9 = vrot.slane %v2075_v47, 2  ;;  %v2091_v52 = vadd.f32 %v2090_v8, %v2089_v13 }
 0x1d7   : > { %v2195_v34 = vld [vmem:[%s3501_s4 + $0xc] sm:$0xff] (%p3464_p12)   ;;  %v2199_v26 = vld [vmem:[%s3501_s4 + $0x14] sm:$0xf] (%p3464_p12) }
 0x1d8   : > { %v2077_v31 = vadd.f32 %v2076_v9, %v2075_v47  ;;  %v2092_v14 = vrot.slane %v2091_v52, 2  ;;  %2196 = vst [vmem:[%s2173_s27 + $0xc0] sm:$0xff] (%p3464_p12), %v2195_v34   ;;  %2200 = vst [vmem:[%s2173_s27 + $0xc8] sm:$0xf] (%p3464_p12), %v2199_v26 }
 0x1d9   : > { %v2193_v25 = vld [vmem:[%s3501_s4 + $0x8] sm:$0xf] (%p3464_p12) }
 0x1da   : > { %v2078_v16 = vrot.slane %v2077_v31, 1  ;;  %v2093_v17 = vadd.f32 %v2092_v14, %v2091_v52  ;;  %v2189_v30 = vld [vmem:[%s3501_s4] sm:$0xff] (%p3464_p12)   ;;  %2194 = vst [vmem:[%s2173_s27 + $0x8] sm:$0xf] (%p3464_p12), %v2193_v25 }
 0x1db   : > { %2190 = vst [vmem:[%s2173_s27] sm:$0xff] (%p3464_p12), %v2189_v30  }
 0x1dc   : > { %v2079_v20 = vadd.f32 %v2078_v16, %v2077_v31  ;;  %v2094_v21 = vrot.slane %v2093_v17, 1  ;;  %2167 = sbr.rel (!%p3464_p12) target bundleno = 483 (0x1e3), region = 171 }
 0x1de   : > { %v2080_v27 = vadd.f32 %v2079_v20, %v2070_v19  ;;  %v2095_v28 = vadd.f32 %v2094_v21, %v2093_v17 }
 0x1e0   : > { %2081 = vst [vmem:[%s4029_s7] sm:$0x1] %v2080_v27  ;;  %v2096_v29 = vadd.f32 %v2095_v28, %v2082_v23 }
 0x1e2   : > { %2097 = vst [vmem:[%s4030_s8] sm:$0x1] %v2096_v29 }
 0x1e3 PF: > { %2235 = sbr.rel (!%p3464_p12) target bundleno = 493 (0x1ed), region = 212  ;;  %s2744_s15 = sshll.u32 (%p3464_p12), %s3311_s11, 4  ;;  %v2275_v33 = vld [vmem:[%s3503_s0] sm:$0xff] (%p3464_p12)  ;;  %v2277_v35 = vld [vmem:[%s3503_s0 + $0x8] sm:$0xff] (%p3464_p12)  ;;  %v2279_v32 = vld [vmem:[%s3503_s0 + $0x10] sm:$0xff] (%p3464_p12) }
 0x1e4   : > { %s4047_s6 = sld [smem:[#allocation10_spill]] (%p3464_p12)  ;;  %v2281_v18 = vld [vmem:[%s3503_s0 + $0x18] sm:$0xff] (%p3464_p12) }
 0x1ea   : > { %s2241_s18 = scalar_lea.vmem %s4047_s6, %s2744_s15 }
 0x1eb   : > { %2276 = vst [vmem:[%s2241_s18] sm:$0xff] %v2275_v33  ;;  %2278 = vst [vmem:[%s2241_s18 + $0x8] sm:$0xff] %v2277_v35 }
 0x1ec   : > { %2280 = vst [vmem:[%s2241_s18 + $0x100] sm:$0xff] %v2279_v32  ;;  %2282 = vst [vmem:[%s2241_s18 + $0x108] sm:$0xff] %v2281_v18 }
 0x1ed PF: > { %s19_s13 = sadd.s32 1, %s3319_s13   ;;  %s4048_s27 = smov %s3291_s28 }
 0x1ee   : > { %p16_p4 = scmp.ge.s32.totalorder %s19_s13, 18   ;;  %s4049_s28 = smov %s3459_s16 }
 0x1ef   : > { %s4050_s29 = smov %s3299_s30  ;;  %s4051_s30 = smov %s3439_s24 }
 0x1f0   : > { %s4052_s9 = smov %s3307_s10  ;;  %s4053_s10 = smov %s3436_s23 }
 0x1f1   : > { %s4054_s11 = smov %s3315_s12  ;;  %s4055_s12 = smov %s3418_s17 }
 0x1f2   :  { %18 = sbr.rel (!%p16_p4) target bundleno = 10 (0xa), region = 341 }

// kernel: res_block_forward.4
= control target key start
LH: loop header
LB: loop body
LE: loop exit
PB: predicated region body
PF: predicated region fallthrough
CT: control target
= control target key end

     0   :  { %s3998_s0 = inlined_call_operand.vmem [shape: bf16[2,16,18,128], index: 0, kind: input, shape index: {}, may-alias: {0,1,2}]   ;;  %s3999_s1 = inlined_call_operand.vmem [shape: bf16[2,16,18,128], index: 1, kind: input, shape index: {}, may-alias: {0,1,2}]   ;;  %s4000_s2 = inlined_call_operand.vmem [shape: bf16[2,16,18,128], index: 2, kind: input, shape index: {}, may-alias: {0,1,2}]   ;;  %s4001_s3 = inlined_call_operand.vmem [shape: f32[1,128], index: 3, kind: input, shape index: {}]   ;;  %s4002_s4 = inlined_call_operand.vmem [shape: f32[1,128], index: 4, kind: input, shape index: {}]   ;;  %s4003_s5 = inlined_call_operand.vmem [shape: bf16[9,128,128], index: 5, kind: input, shape index: {}]   ;;  %s4004_s6 = inlined_call_operand.vmem [shape: f32[2,16,16,128], index: 6, kind: output, shape index: {0}]   ;;  %s4005_s7 = inlined_call_operand.vmem [shape: f32[1,1,128], index: 7, kind: output, shape index: {1}]   ;;  %s4006_s8 = inlined_call_operand.vmem [shape: f32[1,1,128], index: 8, kind: output, shape index: {2}]  }
   0x1   :  { %4010 = sst [smem:[#allocation9_spill]] %s4001_s3 }
   0x2   :  { %4011 = sst [smem:[#allocation10_spill]] %s4002_s4 }
   0x3   :  { %4012 = sst [smem:[#allocation11_spill]] %s4003_s5 }
   0x4   :  { %4013 = sst [smem:[#allocation12_spill]] %s4004_s6 }
   0x5   :  { %4014 = sst [smem:[#allocation13_spill]] %s4006_s8 }
   0x6   :  { %s3173_s27 = smov 0   ;;  %s3175_s28 = smov 0  }
   0x7   :  { %s3177_s29 = smov 0   ;;  %s3179_s30 = smov 0  }
   0x8   :  { %s3181_s9 = smov 0   ;;  %s3183_s10 = smov 0  }
   0x9   :  { %s3185_s11 = smov 0   ;;  %s3187_s12 = smov 0  }
   0xa   :  { %s3189_s13 = smov 0   ;;  %s3191_s14 = smov 0  }
   0xb   :  { %s3193_s15 = smov 0  }
   0xc LB: > { %s3230_s17 = sadd.s32 1, %s3121_s14  ;;  %s35_s18 = sadd.s32 4294967295, %s3121_s14  ;;  %s3125_s15 = sphi %s3193_s15, %s19_s15   ;;  %s3121_s14 = sphi %s3191_s14, %s4064_s14   ;;  %s3117_s13 = sphi %s3189_s13, %s4063_s13   ;;  %s3113_s12 = sphi %s3187_s12, %s4062_s12   ;;  %s3109_s11 = sphi %s3185_s11, %s4061_s11   ;;  %s3105_s10 = sphi %s3183_s10, %s4060_s10   ;;  %s3101_s9 = sphi %s3181_s9, %s4059_s9   ;;  %s3097_s30 = sphi %s3179_s30, %s4058_s30   ;;  %s3093_s29 = sphi %s3177_s29, %s4057_s29   ;;  %s3089_s28 = sphi %s3175_s28, %s4056_s28   ;;  %s3085_s27 = sphi %s3173_s27, %s4055_s27  }
   0xd   : > { %p29_p0 = scmp.ge.s32.totalorder %s3230_s17, 16  ;;  %p36_p1 = scmp.gt.s32.totalorder %s35_s18, 0 }
   0xe   : > { %s50_s21 = sadd.s32 1, %s3113_s12  ;;  %p57_p3 = scmp.ne.s32.totalorder %s3113_s12, %s3109_s11 }
   0xf   : > { %s3235_s19 = scalar_select %p29_p0, 0, %s3230_s17  }
  0x10   : > { %s4066_s18 = smov (!%p36_p1, %s35_s18), 0  ;;  %p58_p4 = scmp.eq.s32.totalorder %s3125_s15, 0 }
  0x11   : > { %4015 = sst [smem:[#allocation6_spill]] %s3235_s19  ;;  %s40_s20 = sadd.s32 4294967295, %s3235_s19 }
  0x12   : > { %p41_p2 = scmp.gt.s32.totalorder %s40_s20, 0  ;;  %p3246_p5 = por %p58_p4, %p57_p3 }
  0x13   : > { %p73_p6 = scmp.gt.s32.totalorder %s3121_s14, 0  ;;  %p2263_p7 = scmp.lt.s32.totalorder %s3121_s14, 15 }
  0x14   : > { %s4068_s20 = smov (!%p41_p2, %s40_s20), 0  ;;  %p77_p9 = scmp.gt.s32.totalorder %s3235_s19, 0 }
  0x15   : > { %s74_s23 = scalar_select %p73_p6, %s3121_s14, 0 }
  0x16   : > { %s46_s24 = ssub.s32 %s4066_s18, %s4068_s20  ;;  %p2268_p10 = scmp.lt.s32.totalorder %s3235_s19, 15 }
  0x17   : > { %p48_p8 = scmp.eq.s32.totalorder %s46_s24, 0  ;;  %s4070_s23 = smov (!%p2263_p7, %s74_s23), 15 }
  0x18   : > { %s78_s26 = scalar_select %p77_p9, %s3235_s19, 0 }
  0x19   : > { %s3258_s25 = scalar_select %p48_p8, %s3113_s12, %s50_s21  }
  0x1a   : > { %s86_s16 = sadd.s32 1, %s3105_s10  ;;  %p93_p11 = scmp.ne.s32.totalorder %s3105_s10, %s3101_s9 }
  0x1b   : > { %4017 = sst [smem:[#allocation7_spill]] %s3258_s25  ;;  %s4072_s26 = smov (!%p2268_p10, %s78_s26), 15 }
  0x1c   : > { %p3267_p12 = por %p93_p11, %p58_p4  ;;  %p2273_p13 = scmp.lt.s32.totalorder %s3230_s17, 15 }
  0x1d   : > { %s82_s24 = ssub.s32 %s4070_s23, %s4072_s26  ;;  %s114_s21 = sadd.s32 1, %s3235_s19 }
  0x1e   : > { %p84_p0 = scmp.eq.s32.totalorder %s82_s24, 0  ;;  %s4074_s17 = smov (!%p2273_p13, %s3230_s17), 15 }
  0x1f   : > { %p2278_p1 = scmp.lt.s32.totalorder %s114_s21, 15  ;;  %s124_s6 = sadd.s32 1, %s3097_s30 }
  0x20   : > { %s3275_s25 = scalar_select %p84_p0, %s3105_s10, %s86_s16  }
  0x21   : > { %p131_p2 = scmp.ne.s32.totalorder %s3097_s30, %s3093_s29  ;;  %s211_s4 = ssub.s32 %s3121_s14, %s3235_s19 }
  0x22   : > { %4019 = sst [smem:[#allocation8_spill]] %s3275_s25  ;;  %s4076_s21 = smov (!%p2278_p1, %s114_s21), 15 }
  0x23   : > { %p3287_p3 = por %p131_p2, %p58_p4  ;;  %p213_p6 = scmp.eq.s32.totalorder %s211_s4, 0 }
  0x24   : > { %s120_s26 = ssub.s32 %s4074_s17, %s4076_s21  ;;  %s215_s5 = sadd.s32 1, %s3089_s28 }
  0x25   : > { %p122_p7 = scmp.eq.s32.totalorder %s120_s26, 0  ;;  %p225_p8 = scmp.ne.s32.totalorder %s3089_s28, %s3085_s27 }
  0x26   : > { %s3296_s16 = scalar_select %p213_p6, %s3089_s28, %s215_s5  }
  0x27   : > { %s3299_s24 = scalar_select %p122_p7, %s3097_s30, %s124_s6  }
  0x28   : > { %s4021_s25 = sadd.s32 4294967295, %s3125_s15   ;;  %p2284_p4 = scmp.ge.s32.totalorder %s3125_s15, 16 }
  0x29   : > { %p226_p9 = scmp.eq.s32.totalorder %s4021_s25, 15 }
  0x2a   : > { %309 = sbr.rel (%p2284_p4) target bundleno = 70 (0x46), region = 28 }
  0x2b   : > { %p3303_p10 = por %p226_p9, %p225_p8 }
  0x31   : > { %312 = sbr.rel (!%p3246_p5) target bundleno = 56 (0x38), region = 32  ;;  %s314_s4 = sand.u32 (%p3246_p5), 1, %s3113_s12  }
  0x32   : > { %s2870_s21 = smul.u32 (%p3246_p5), 12, %s4066_s18 }
  0x33   : > { %s2869_s5 = smul.u32 (%p3246_p5), 24, %s314_s4 }
  0x34   : > { %s327_s19 = scalar_lea.vmem (%p3246_p5), %s3998_s0, %s2870_s21 }
  0x35   : > { %v343_v0 = vld [vmem:[%s327_s19] sm:$0xff] (%p3246_p5)   ;;  %v347_v1 = vld [vmem:[%s327_s19 + $0x8] sm:$0xf] (%p3246_p5)  ;;  %s316_s25 = scalar_lea.vmem (%p3246_p5), [#allocation2], %s2869_s5 }
  0x36   : > { %v349_v2 = vld [vmem:[%s327_s19 + $0xc0] sm:$0xff] (%p3246_p5)   ;;  %344 = vst [vmem:[%s316_s25] sm:$0xff] (%p3246_p5), %v343_v0   ;;  %348 = vst [vmem:[%s316_s25 + $0x8] sm:$0xf] (%p3246_p5), %v347_v1  ;;  %v353_v3 = vld [vmem:[%s327_s19 + $0xc8] sm:$0xf] (%p3246_p5) }
  0x37   : > { %350 = vst [vmem:[%s316_s25 + $0xc] sm:$0xff] (%p3246_p5), %v349_v2   ;;  %354 = vst [vmem:[%s316_s25 + $0x14] sm:$0xf] (%p3246_p5), %v353_v3 }
  0x38 PF: > { %389 = sbr.rel (!%p3267_p12) target bundleno = 63 (0x3f), region = 73  ;;  %s391_s18 = sand.u32 (%p3267_p12), 1, %s3105_s10  }
  0x39   : > { %s2872_s22 = smul.u32 (%p3267_p12), 12, %s4070_s23 }
  0x3a   : > { %s2871_s4 = smul.u32 (%p3267_p12), 24, %s391_s18 }
  0x3b   : > { %s403_s6 = scalar_lea.vmem (%p3267_p12), %s3999_s1, %s2872_s22 }
  0x3c   : > { %v419_v4 = vld [vmem:[%s403_s6] sm:$0xff] (%p3267_p12)   ;;  %v423_v5 = vld [vmem:[%s403_s6 + $0x8] sm:$0xf] (%p3267_p12)  ;;  %s393_s5 = scalar_lea.vmem (%p3267_p12), [#allocation3], %s2871_s4 }
  0x3d   : > { %v425_v6 = vld [vmem:[%s403_s6 + $0xc0] sm:$0xff] (%p3267_p12)   ;;  %420 = vst [vmem:[%s393_s5] sm:$0xff] (%p3267_p12), %v419_v4   ;;  %424 = vst [vmem:[%s393_s5 + $0x8] sm:$0xf] (%p3267_p12), %v423_v5  ;;  %v429_v7 = vld [vmem:[%s403_s6 + $0xc8] sm:$0xf] (%p3267_p12) }
  0x3e   : > { %426 = vst [vmem:[%s393_s5 + $0xc] sm:$0xff] (%p3267_p12), %v425_v6   ;;  %430 = vst [vmem:[%s393_s5 + $0x14] sm:$0xf] (%p3267_p12), %v429_v7 }
  0x3f PF: > { %465 = sbr.rel (!%p3287_p3) target bundleno = 70 (0x46), region = 114  ;;  %s467_s19 = sand.u32 (%p3287_p3), 1, %s3097_s30  }
  0x40   : > { %s2874_s23 = smul.u32 (%p3287_p3), 12, %s4074_s17 }
  0x41   : > { %s2873_s20 = smul.u32 (%p3287_p3), 24, %s467_s19 }
  0x42   : > { %s480_s22 = scalar_lea.vmem (%p3287_p3), %s4000_s2, %s2874_s23 }
  0x43   : > { %v496_v8 = vld [vmem:[%s480_s22] sm:$0xff] (%p3287_p3)   ;;  %v500_v9 = vld [vmem:[%s480_s22 + $0x8] sm:$0xf] (%p3287_p3)  ;;  %s469_s4 = scalar_lea.vmem (%p3287_p3), [#allocation4], %s2873_s20 }
  0x44   : > { %v502_v10 = vld [vmem:[%s480_s22 + $0xc0] sm:$0xff] (%p3287_p3)   ;;  %497 = vst [vmem:[%s469_s4] sm:$0xff] (%p3287_p3), %v496_v8   ;;  %501 = vst [vmem:[%s469_s4 + $0x8] sm:$0xf] (%p3287_p3), %v500_v9  ;;  %v506_v11 = vld [vmem:[%s480_s22 + $0xc8] sm:$0xf] (%p3287_p3) }
  0x45   : > { %503 = vst [vmem:[%s469_s4 + $0xc] sm:$0xff] (%p3287_p3), %v502_v10   ;;  %507 = vst [vmem:[%s469_s4 + $0x14] sm:$0xf] (%p3287_p3), %v506_v11 }
  0x46 PF: > { %p2303_p5 = scmp.ge.s32.totalorder %s3125_s15, 1  ;;  %p541_p11 = scmp.lt.s32.totalorder %s3125_s15, 17 }
  0x48   : > { %p542_p12 = pnand %p2303_p5, %p541_p11 }
  0x49   : > { %s548_s3 = sand.u32 (!%p542_p12), 1, %s3109_s11   ;;  %s555_s17 = sand.u32 (!%p542_p12), 1, %s3101_s9  }
  0x4a   : > { %545 = sbr.rel (%p542_p12) target bundleno = 509 (0x1fd), region = 155  ;;  %s562_s21 = sand.u32 (!%p542_p12), 1, %s3093_s29  }
  0x4b   : > { %s2875_s26 = smul.u32 (!%p542_p12), 24, %s548_s3  ;;  %s595_s5 = sand.u32 (!%p542_p12), 1, %s3085_s27  }
  0x4c   : > { %s2876_s6 = smul.u32 (!%p542_p12), 24, %s555_s17  ;;  %s2304_s23 = sshll.u32 (!%p542_p12), %s595_s5, 5 }
  0x4d   : > { %s2877_s19 = smul.u32 (!%p542_p12), 24, %s562_s21  ;;  %s3335_s20 = scalar_lea.vmem (!%p542_p12), [#allocation2], %s2875_s26 }
  0x4e   : > { %s3337_s25 = scalar_lea.vmem (!%p542_p12), [#allocation3], %s2876_s6  ;;  %s3341_s22 = scalar_lea.vmem (!%p542_p12), [#allocation5], %s2304_s23 }
  0x4f   : > { %s3339_s18 = scalar_lea.vmem (!%p542_p12), [#allocation4], %s2877_s19  ;;  %p2305_p13 = scmp.ne.s32.totalorder (!%p542_p12), %s3117_s13, 0 }
  0x51   : > { %636 = sbr.rel (%p2305_p13) target bundleno = 88 (0x58), region = 171  ;;  %v3127_v12 = vmov (!%p2305_p13), 0.0   ;;  %s4023_s4 = sld [smem:[#allocation13_spill]] (!%p2305_p13) }
  0x52   : > { %637 = vst [vmem:[%s4005_s7] sm:$0x1] (!%p2305_p13), %v3127_v12 }
  0x57   : > { %638 = vst [vmem:[%s4023_s4] sm:$0x1] (!%p2305_p13), %v3127_v12 }
  0x58 PF: > { %s4024_s26 = sld [smem:[#allocation11_spill]]  ;;  %v641_v19 = vlaneseq  ;;  %p696_p0 = scmp.ge.s32.totalorder %s3117_s13, 1  ;;  %v2556_v28 = vld [vmem:[%s3335_s20] sm:$0xff]   ;;  %v656_v32 = vld [vmem:[%s3335_s20 + $0x8] sm:$0x1]  ;;  %v2560_v39 = vld [vmem:[%s3337_s25] sm:$0xff]  }
  0x59   : > { %p697_p1 = scmp.le.s32.totalorder %s3117_s13, 16  ;;  %s1137_s21 = sadd.s32 1, %s3117_s13  ;;  %v2557_v30 = vunpack.c.l.bf16 %v2556_v28  ;;  %v2558_v31 = vunpack.c.h.bf16 %v2556_v28  ;;  %v662_v34 = vunpack.c.l.bf16 %v656_v32  ;;  %v1109_v40 = vld [vmem:[%s3337_s25 + $0x8] sm:$0x1]  ;;  %v2561_v42 = vunpack.c.l.bf16 %v2560_v39  ;;  %v657_v44 = vld [vmem:[%s3335_s20 + $0xc] sm:$0xff]  }
  0x5a   : > { %v3377_v22 = vshrl.u32 %v641_v19, 7  ;;  %p3379_p2 = scmp.ge.s32.totalorder %s1137_s21, 1  ;;  %p3383_p3 = scmp.le.s32.totalorder %s1137_s21, 16  ;;  %v2562_v43 = vunpack.c.h.bf16 %v2560_v39  ;;  %v1115_v48 = vunpack.c.l.bf16 %v1109_v40  ;;  %v659_v55 = vld [vmem:[%s3335_s20 + $0x14] sm:$0x1]  ;;  %v663_v60 = vunpack.c.l.bf16 %v657_v44 }
  0x5b   : > { %p3400_p6 = pnand %p697_p1, %p696_p0  ;;  %s4028_s5 = sld [smem:[#allocation9_spill]]  ;;  %vm738_vm6 = vsmask.f32 7424  ;;  %v664_v1 = vunpack.c.h.bf16 %v657_v44  ;;  %v665_v7 = vunpack.c.l.bf16 %v659_v55  ;;  %vm980_vm11 = vcmask 1046528  }
  0x5c   : > { %v3394_v25 = vadd.s32 16, %v3377_v22  ;;  %p1140_p7 = pnand %p3383_p3, %p3379_p2  ;;  %vm645_vm0 = vcmp.ge.s32.totalorder %v3377_v22, 1  ;;  %s4029_s17 = sld [smem:[#allocation10_spill]] }
  0x5d   : > { %s2308_s29 = scalar_select %p3400_p6, 0, 1 }
  0x5e   : > { %v2967_v13 = vld [vmem:[%s4024_s26 + $0x40] sm:$0xff]   ;;  %v2969_v15 = vld [vmem:[%s4024_s26 + $0x48] sm:$0xff]   ;;  %v2971_v17 = vld [vmem:[%s4024_s26 + $0x50] sm:$0xff]   ;;  %vm650_vm1 = vcmp.le.s32.totalorder %v3394_v25, 16  ;;  %s2371_s4 = scalar_select %p1140_p7, 0, 1 }
  0x5f   : > { %v2968_v14 = vld [vmem:[%s4024_s26 + $0x100] sm:$0xff]   ;;  %2657 = vmatprep.subr.bf16.mxu1 %v2967_v13  ;;  %v2970_v16 = vld [vmem:[%s4024_s26 + $0x108] sm:$0xff]   ;;  %v2972_v18 = vld [vmem:[%s4024_s26 + $0x110] sm:$0xff]   ;;  %v3435_v38 = vstv %s2308_s29  ;;  %s1586_s6 = sadd.s32 2, %s3117_s13  ;;  %s4051_s20 = sld [smem:[#allocation12_spill]] (%p3303_p10) }
  0x60   : > { %2737 = vmatprep.subr.bf16.mxu0 %v2968_v14  ;;  %2658 = vmatpush3.bf16.msra.mxu1 %v2967_v13  ;;  %v2973_v20 = vld [vmem:[%s4024_s26 + $0x58] sm:$0xff]   ;;  %v2975_v23 = vld [vmem:[%s4024_s26 + $0x60] sm:$0xff]   ;;  %v2977_v26 = vld [vmem:[%s4024_s26 + $0x68] sm:$0xff]   ;;  %vm702_vm2 = vcmp.eq.s32.totalorder %v3435_v38, 1  ;;  %v1143_v49 = vstv %s2371_s4  ;;  %p3647_p8 = scmp.ge.s32.totalorder %s1586_s6, 1  ;;  %p3651_p9 = scmp.le.s32.totalorder %s1586_s6, 16 }
  0x61   : > { %2738 = vmatpush3.bf16.msra.mxu0 %v2968_v14  ;;  %2659 = vmatprep.subr.bf16.mxu1 %v2969_v15  ;;  %v2974_v21 = vld [vmem:[%s4024_s26 + $0x118] sm:$0xff]   ;;  %v2976_v24 = vld [vmem:[%s4024_s26 + $0x120] sm:$0xff]   ;;  %v2978_v29 = vld [vmem:[%s4024_s26 + $0x128] sm:$0xff]   ;;  %vm3467_vm4 = vcmp.eq.s32.totalorder %v1143_v49, 1  ;;  %s2554_s4 = sshll.u32 (%p3303_p10), %s3117_s13, 4 }
  0x62   : > { %2739 = vmatprep.subr.bf16.mxu0 %v2970_v16  ;;  %v3414_v27 = vld [vmem:[%s4028_s5] ss:$0 sm:$0xff]  ;;  %v2979_v35 = vld [vmem:[%s4024_s26 + $0x70] sm:$0xff]   ;;  %vm3461_vm3 = vmand %vm645_vm0, %vm702_vm2  ;;  %p1589_p4 = pnand %p3651_p9, %p3647_p8 }
  0x63   : > { %v3428_v33 = vld [vmem:[%s4029_s17] ss:$0 sm:$0xff]  ;;  %v672_v36 = vmul.f32 %v2557_v30, %v3414_v27  ;;  %v673_v37 = vmul.f32 %v2558_v31, %v3414_v27  ;;  %v674_v41 = vmul.f32 %v3414_v27, %v662_v34  ;;  %v2980_v45 = vld [vmem:[%s4024_s26 + $0x130] sm:$0xff]   ;;  %v1119_v52 = vmul.f32 %v2561_v42, %v3414_v27  ;;  %vm3478_vm5 = vmand %vm650_vm1, %vm702_vm2  ;;  %s4050_s17 = sld [smem:[#allocation13_spill]] }
  0x64   : > { %2660 = vmatpush3.bf16.msra.mxu1 %v2969_v15  ;;  %v1120_v53 = vmul.f32 %v2562_v43, %v3414_v27  ;;  %v1121_v59 = vmul.f32 %v3414_v27, %v1115_v48  ;;  %v2981_v61 = vld [vmem:[%s4024_s26 + $0x78] sm:$0xff]   ;;  %vm3508_vm7 = vmand %vm645_vm0, %vm3467_vm4  ;;  %v3519_v10 = vld [vmem:[%s4024_s26] sm:$0xff]   ;;  %s2450_s21 = scalar_select %p1589_p4, 0, 1 }
  0x65   : > { %2740 = vmatpush3.bf16.msra.mxu0 %v2970_v16  ;;  %2661 = vmatprep.subr.bf16.mxu1 %v2971_v17  ;;  %v3451_v46 = vadd.f32 %v3428_v33, %v672_v36  ;;  %v3454_v47 = vadd.f32 %v3428_v33, %v673_v37  ;;  %v686_v50 = vadd.f32 %v3428_v33, %v674_v41  ;;  %v2982_v2 = vld [vmem:[%s4024_s26 + $0x138] sm:$0xff]   ;;  %vm3527_vm8 = vmand %vm650_vm1, %vm3467_vm4  ;;  %v3536_v16 = vld [vmem:[%s4024_s26 + $0x140] sm:$0xff]   ;;  %s2055_s19 = scalar_lea.vmem (%p3303_p10), %s4051_s20, %s2554_s4 }
  0x66   : > { %2741 = vmatprep.subr.bf16.mxu0 %v2972_v18  ;;  %v3487_v63 = vadd.f32 %v3428_v33, %v1119_v52  ;;  %v3490_v0 = vadd.f32 %v3428_v33, %v1120_v53  ;;  %v1127_v5 = vadd.f32 %v3428_v33, %v1121_v59  ;;  %vm2396_vm9 = vmpackc.low %vm3467_vm4, %vm3508_vm7  ;;  %v1112_v36 = vld [vmem:[%s3337_s25 + $0x14] sm:$0x1]  ;;  %v2987_v13 = vld [vmem:[%s4024_s26 + $0x10] sm:$0xff]  }
  0x67   : > { %v690_v56 = vmax.f32 %v3451_v46, 0.0  ;;  %v691_v57 = vmax.f32 %v3454_v47, 0.0  ;;  %v692_v62 = vmax.f32 %v686_v50, 0.0  ;;  %vm3624_vm10 = vmpackc.low %vm702_vm2, %vm3461_vm3  ;;  %v3033_v54 = vld [vmem:[%s4024_s26 + $0x210] sm:$0xff]   ;;  %v3034_v6 = vld [vmem:[%s4024_s26 + $0x218] sm:$0xff]  }
  0x68   : > { %2662 = vmatpush3.bf16.msra.mxu1 %v2971_v17  ;;  %v1131_v11 = vmax.f32 %v3487_v63, 0.0  ;;  %v1132_v12 = vmax.f32 %v3490_v0, 0.0  ;;  %v1133_v15 = vmax.f32 %v1127_v5, 0.0  ;;  %v675_v17 = vmul.f32 %v3414_v27, %v663_v60 }
  0x69   : > { %2742 = vmatpush3.bf16.msra.mxu0 %v2972_v18  ;;  %2663 = vmatprep.subr.bf16.mxu1 %v2973_v20  ;;  %v712_v3 = vsel %vm3461_vm3, %v690_v56, 0.0  ;;  %v713_v4 = vsel %vm702_vm2, %v691_v57, 0.0  ;;  %v714_v8 = vsel %vm3478_vm5, %v692_v62, 0.0  ;;  %v676_v18 = vmul.f32 %v3414_v27, %v664_v1 }
  0x6a   : > { %2743 = vmatprep.subr.bf16.mxu0 %v2974_v21  ;;  %v3514_v9 = vpack.c.bf16 %v713_v4, %v712_v3  ;;  %v3531_v14 = vpack.c.bf16 %v714_v8, %v714_v8  ;;  %v3563_v32 = vadd.f32 %v3428_v33, %v675_v17 }
  0x6b   : > { %v3566_v34 = vadd.f32 %v3428_v33, %v676_v18 }
  0x6c   : > { %2664 = vmatpush3.bf16.msra.mxu1 %v2973_v20  ;;  %v740_v19 = vshrl.u32 %v3514_v9, 16  ;;  %v742_v20 = vshll.u32 %v3514_v9, 16  ;;  %v693_v44 = vmax.f32 %v3563_v32, 0.0  ;;  %v3001_v32 = vld [vmem:[%s4024_s26 + $0x88] sm:$0xff]  }
  0x6d   : > { %2744 = vmatpush3.bf16.msra.mxu0 %v2974_v21  ;;  %2665 = vmatprep.subr.bf16.mxu1 %v2975_v23  ;;  %v1154_v21 = vsel %vm3508_vm7, %v1131_v11, 0.0 }
  0x6e   : > { %2745 = vmatprep.subr.bf16.mxu0 %v2976_v24  ;;  %v744_v30 = vrot.slane %v742_v20, 1  ;;  %v715_v59 = vsel %vm3461_vm3, %v693_v44, 0.0 }
  0x70   : > { %2666 = vmatpush3.bf16.msra.mxu1 %v2975_v23  ;;  %v1155_v23 = vsel %vm3467_vm4, %v1132_v12, 0.0  ;;  %v745_v42 = vor.u32 %v744_v30, %v740_v19 }
  0x71   : > { %2746 = vmatpush3.bf16.msra.mxu0 %v2976_v24  ;;  %2667 = vmatprep.subr.bf16.mxu1 %v2977_v26  ;;  %v747_v24 = vshll.u32 %v3531_v14, 16  ;;  %v3557_v28 = vpack.c.bf16 %v1155_v23, %v1154_v21  ;;  %v3607_v23 = vpack.c.bf16 %v1132_v12, %v1131_v11 }
  0x72   : > { %2747 = vmatprep.subr.bf16.mxu0 %v2978_v29 }
  0x73   : > { %v749_v37 = vrot.slane %v747_v24, 1  ;;  %v1283_v39 = vshrl.u32 %v3557_v28, 16  ;;  %v1285_v40 = vshll.u32 %v3557_v28, 16 }
  0x74   : > { %2668 = vmatpush3.bf16.msra.mxu1 %v2977_v26  ;;  %v1156_v26 = vsel %vm3527_vm8, %v1133_v15, 0.0 }
  0x75   : > { %2748 = vmatpush3.bf16.msra.mxu0 %v2978_v29  ;;  %2669 = vmatprep.subr.bf16.mxu1 %v2979_v35  ;;  %v677_v29 = vmul.f32 %v3414_v27, %v665_v7  ;;  %v3560_v31 = vpack.c.bf16 %v1156_v26, %v1156_v26  ;;  %v1287_v48 = vrot.slane %v1285_v40, 1  ;;  %v750_v53 = vsel %vm738_vm6, %v745_v42, %v749_v37  ;;  %v2986_v42 = vld [vmem:[%s4024_s26 + $0x148] sm:$0xff]  }
  0x76   : > { %2749 = vmatprep.subr.bf16.mxu0 %v2980_v45  ;;  %2673 = vmatprep.mubr.bf16.mxu1 %v750_v53  ;;  %v2342_v37 = vpack.c.bf16 %v691_v57, %v690_v56  ;;  %v1430_v40 = vrot.slane %v3557_v28, 1 }
  0x77   : > { %v689_v41 = vadd.f32 %v3428_v33, %v677_v29  ;;  %v1290_v43 = vshll.u32 %v3560_v31, 16 }
  0x78   : > { %2670 = vmatpush3.bf16.msra.mxu1 %v2979_v35  ;;  %v1110_v35 = vld [vmem:[%s3337_s25 + $0xc] sm:$0xff]  }
  0x79   : > { %2750 = vmatpush3.bf16.msra.mxu0 %v2980_v45  ;;  %2671 = vmatprep.subr.bf16.mxu1 %v2981_v61  ;;  %v694_v45 = vmax.f32 %v3566_v34, 0.0  ;;  %v695_v49 = vmax.f32 %v689_v41, 0.0  ;;  %v1116_v50 = vunpack.c.l.bf16 %v1110_v35  ;;  %v1117_v52 = vunpack.c.h.bf16 %v1110_v35  ;;  %v1558_v34 = vld [vmem:[%s3339_s18 + $0x8] sm:$0x1] }
  0x7a   : > { %2751 = vmatprep.subr.bf16.mxu0 %v2982_v2  ;;  %v1292_v55 = vrot.slane %v1290_v43, 1  ;;  %v1431_v43 = vrot.slane %v3560_v31, 1  ;;  %v2988_v31 = vld [vmem:[%s4024_s26 + $0x150] sm:$0xff]  }
  0x7b   : > { %v716_v60 = vsel %vm702_vm2, %v694_v45, 0.0  ;;  %v717_v62 = vsel %vm3478_vm5, %v695_v49, 0.0  ;;  %v1122_v4 = vmul.f32 %v3414_v27, %v1116_v50  ;;  %v1123_v5 = vmul.f32 %v3414_v27, %v1117_v52  ;;  %v2989_v49 = vld [vmem:[%s4024_s26 + $0x18] sm:$0xff]  }
  0x7c   : > { %2672 = vmatpush3.bf16.msra.mxu1 %v2981_v61  ;;  %v1288_v61 = vor.u32 %v1287_v48, %v1283_v39  ;;  %v3589_v1 = vpack.c.bf16 %v716_v60, %v715_v59  ;;  %v3591_v3 = vpack.c.bf16 %v717_v62, %v717_v62  ;;  %v1432_v52 = vsel %vm980_vm11, %v1430_v40, %v1431_v43  ;;  %v2993_v60 = vld [vmem:[%s4024_s26 + $0x28] sm:$0xff]   ;;  %v2998_v43 = vld [vmem:[%s4024_s26 + $0x178] sm:$0xff]  }
  0x7d   : > { %2752 = vmatpush3.bf16.msra.mxu0 %v2982_v2  ;;  %2677 = vmatprep.subr.bf16.mxu1 %v3519_v10  ;;  %v1118_v2 = vunpack.c.l.bf16 %v1112_v36  ;;  %v1128_v18 = vadd.f32 %v3428_v33, %v1122_v4  ;;  %v1129_v19 = vadd.f32 %v3428_v33, %v1123_v5  ;;  %v2985_v36 = vld [vmem:[%s4024_s26 + $0x8] sm:$0xff]   ;;  %v2992_v5 = vld [vmem:[%s4024_s26 + $0x160] sm:$0xff]   ;;  %v2345_v40 = vpack.c.bf16 %v694_v45, %v693_v44 }
  0x7e   : > { %2757 = vmatprep.subr.bf16.mxu0 %v3536_v16  ;;  %v1293_v7 = vsel %vm738_vm6, %v1288_v61, %v1292_v55  ;;  %v752_v8 = vshrl.u32 %v3589_v1, 16  ;;  %v754_v15 = vshll.u32 %v3589_v1, 16  ;;  %v759_v58 = vshll.u32 %v3591_v3, 16  ;;  %v2991_v55 = vld [vmem:[%s4024_s26 + $0x20] sm:$0xff]  }
  0x7f   : > { %v1124_v17 = vmul.f32 %v3414_v27, %v1118_v2  ;;  %2753 = vmatprep.mubr.bf16.mxu0 %v1293_v7  ;;  %v1134_v26 = vmax.f32 %v1128_v18, 0.0  ;;  %v1135_v29 = vmax.f32 %v1129_v19, 0.0  ;;  %v984_v28 = vrot.slane %v3589_v1, 1  ;;  %v2564_v61 = vld [vmem:[%s3339_s18] sm:$0xff]   ;;  %v1559_v2 = vld [vmem:[%s3339_s18 + $0xc] sm:$0xff]  }
  0x80   : > { %v756_v20 = vrot.slane %v754_v15, 1  ;;  %v761_v24 = vrot.slane %v759_v58, 1  ;;  %v985_v53 = vrot.slane %v3591_v3, 1  ;;  %v2565_v62 = vunpack.c.l.bf16 %v2564_v61 }
  0x81   : > { %v1130_v21 = vadd.f32 %v3428_v33, %v1124_v17  ;;  %v1157_v63 = vsel %vm3508_vm7, %v1134_v26, 0.0  ;;  %v1158_v0 = vsel %vm3467_vm4, %v1135_v29, 0.0  ;;  %v3628_v12 = vpack.c.bf16 %v1135_v29, %v1134_v26  ;;  %v2995_v17 = vld [vmem:[%s4024_s26 + $0x30] sm:$0xff]   ;;  %v2994_v29 = vld [vmem:[%s4024_s26 + $0x168] sm:$0xff]   ;;  %v3022_v26 = vld [vmem:[%s4024_s26 + $0x1d8] sm:$0xff]  }
  0x82   : > { %v757_v30 = vor.u32 %v756_v20, %v752_v8  ;;  %v3633_v56 = vpack.c.bf16 %v1158_v0, %v1157_v63  ;;  %v3679_v59 = vsel %vm980_vm11, %v984_v28, %v985_v53  ;;  %v2566_v1 = vunpack.c.h.bf16 %v2564_v61  ;;  %v2996_v0 = vld [vmem:[%s4024_s26 + $0x170] sm:$0xff]   ;;  %v3025_v63 = vld [vmem:[%s4024_s26 + $0xe8] sm:$0xff]  }
  0x83   : > { %v1136_v35 = vmax.f32 %v1130_v21, 0.0  ;;  %v1565_v3 = vunpack.c.l.bf16 %v1559_v2  ;;  %v1566_v4 = vunpack.c.h.bf16 %v1559_v2  ;;  %v1568_v7 = vmul.f32 %v2565_v62, %v3414_v27 }
  0x84   : > { %v762_v46 = vsel %vm738_vm6, %v757_v30, %v761_v24  ;;  %v1295_v38 = vshrl.u32 %v3633_v56, 16  ;;  %v1297_v51 = vshll.u32 %v3633_v56, 16  ;;  %v1569_v8 = vmul.f32 %v2566_v1, %v3414_v27  ;;  %v2997_v30 = vld [vmem:[%s4024_s26 + $0x38] sm:$0xff]  }
  0x85   : > { %v1159_v47 = vsel %vm3527_vm8, %v1136_v35, 0.0  ;;  %2674 = vmatmul.mubr.bf16.vlgmr.msra.gmra.mrb[0].mxu1 %v762_v46  ;;  %v1592_v15 = vstv %s2450_s21  ;;  %v1571_v58 = vmul.f32 %v3414_v27, %v1565_v3  ;;  %v1572_v18 = vmul.f32 %v3414_v27, %v1566_v4 }
  0x86   : > { %v3636_v57 = vpack.c.bf16 %v1159_v47, %v1159_v47  ;;  %2678 = vmatpush3.bf16.msra.mxu1 %v3519_v10  ;;  %2693 = vmatprep.mubr.msk.bf16.mxu1 %vm3624_vm10, %v2342_v37  ;;  %v1299_v10 = vrot.slane %v1297_v51, 1  ;;  %v3700_v19 = vadd.f32 %v3428_v33, %v1568_v7  ;;  %v3703_v20 = vadd.f32 %v3428_v33, %v1569_v8 }
  0x87   : > { %2679 = vmatprep.subr.bf16.mxu1 %v2985_v36  ;;  %v1577_v21 = vadd.f32 %v3428_v33, %v1571_v58  ;;  %v1578_v24 = vadd.f32 %v3428_v33, %v1572_v18  ;;  %vm3707_vm12 = vcmp.eq.s32.totalorder %v1592_v15, 1 }
  0x88   : > { %v1302_v39 = vshll.u32 %v3636_v57, 16  ;;  %v1300_v48 = vor.u32 %v1299_v10, %v1295_v38  ;;  %v1580_v37 = vmax.f32 %v3700_v19, 0.0  ;;  %vm3722_vm13 = vmand %vm645_vm0, %vm3707_vm12  ;;  %v1581_v46 = vmax.f32 %v3703_v20, 0.0 }
  0x89   : > { %v1583_v35 = vmax.f32 %v1577_v21, 0.0  ;;  %v1434_v44 = vrot.slane %v3636_v57, 1  ;;  %v3005_v57 = vld [vmem:[%s4024_s26 + $0x98] sm:$0xff]   ;;  %vm3785_vm14 = vmand %vm650_vm1, %vm3707_vm12 }
  0x8a   : > { %v1304_v41 = vrot.slane %v1302_v39, 1  ;;  %2680 = vmatpush3.bf16.msra.mxu1 %v2985_v36  ;;  %v1584_v36 = vmax.f32 %v1578_v24, 0.0  ;;  %v2999_v39 = vld [vmem:[%s4024_s26 + $0x80] sm:$0xff]   ;;  %v1604_v10 = vsel %vm3707_vm12, %v1581_v46, 0.0  ;;  %v2476_v3 = vpack.c.bf16 %v1581_v46, %v1580_v37  ;;  %vm2475_vm15 = vmpackc.low %vm3707_vm12, %vm3722_vm13  ;;  %v3009_v46 = vld [vmem:[%s4024_s26 + $0xa8] sm:$0xff]  }
  0x8b   : > { %2681 = vmatprep.subr.bf16.mxu1 %v2987_v13  ;;  %v1606_v47 = vsel %vm3722_vm13, %v1583_v35, 0.0 }
  0x8c   : > { %v1305_v50 = vsel %vm738_vm6, %v1300_v48, %v1304_v41  ;;  %v1607_v38 = vsel %vm3707_vm12, %v1584_v36, 0.0  ;;  %v3734_v51 = vpack.c.bf16 %v1584_v36, %v1583_v35  ;;  %v981_v41 = vrot.slane %v3514_v9, 1  ;;  %v3000_v9 = vld [vmem:[%s4024_s26 + $0x180] sm:$0xff]  }
  0x8d   : > { %2754 = vmatmul.mubr.bf16.vlgmr.msra.gmra.mrb[0].mxu0 %v1305_v50  ;;  %v3736_v22 = vpack.c.bf16 %v1607_v38, %v1606_v47  ;;  %v1561_v50 = vld [vmem:[%s3339_s18 + $0x14] sm:$0x1] }
  0x8e   : > { %2758 = vmatpush3.bf16.msra.mxu0 %v3536_v16  ;;  %2682 = vmatpush3.bf16.msra.mxu1 %v2987_v13  ;;  %v2990_v16 = vld [vmem:[%s4024_s26 + $0x158] sm:$0xff]   ;;  %v1603_v13 = vsel %vm3722_vm13, %v1580_v37, 0.0 }
  0x8f   : > { %2759 = vmatprep.subr.bf16.mxu0 %v2986_v42  ;;  %2683 = vmatprep.subr.bf16.mxu1 %v2989_v49  ;;  %v1609_v48 = vpack.c.bf16 %v1604_v10, %v1603_v13  ;;  %v1882_v24 = vrot.slane %v3736_v22, 1  ;;  %v3008_v13 = vld [vmem:[%s4024_s26 + $0x1a0] sm:$0xff]   ;;  %v3011_v10 = vld [vmem:[%s4024_s26 + $0xb0] sm:$0xff]  }
  0x90   : > { %2773 = vmatprep.mubr.bf16.mxu0 %v1432_v52  ;;  %v3003_v52 = vld [vmem:[%s4024_s26 + $0x90] sm:$0xff]  }
  0x91   : > { %v1734_v11 = vshll.u32 %v1609_v48, 16  ;;  %v1732_v62 = vshrl.u32 %v1609_v48, 16  ;;  %v1879_v15 = vrot.slane %v1609_v48, 1  ;;  %v3017_v48 = vld [vmem:[%s4024_s26 + $0xc8] sm:$0xff]  }
  0x92   : > { %2760 = vmatpush3.bf16.msra.mxu0 %v2986_v42  ;;  %2684 = vmatpush3.bf16.msra.mxu1 %v2989_v49  ;;  %v982_v42 = vrot.slane %v3531_v14, 1  ;;  %v1433_v14 = vrot.slane %v3633_v56, 1  ;;  %v1564_v49 = vunpack.c.l.bf16 %v1558_v34  ;;  %v3002_v56 = vld [vmem:[%s4024_s26 + $0x188] sm:$0xff]   ;;  %v3016_v34 = vld [vmem:[%s4024_s26 + $0x1c0] sm:$0xff]  }
  0x93   : > { %2761 = vmatprep.subr.bf16.mxu0 %v2988_v31  ;;  %2685 = vmatprep.subr.bf16.mxu1 %v2991_v55  ;;  %v1736_v2 = vrot.slane %v1734_v11, 1  ;;  %v3031_v11 = vld [vmem:[%s4024_s26 + $0x200] sm:$0xff]  }
  0x94   : > { %v983_v45 = vsel %vm980_vm11, %v981_v41, %v982_v42  ;;  %v1570_v28 = vmul.f32 %v3414_v27, %v1564_v49  ;;  %v3013_v41 = vld [vmem:[%s4024_s26 + $0xb8] sm:$0xff]   ;;  %v3012_v42 = vld [vmem:[%s4024_s26 + $0x1b0] sm:$0xff]   ;;  %v3026_v49 = vld [vmem:[%s4024_s26 + $0x1e8] sm:$0xff]  }
  0x95   : > { %v1737_v58 = vor.u32 %v1736_v2, %v1732_v62 }
  0x96   : > { %2762 = vmatpush3.bf16.msra.mxu0 %v2988_v31  ;;  %2686 = vmatpush3.bf16.msra.mxu1 %v2991_v55  ;;  %v1567_v31 = vunpack.c.l.bf16 %v1561_v50  ;;  %v1576_v53 = vadd.f32 %v3428_v33, %v1570_v28  ;;  %v3029_v50 = vld [vmem:[%s4024_s26 + $0xf8] sm:$0xff]  }
  0x97   : > { %2763 = vmatprep.subr.bf16.mxu0 %v2990_v16  ;;  %2687 = vmatprep.subr.bf16.mxu1 %v2993_v60  ;;  %v3030_v28 = vld [vmem:[%s4024_s26 + $0x1f8] sm:$0xff]  }
  0x98   : > { %v1573_v55 = vmul.f32 %v3414_v27, %v1567_v31  ;;  %v1582_v1 = vmax.f32 %v1576_v53, 0.0  ;;  %v3032_v31 = vld [vmem:[%s4024_s26 + $0x208] sm:$0xff]   ;;  %v3038_v53 = vld [vmem:[%s4024_s26 + $0x238] sm:$0xff]  }
  0x9a   : > { %2764 = vmatpush3.bf16.msra.mxu0 %v2990_v16  ;;  %2688 = vmatpush3.bf16.msra.mxu1 %v2993_v60  ;;  %v1746_v16 = vshll.u32 %v3736_v22, 16  ;;  %v1435_v60 = vsel %vm980_vm11, %v1433_v14, %v1434_v44  ;;  %v1579_v27 = vadd.f32 %v3428_v33, %v1573_v55  ;;  %v1605_v25 = vsel %vm3785_vm14, %v1582_v1, 0.0  ;;  %v3004_v33 = vld [vmem:[%s4024_s26 + $0x190] sm:$0xff]   ;;  %v3021_v14 = vld [vmem:[%s4024_s26 + $0xd8] sm:$0xff]   ;;  %v3023_v44 = vld [vmem:[%s4024_s26 + $0xe0] sm:$0xff]  }
  0x9b   : > { %2765 = vmatprep.subr.bf16.mxu0 %v2992_v5  ;;  %2689 = vmatprep.subr.bf16.mxu1 %v2995_v17  ;;  %v1610_v8 = vpack.c.bf16 %v1605_v25, %v1605_v25 }
  0x9c   : > { %v1585_v4 = vmax.f32 %v1579_v27, 0.0  ;;  %v1748_v7 = vrot.slane %v1746_v16, 1 }
  0x9d   : > { %v1739_v19 = vshll.u32 %v1610_v8, 16  ;;  %v1880_v21 = vrot.slane %v1610_v8, 1 }
  0x9e   : > { %2766 = vmatpush3.bf16.msra.mxu0 %v2992_v5  ;;  %2690 = vmatpush3.bf16.msra.mxu1 %v2995_v17  ;;  %v1744_v5 = vshrl.u32 %v3736_v22, 16  ;;  %v3007_v17 = vld [vmem:[%s4024_s26 + $0xa0] sm:$0xff]   ;;  %v1608_v18 = vsel %vm3785_vm14, %v1585_v4, 0.0 }
  0x9f   : > { %2767 = vmatprep.subr.bf16.mxu0 %v2994_v29  ;;  %2691 = vmatprep.subr.bf16.mxu1 %v2997_v30  ;;  %v1612_v20 = vpack.c.bf16 %v1608_v18, %v1608_v18  ;;  %v3812_v36 = vsel %vm980_vm11, %v1879_v15, %v1880_v21 }
  0xa1   : > { %v1751_v35 = vshll.u32 %v1612_v20, 16  ;;  %v1883_v37 = vrot.slane %v1612_v20, 1 }
  0xa2   : > { %2768 = vmatpush3.bf16.msra.mxu0 %v2994_v29  ;;  %2692 = vmatpush3.bf16.msra.mxu1 %v2997_v30  ;;  %v1749_v29 = vor.u32 %v1748_v7, %v1744_v5  ;;  %v1741_v30 = vrot.slane %v1739_v19, 1 }
  0xa3   : > { %2769 = vmatprep.subr.bf16.mxu0 %v2996_v0  ;;  %2697 = vmatprep.subr.bf16.mxu1 %v2999_v39  ;;  %v1753_v38 = vrot.slane %v1751_v35, 1  ;;  %v3822_v22 = vsel %vm980_vm11, %v1882_v24, %v1883_v37 }
  0xa4   : > { %v1742_v47 = vsel %vm738_vm6, %v1737_v58, %v1741_v30 }
  0xa5   : > { %2694 = vmatmul.mubr.msk.bf16.vlgmr.msra.gmra.mrb[0].mxu1 %vm3624_vm10, %v2345_v40  ;;  %v3010_v40 = vld [vmem:[%s4024_s26 + $0x1a8] sm:$0xff]  }
  0xa6   : > { %2770 = vmatpush3.bf16.msra.mxu0 %v2996_v0  ;;  %2698 = vmatpush3.bf16.msra.mxu1 %v2999_v39  ;;  %v3006_v0 = vld [vmem:[%s4024_s26 + $0x198] sm:$0xff]   ;;  %v3825_v39 = vsel %vm738_vm6, %v1749_v29, %v1753_v38  ;;  %v2009_v38 = vld [vmem:[%s4005_s7] sm:$0x1] }
  0xa7   : > { %2771 = vmatprep.subr.bf16.mxu0 %v2998_v43  ;;  %2699 = vmatprep.subr.bf16.mxu1 %v3001_v32 }
  0xa8   : > { %2713 = vmatprep.mubr.bf16.mxu1 %v983_v45  ;;  %v3027_v45 = vld [vmem:[%s4024_s26 + $0xf0] sm:$0xff]  }
  0xaa   : > { %2772 = vmatpush3.bf16.msra.mxu0 %v2998_v43  ;;  %2700 = vmatpush3.bf16.msra.mxu1 %v3001_v32  ;;  %v3015_v43 = vld [vmem:[%s4024_s26 + $0xc0] sm:$0xff]   ;;  %v3014_v32 = vld [vmem:[%s4024_s26 + $0x1b8] sm:$0xff]  }
  0xab   : > { %2777 = vmatprep.subr.bf16.mxu0 %v3000_v9  ;;  %2701 = vmatprep.subr.bf16.mxu1 %v3003_v52 }
  0xad   : > { %2774 = vmatmul.mubr.bf16.vlgmr.msra.gmra.mrb[0].mxu0 %v1435_v60 }
  0xae   : > { %2778 = vmatpush3.bf16.msra.mxu0 %v3000_v9  ;;  %2702 = vmatpush3.bf16.msra.mxu1 %v3003_v52  ;;  %v3019_v9 = vld [vmem:[%s4024_s26 + $0xd0] sm:$0xff]  }
  0xaf   : > { %2779 = vmatprep.subr.bf16.mxu0 %v3002_v56  ;;  %2703 = vmatprep.subr.bf16.mxu1 %v3005_v57  ;;  %v3028_v52 = vld [vmem:[%s4024_s26 + $0x1f0] sm:$0xff]  }
  0xb0   : > { %2793 = vmatprep.mubr.msk.bf16.mxu0 %vm2475_vm15, %v2476_v3 }
  0xb2   : > { %2780 = vmatpush3.bf16.msra.mxu0 %v3002_v56  ;;  %2704 = vmatpush3.bf16.msra.mxu1 %v3005_v57  ;;  %v3036_v56 = vld [vmem:[%s4024_s26 + $0x228] sm:$0xff]   ;;  %v3037_v57 = vld [vmem:[%s4024_s26 + $0x230] sm:$0xff]  }
  0xb3   : > { %2781 = vmatprep.subr.bf16.mxu0 %v3004_v33  ;;  %2705 = vmatprep.subr.bf16.mxu1 %v3007_v17 }
  0xb6   : > { %2782 = vmatpush3.bf16.msra.mxu0 %v3004_v33  ;;  %2706 = vmatpush3.bf16.msra.mxu1 %v3007_v17 }
  0xb7   : > { %2783 = vmatprep.subr.bf16.mxu0 %v3006_v0  ;;  %2707 = vmatprep.subr.bf16.mxu1 %v3009_v46 }
  0xba   : > { %2784 = vmatpush3.bf16.msra.mxu0 %v3006_v0  ;;  %2708 = vmatpush3.bf16.msra.mxu1 %v3009_v46 }
  0xbb   : > { %2785 = vmatprep.subr.bf16.mxu0 %v3008_v13  ;;  %2709 = vmatprep.subr.bf16.mxu1 %v3011_v10 }
  0xbe   : > { %2786 = vmatpush3.bf16.msra.mxu0 %v3008_v13  ;;  %2710 = vmatpush3.bf16.msra.mxu1 %v3011_v10  ;;  %v2021_v13 = vld [vmem:[%s4050_s17] sm:$0x1] }
  0xbf   : > { %2787 = vmatprep.subr.bf16.mxu0 %v3010_v40  ;;  %2711 = vmatprep.subr.bf16.mxu1 %v3013_v41 }
  0xc2   : > { %2788 = vmatpush3.bf16.msra.mxu0 %v3010_v40  ;;  %2712 = vmatpush3.bf16.msra.mxu1 %v3013_v41 }
  0xc3   : > { %2789 = vmatprep.subr.bf16.mxu0 %v3012_v42  ;;  %2717 = vmatprep.subr.bf16.mxu1 %v3015_v43 }
  0xc5   : > { %2714 = vmatmul.mubr.bf16.vlgmr.msra.gmra.mrb[0].mxu1 %v3679_v59  ;;  %v3018_v59 = vld [vmem:[%s4024_s26 + $0x1c8] sm:$0xff]  }
  0xc6   : > { %2790 = vmatpush3.bf16.msra.mxu0 %v3012_v42  ;;  %2718 = vmatpush3.bf16.msra.mxu1 %v3015_v43 }
  0xc7   : > { %2791 = vmatprep.subr.bf16.mxu0 %v3014_v32  ;;  %2719 = vmatprep.subr.bf16.mxu1 %v3017_v48 }
  0xc8   : > { %2733 = vmatprep.mubr.msk.bf16.mxu1 %vm2396_vm9, %v3607_v23  ;;  %v3020_v23 = vld [vmem:[%s4024_s26 + $0x1d0] sm:$0xff]  }
  0xca   : > { %2792 = vmatpush3.bf16.msra.mxu0 %v3014_v32  ;;  %2720 = vmatpush3.bf16.msra.mxu1 %v3017_v48 }
  0xcb   : > { %2797 = vmatprep.subr.bf16.mxu0 %v3016_v34  ;;  %2721 = vmatprep.subr.bf16.mxu1 %v3019_v9 }
  0xcd   : > { %2794 = vmatmul.mubr.msk.bf16.vlgmr.msra.gmra.mrb[0].mxu0 %vm2475_vm15, %v3734_v51  ;;  %v3024_v51 = vld [vmem:[%s4024_s26 + $0x1e0] sm:$0xff]  }
  0xce   : > { %2798 = vmatpush3.bf16.msra.mxu0 %v3016_v34  ;;  %2722 = vmatpush3.bf16.msra.mxu1 %v3019_v9 }
  0xcf   : > { %2799 = vmatprep.subr.bf16.mxu0 %v3018_v59  ;;  %2723 = vmatprep.subr.bf16.mxu1 %v3021_v14 }
  0xd0   : > { %2813 = vmatprep.mubr.bf16.mxu0 %v1742_v47 }
  0xd2   : > { %2800 = vmatpush3.bf16.msra.mxu0 %v3018_v59  ;;  %2724 = vmatpush3.bf16.msra.mxu1 %v3021_v14 }
  0xd3   : > { %2801 = vmatprep.subr.bf16.mxu0 %v3020_v23  ;;  %2725 = vmatprep.subr.bf16.mxu1 %v3023_v44 }
  0xd6   : > { %2802 = vmatpush3.bf16.msra.mxu0 %v3020_v23  ;;  %2726 = vmatpush3.bf16.msra.mxu1 %v3023_v44 }
  0xd7   : > { %2803 = vmatprep.subr.bf16.mxu0 %v3022_v26  ;;  %2727 = vmatprep.subr.bf16.mxu1 %v3025_v63 }
  0xda   : > { %2804 = vmatpush3.bf16.msra.mxu0 %v3022_v26  ;;  %2728 = vmatpush3.bf16.msra.mxu1 %v3025_v63 }
  0xdb   : > { %2805 = vmatprep.subr.bf16.mxu0 %v3024_v51  ;;  %2729 = vmatprep.subr.bf16.mxu1 %v3027_v45 }
  0xde   : > { %2806 = vmatpush3.bf16.msra.mxu0 %v3024_v51  ;;  %2730 = vmatpush3.bf16.msra.mxu1 %v3027_v45 }
  0xdf   : > { %2807 = vmatprep.subr.bf16.mxu0 %v3026_v49  ;;  %2731 = vmatprep.subr.bf16.mxu1 %v3029_v50 }
  0xe2   : > { %2808 = vmatpush3.bf16.msra.mxu0 %v3026_v49  ;;  %2732 = vmatpush3.bf16.msra.mxu1 %v3029_v50 }
  0xe3   : > { %2809 = vmatprep.subr.bf16.mxu0 %v3028_v52 }
  0xe5   : > { %2734 = vmatmul.mubr.msk.bf16.vlgmr.msra.gmra.mrb[0].mxu1 %vm2396_vm9, %v3628_v12  ;;  %v3035_v12 = vld [vmem:[%s4024_s26 + $0x220] sm:$0xff]  }
  0xe6   : > { %2810 = vmatpush3.bf16.msra.mxu0 %v3028_v52 }
  0xe7   : > { %2811 = vmatprep.subr.bf16.mxu0 %v3030_v28 }
  0xea   : > { %2812 = vmatpush3.bf16.msra.mxu0 %v3030_v28 }
  0xeb   : > { %2817 = vmatprep.subr.bf16.mxu0 %v3031_v11 }
  0xed   : > { %2814 = vmatmul.mubr.bf16.vlgmr.msra.gmra.mrb[0].mxu0 %v3825_v39 }
  0xee   : > { %2818 = vmatpush3.bf16.msra.mxu0 %v3031_v11  ;;  %2833 = vmatprep.mubr.bf16.mxu0 %v3812_v36 }
  0xef   : > { %2819 = vmatprep.subr.bf16.mxu0 %v3032_v31 }
  0xf2   : > { %2820 = vmatpush3.bf16.msra.mxu0 %v3032_v31 }
  0xf3   : > { %2821 = vmatprep.subr.bf16.mxu0 %v3033_v54 }
  0xf6   : > { %2822 = vmatpush3.bf16.msra.mxu0 %v3033_v54 }
  0xf7   : > { %2823 = vmatprep.subr.bf16.mxu0 %v3034_v6 }
  0xfa   : > { %2824 = vmatpush3.bf16.msra.mxu0 %v3034_v6 }
  0xfb   : > { %2825 = vmatprep.subr.bf16.mxu0 %v3035_v12 }
  0xfe   : > { %2826 = vmatpush3.bf16.msra.mxu0 %v3035_v12 }
  0xff   : > { %2827 = vmatprep.subr.bf16.mxu0 %v3036_v56 }
 0x102   : > { %2828 = vmatpush3.bf16.msra.mxu0 %v3036_v56 }
 0x103   : > { %2829 = vmatprep.subr.bf16.mxu0 %v3037_v57 }
 0x106   : > { %2830 = vmatpush3.bf16.msra.mxu0 %v3037_v57 }
 0x107   : > { %2831 = vmatprep.subr.bf16.mxu0 %v3038_v53 }
 0x10a   : > { %2832 = vmatpush3.bf16.msra.mxu0 %v3038_v53 }
 0x10d   : > { %2834 = vmatmul.mubr.bf16.vlgmr.msra.gmra.mrb[0].mxu0 %v3822_v22 }
 0x1b8   : > { %v2735_v55 = vpop.f32.mrb[0].mxu1 }
 0x1b9   : > { %v1263_v16 = vpop.f32.mrb[1].mxu1 }
 0x1ba   : > { %v2736_v60 = vpop.f32.mrb[2].mxu1 }
 0x1bb   : > { %v1266_v61 = vpop.f32.mrb[3].mxu1 }
 0x1e0   : > { %v2835_v62 = vpop.f32.mrb[0].mxu0 }
 0x1e1   : > { %v2837_v1 = vadd.f32 %v2835_v62, %v2735_v55  ;;  %v1986_v2 = vpop.f32.mrb[1].mxu0 }
 0x1e2   : > { %v2838_v27 = vadd.f32 %v1986_v2, %v1263_v16  ;;  %v2836_v3 = vpop.f32.mrb[2].mxu0 }
 0x1e3   : > { %2007 = vst [vmem:[%s3341_s22 + $0x10] sm:$0xff] %v2837_v1  ;;  %v2839_v25 = vadd.f32 %v2836_v3, %v2736_v60  ;;  %v1989_v4 = vpop.f32.mrb[3].mxu0  ;;  %v2024_v33 = vmul.f32 %v2837_v1, %v2837_v1 }
 0x1e4   : > { %2005 = vst [vmem:[%s3341_s22] sm:$0xff] %v2838_v27  ;;  %v2840_v5 = vadd.f32 %v1989_v4, %v1266_v61  ;;  %v2022_v7 = vmul.f32 %v2838_v27, %v2838_v27 }
 0x1e5   : > { %2008 = vst [vmem:[%s3341_s22 + $0x18] sm:$0xff] %v2839_v25  ;;  %v2025_v18 = vmul.f32 %v2839_v25, %v2839_v25 }
 0x1e6   : > { %2006 = vst [vmem:[%s3341_s22 + $0x8] sm:$0xff] %v2840_v5  ;;  %v2010_v8 = vadd.f32 %v2840_v5, %v2838_v27  ;;  %v2023_v15 = vmul.f32 %v2840_v5, %v2840_v5 }
 0x1e8   : > { %v2011_v17 = vadd.f32 %v2837_v1, %v2010_v8  ;;  %v2026_v58 = vadd.f32 %v2023_v15, %v2022_v7 }
 0x1ea   : > { %v2012_v19 = vadd.f32 %v2839_v25, %v2011_v17  ;;  %v2027_v20 = vadd.f32 %v2026_v58, %v2024_v33  ;;  %v2093_v32 = vld [vmem:[%s3341_s22 + $0x10] sm:$0xff] (%p3303_p10) }
 0x1eb   : > { %v2089_v42 = vld [vmem:[%s3341_s22] sm:$0xff] (%p3303_p10)  ;;  %2094 = vst [vmem:[%s2055_s19 + $0x100] sm:$0xff] (%p3303_p10), %v2093_v32 }
 0x1ec   : > { %v2013_v21 = vrot.slane %v2012_v19, 4  ;;  %v2028_v24 = vadd.f32 %v2027_v20, %v2025_v18  ;;  %v2095_v48 = vld [vmem:[%s3341_s22 + $0x18] sm:$0xff] (%p3303_p10)  ;;  %2090 = vst [vmem:[%s2055_s19] sm:$0xff] (%p3303_p10), %v2089_v42 }
 0x1ed   : > { %v2091_v43 = vld [vmem:[%s3341_s22 + $0x8] sm:$0xff] (%p3303_p10)  ;;  %2096 = vst [vmem:[%s2055_s19 + $0x108] sm:$0xff] (%p3303_p10), %v2095_v48 }
 0x1ee   : > { %v2014_v29 = vadd.f32 %v2013_v21, %v2012_v19  ;;  %v2029_v30 = vrot.slane %v2028_v24, 4  ;;  %2092 = vst [vmem:[%s2055_s19 + $0x8] sm:$0xff] (%p3303_p10), %v2091_v43 }
 0x1f0   : > { %v2015_v35 = vrot.slane %v2014_v29, 2  ;;  %v2030_v36 = vadd.f32 %v2029_v30, %v2028_v24 }
 0x1f2   : > { %v2016_v37 = vadd.f32 %v2015_v35, %v2014_v29  ;;  %v2031_v0 = vrot.slane %v2030_v36, 2 }
 0x1f4   : > { %v2017_v46 = vrot.slane %v2016_v37, 1  ;;  %v2032_v47 = vadd.f32 %v2031_v0, %v2030_v36 }
 0x1f6   : > { %v2018_v22 = vadd.f32 %v2017_v46, %v2016_v37  ;;  %v2033_v39 = vrot.slane %v2032_v47, 1  ;;  %2049 = sbr.rel (!%p3303_p10) target bundleno = 509 (0x1fd), region = 175 }
 0x1f8   : > { %v2019_v10 = vadd.f32 %v2018_v22, %v2009_v38  ;;  %v2034_v40 = vadd.f32 %v2033_v39, %v2032_v47 }
 0x1fa   : > { %2020 = vst [vmem:[%s4005_s7] sm:$0x1] %v2019_v10  ;;  %v2035_v41 = vadd.f32 %v2034_v40, %v2021_v13 }
 0x1fc   : > { %2036 = vst [vmem:[%s4050_s17] sm:$0x1] %v2035_v41 }
 0x1fd PF: > { %s19_s15 = sadd.s32 1, %s3125_s15   ;;  %s4052_s8 = sld [smem:[#allocation8_spill]] }
 0x1fe   : > { %p16_p10 = scmp.ge.s32.totalorder %s19_s15, 18   ;;  %s4053_s13 = sld [smem:[#allocation7_spill]] }
 0x1ff   : > { %s4054_s23 = sld [smem:[#allocation6_spill]]  ;;  %s4055_s27 = smov %s3089_s28 }
 0x200   : > { %s4056_s28 = smov %s3296_s16  ;;  %s4057_s29 = smov %s3097_s30 }
 0x201   : > { %s4058_s30 = smov %s3299_s24  ;;  %s4059_s9 = smov %s3105_s10 }
 0x202   : > { %s4061_s11 = smov %s3113_s12  ;;  %18 = sbr.rel (!%p16_p10) target bundleno = 12 (0xc), region = 292 }
 0x203   : > { %s4060_s10 = smov %s4052_s8 }
 0x204   : > { %s4062_s12 = smov %s4053_s13  ;;  %s4063_s13 = smov %s3121_s14 }
 0x205   : > { %s4064_s14 = smov %s4054_s23 }

</bundles_post_ra>
